<compile_context>
chip_gen: v7x
topology: tpu7x:2x2x1
jax: 0.10.0
libtpu: 0.0.40
codegen_flags: <defaults>
</compile_context>

<pallas_src>
import functools

import jax
import jax.numpy as jnp
from jax.experimental import pallas as pl
from jax.experimental.pallas import tpu as pltpu

LN_EPS = 1e-5  # nn.LayerNorm default


def ffn_kernel(x_ref, w1_ref, b1_ref, w2_ref, b2_ref, g_ref, beta_ref, o_ref):
    # x block in its stored dtype (bf16 in the fast path); keep an f32 copy
    # for the residual/LayerNorm path and a bf16 copy to feed the MXU.
    x_in = x_ref[...]                                     # (tm, D)
    x_f32 = x_in.astype(jnp.float32)
    x_mx = x_in.astype(jnp.bfloat16)                      # no-op if already bf16

    # Linear1 + ReLU  (bf16 operands, f32 accumulation on the MXU).
    h = jnp.dot(x_mx, w1_ref[...], preferred_element_type=jnp.float32)
    h = jnp.maximum(h + b1_ref[...], 0.0)                 # (tm, dff) f32

    # Linear2  (+ Dropout == identity in eval mode).
    # TODO(synk): training-mode dropout (p=0.1) not implemented; eval semantics.
    y = jnp.dot(h.astype(jnp.bfloat16), w2_ref[...],
                preferred_element_type=jnp.float32) + b2_ref[...]   # (tm, D)

    # Residual + LayerNorm over d_model (biased variance, eps=1e-5), f32 math.
    r = x_f32 + y
    mean = jnp.mean(r, axis=-1, keepdims=True)
    c = r - mean
    var = jnp.mean(c * c, axis=-1, keepdims=True)
    out = c * jax.lax.rsqrt(var + LN_EPS) * g_ref[...] + beta_ref[...]

    o_ref[...] = out.astype(o_ref.dtype)


def _round_up(n, m):
    return (n + m - 1) // m * m


@functools.partial(jax.jit, static_argnames=("tm",))
def ffn_forward(x, w1, b1, w2, b2, gamma, beta, *, tm=512):
    """x: (batch, seq, d_model) -> (batch, seq, d_model), same dtype as x."""
    B, S, D = x.shape
    dff = w1.shape[1]
    N = B * S

    # Row tile: large (>=512 hits ~85% of HBM roofline, amortizing the
    # ~0.35us/step overhead), but capped so the grid has >= 2 steps — v7x has
    # two TensorCores and a 1-step "parallel" grid would leave one idle.
    tm_cap = max(8, _round_up(pl.cdiv(N, 2), 8))
    tm_eff = min(tm, tm_cap)

    x2 = x.reshape(N, D)   # contiguous reshape: free, no extra HBM pass

    # Weights should arrive already in bf16 (cast once at model build/load
    # time); these astypes are no-ops in that case.  Bias / LayerNorm params
    # stay f32 (applied in the f32 epilogue).
    w1_mx = w1.astype(jnp.bfloat16)
    w2_mx = w2.astype(jnp.bfloat16)
    b1_2 = b1.reshape(1, dff).astype(jnp.float32)
    b2_2 = b2.reshape(1, D).astype(jnp.float32)
    g2 = gamma.reshape(1, D).astype(jnp.float32)
    be2 = beta.reshape(1, D).astype(jnp.float32)

    out2 = pl.pallas_call(
        ffn_kernel,
        out_shape=jax.ShapeDtypeStruct((N, D), x.dtype),
        grid_spec=pl.GridSpec(
            grid=(pl.cdiv(N, tm_eff),),          # no input padding needed
            in_specs=[
                pl.BlockSpec((tm_eff, D), lambda i: (i, 0)),   # x rows
                pl.BlockSpec((D, dff), lambda i: (0, 0)),      # W1 (bf16, resident)
                pl.BlockSpec((1, dff), lambda i: (0, 0)),      # b1
                pl.BlockSpec((dff, D), lambda i: (0, 0)),      # W2 (bf16, resident)
                pl.BlockSpec((1, D), lambda i: (0, 0)),        # b2
                pl.BlockSpec((1, D), lambda i: (0, 0)),        # gamma
                pl.BlockSpec((1, D), lambda i: (0, 0)),        # beta
            ],
            out_specs=pl.BlockSpec((tm_eff, D), lambda i: (i, 0)),
        ),
        compiler_params=pltpu.CompilerParams(
            dimension_semantics=("parallel",),
        ),
    )(x2, w1_mx, b1_2, w2_mx, b2_2, g2, be2)

    return out2.reshape(B, S, D)


def reference_ffn(x, w1, b1, w2, b2, gamma, beta):
    h = jnp.maximum(x @ w1 + b1, 0.0)
    y = h @ w2 + b2
    r = x + y
    mean = jnp.mean(r, axis=-1, keepdims=True)
    var = jnp.mean((r - mean) ** 2, axis=-1, keepdims=True)
    return (r - mean) / jnp.sqrt(var + LN_EPS) * gamma + beta


if __name__ == "__main__":
    # Shapes consistent with the module: d_model=256, dff=512.
    # batch*seq = 512 rows -> two 256-row tiles on the grid (both TCs busy on v7x).
    batch, seq, d_model, dff = 4, 128, 256, 512

    key = jax.random.PRNGKey(0)
    kx, k1, kb1, k2, kb2 = jax.random.split(key, 5)

    x_f32 = jax.random.normal(kx, (batch, seq, d_model), dtype=jnp.float32)

    # Deterministic synthetic parameters (uniform init like nn.Linear's scale).
    lim1 = 1.0 / (d_model ** 0.5)
    lim2 = 1.0 / (dff ** 0.5)
    w1 = jax.random.uniform(k1, (d_model, dff), minval=-lim1, maxval=lim1,
                            dtype=jnp.float32)
    b1 = jax.random.uniform(kb1, (dff,), minval=-lim1, maxval=lim1,
                            dtype=jnp.float32)
    w2 = jax.random.uniform(k2, (dff, d_model), minval=-lim2, maxval=lim2,
                            dtype=jnp.float32)
    b2 = jax.random.uniform(kb2, (d_model,), minval=-lim2, maxval=lim2,
                            dtype=jnp.float32)
    gamma = jnp.ones((d_model,), dtype=jnp.float32)   # LayerNorm weight init
    beta = jnp.zeros((d_model,), dtype=jnp.float32)   # LayerNorm bias init

    # One-time weight downcast, hoisted out of the forward call ("model
    # build/load time"), per the performance feedback.
    w1_bf = w1.astype(jnp.bfloat16)
    w2_bf = w2.astype(jnp.bfloat16)

    # ---- f32 activation path (matches the PyTorch module's dtype) ----
    out_f32 = jax.block_until_ready(
        ffn_forward(x_f32, w1_bf, b1, w2_bf, b2, gamma, beta))
    ref_f32 = reference_ffn(x_f32, w1, b1, w2, b2, gamma, beta)
    assert out_f32.shape == (batch, seq, d_model)
    assert out_f32.dtype == x_f32.dtype
    err_f32 = float(jnp.max(jnp.abs(out_f32 - ref_f32)))
    # bf16 MXU operands with f32 accumulation: expect ~1e-2 abs error on the
    # O(1) LayerNorm outputs vs the pure-f32 reference.
    assert jnp.allclose(out_f32, ref_f32, atol=3e-2, rtol=3e-2), (
        f"f32 path mismatch vs reference (max abs err {err_f32})")

    # ---- bf16 activation path (memory-bound production path: halves the
    #      dominant HBM read/write streams; output stored as bf16) ----
    x_bf16 = x_f32.astype(jnp.bfloat16)
    out_bf16 = jax.block_until_ready(
        ffn_forward(x_bf16, w1_bf, b1, w2_bf, b2, gamma, beta))
    ref_bf16 = reference_ffn(x_bf16.astype(jnp.float32), w1, b1, w2, b2, gamma, beta)
    assert out_bf16.dtype == jnp.bfloat16
    err_bf16 = float(jnp.max(jnp.abs(out_bf16.astype(jnp.float32) - ref_bf16)))
    assert jnp.allclose(out_bf16.astype(jnp.float32), ref_bf16,
                        atol=1e-1, rtol=1e-1), (
        f"bf16 path mismatch vs reference (max abs err {err_bf16})")

    print("KERNEL_OK")
</pallas_src>

<mosaic_0001>
module attributes {stable_mosaic.version = 11 : i64} {
  func.func @ffn_kernel(%arg0: i32, %arg1: memref<256x256xf32, #tpu.memory_space<vmem>>, %arg2: memref<256x512xbf16, #tpu.memory_space<vmem>>, %arg3: memref<1x512xf32, #tpu.memory_space<vmem>>, %arg4: memref<512x256xbf16, #tpu.memory_space<vmem>>, %arg5: memref<1x256xf32, #tpu.memory_space<vmem>>, %arg6: memref<1x256xf32, #tpu.memory_space<vmem>>, %arg7: memref<1x256xf32, #tpu.memory_space<vmem>>, %arg8: memref<256x256xf32, #tpu.memory_space<vmem>>) attributes {dimension_semantics = [#tpu.dimension_semantics<parallel>], iteration_bounds = array<i64: 2>, scalar_prefetch = 0 : i64, scratch_operands = 0 : i64, tpu.core_type = #tpu.core_type<tc>, window_params = [{transform_indices = @transform_0, window_bounds = array<i64: 256, 256>}, {pipeline_mode = #tpu.pipeline_mode<synchronous>, transform_indices = @transform_1, window_bounds = array<i64: 256, 512>}, {pipeline_mode = #tpu.pipeline_mode<synchronous>, transform_indices = @transform_2, window_bounds = array<i64: 1, 512>}, {pipeline_mode = #tpu.pipeline_mode<synchronous>, transform_indices = @transform_3, window_bounds = array<i64: 512, 256>}, {pipeline_mode = #tpu.pipeline_mode<synchronous>, transform_indices = @transform_4, window_bounds = array<i64: 1, 256>}, {pipeline_mode = #tpu.pipeline_mode<synchronous>, transform_indices = @transform_5, window_bounds = array<i64: 1, 256>}, {pipeline_mode = #tpu.pipeline_mode<synchronous>, transform_indices = @transform_6, window_bounds = array<i64: 1, 256>}, {transform_indices = @transform_7, window_bounds = array<i64: 256, 256>}]} {
    %c0 = arith.constant 0 : index
    %c0_0 = arith.constant 0 : index
    %0 = vector.load %arg1[%c0, %c0_0] : memref<256x256xf32, #tpu.memory_space<vmem>>, vector<256x256xf32>
    %1 = arith.truncf %0 : vector<256x256xf32> to vector<256x256xbf16>
    %c0_1 = arith.constant 0 : index
    %c0_2 = arith.constant 0 : index
    %2 = vector.load %arg2[%c0_1, %c0_2] : memref<256x512xbf16, #tpu.memory_space<vmem>>, vector<256x512xbf16>
    %cst = arith.constant dense<0.000000e+00> : vector<256x512xf32>
    %3 = tpu.matmul %1, %2, %cst {dimension_numbers = #tpu.dot_dimension_numbers<[1], [0], [0], [1], [0, 0, 1, 1], [], []>} : vector<256x256xbf16>, vector<256x512xbf16>, vector<256x512xf32> -> vector<256x512xf32>
    %c0_3 = arith.constant 0 : index
    %c0_4 = arith.constant 0 : index
    %4 = vector.load %arg3[%c0_3, %c0_4] : memref<1x512xf32, #tpu.memory_space<vmem>>, vector<1x512xf32>
    %5 = vector.broadcast %4 : vector<1x512xf32> to vector<256x512xf32>
    %6 = arith.addf %3, %5 : vector<256x512xf32>
    %cst_5 = arith.constant 0.000000e+00 : f32
    %7 = vector.broadcast %cst_5 : f32 to vector<256x512xf32>
    %8 = arith.maximumf %6, %7 : vector<256x512xf32>
    %9 = arith.truncf %8 : vector<256x512xf32> to vector<256x512xbf16>
    %c0_6 = arith.constant 0 : index
    %c0_7 = arith.constant 0 : index
    %10 = vector.load %arg4[%c0_6, %c0_7] : memref<512x256xbf16, #tpu.memory_space<vmem>>, vector<512x256xbf16>
    %cst_8 = arith.constant dense<0.000000e+00> : vector<256x256xf32>
    %11 = tpu.matmul %9, %10, %cst_8 {dimension_numbers = #tpu.dot_dimension_numbers<[1], [0], [0], [1], [0, 0, 1, 1], [], []>} : vector<256x512xbf16>, vector<512x256xbf16>, vector<256x256xf32> -> vector<256x256xf32>
    %c0_9 = arith.constant 0 : index
    %c0_10 = arith.constant 0 : index
    %12 = vector.load %arg5[%c0_9, %c0_10] : memref<1x256xf32, #tpu.memory_space<vmem>>, vector<1x256xf32>
    %13 = vector.broadcast %12 : vector<1x256xf32> to vector<256x256xf32>
    %14 = arith.addf %11, %13 : vector<256x256xf32>
    %15 = arith.addf %0, %14 : vector<256x256xf32>
    %cst_11 = arith.constant dense<0.000000e+00> : vector<256xf32>
    %16 = vector.multi_reduction <add>, %15, %cst_11 [1] : vector<256x256xf32> to vector<256xf32>
    %17 = vector.shape_cast %16 : vector<256xf32> to vector<256x1xf32>
    %cst_12 = arith.constant 2.560000e+02 : f32
    %18 = vector.broadcast %cst_12 : f32 to vector<256x1xf32>
    %19 = arith.divf %17, %18 : vector<256x1xf32>
    %20 = vector.broadcast %19 : vector<256x1xf32> to vector<256x256xf32>
    %21 = arith.subf %15, %20 : vector<256x256xf32>
    %22 = arith.mulf %21, %21 : vector<256x256xf32>
    %cst_13 = arith.constant dense<0.000000e+00> : vector<256xf32>
    %23 = vector.multi_reduction <add>, %22, %cst_13 [1] : vector<256x256xf32> to vector<256xf32>
    %24 = vector.shape_cast %23 : vector<256xf32> to vector<256x1xf32>
    %cst_14 = arith.constant 2.560000e+02 : f32
    %25 = vector.broadcast %cst_14 : f32 to vector<256x1xf32>
    %26 = arith.divf %24, %25 : vector<256x1xf32>
    %cst_15 = arith.constant 9.99999974E-6 : f32
    %27 = vector.broadcast %cst_15 : f32 to vector<256x1xf32>
    %28 = arith.addf %26, %27 : vector<256x1xf32>
    %29 = math.rsqrt %28 : vector<256x1xf32>
    %30 = vector.broadcast %29 : vector<256x1xf32> to vector<256x256xf32>
    %31 = arith.mulf %21, %30 : vector<256x256xf32>
    %c0_16 = arith.constant 0 : index
    %c0_17 = arith.constant 0 : index
    %32 = vector.load %arg6[%c0_16, %c0_17] : memref<1x256xf32, #tpu.memory_space<vmem>>, vector<1x256xf32>
    %33 = vector.broadcast %32 : vector<1x256xf32> to vector<256x256xf32>
    %34 = arith.mulf %31, %33 : vector<256x256xf32>
    %c0_18 = arith.constant 0 : index
    %c0_19 = arith.constant 0 : index
    %35 = vector.load %arg7[%c0_18, %c0_19] : memref<1x256xf32, #tpu.memory_space<vmem>>, vector<1x256xf32>
    %36 = vector.broadcast %35 : vector<1x256xf32> to vector<256x256xf32>
    %37 = arith.addf %34, %36 : vector<256x256xf32>
    %c0_20 = arith.constant 0 : index
    %c0_21 = arith.constant 0 : index
    %38 = vector.load %arg8[%c0_20, %c0_21] : memref<256x256xf32, #tpu.memory_space<vmem>>, vector<256x256xf32>
    tpu.vector_store %arg8[%c0_20, %c0_21], %37 {strides = array<i32>} : memref<256x256xf32, #tpu.memory_space<vmem>>, vector<256x256xf32>,
    return
  }
  func.func @transform_0(%arg0: i32) -> (i32, i32) {
    %c0_i32 = arith.constant 0 : i32
    %c0_i32_0 = arith.constant 0 : i32
    return %arg0, %c0_i32 : i32, i32
  }
  func.func @transform_1(%arg0: i32) -> (i32, i32) {
    %c0_i32 = arith.constant 0 : i32
    %c0_i32_0 = arith.constant 0 : i32
    %c0_i32_1 = arith.constant 0 : i32
    return %c0_i32, %c0_i32_0 : i32, i32
  }
  func.func @transform_2(%arg0: i32) -> (i32, i32) {
    %c0_i32 = arith.constant 0 : i32
    %c0_i32_0 = arith.constant 0 : i32
    %c0_i32_1 = arith.constant 0 : i32
    return %c0_i32, %c0_i32_0 : i32, i32
  }
  func.func @transform_3(%arg0: i32) -> (i32, i32) {
    %c0_i32 = arith.constant 0 : i32
    %c0_i32_0 = arith.constant 0 : i32
    %c0_i32_1 = arith.constant 0 : i32
    return %c0_i32, %c0_i32_0 : i32, i32
  }
  func.func @transform_4(%arg0: i32) -> (i32, i32) {
    %c0_i32 = arith.constant 0 : i32
    %c0_i32_0 = arith.constant 0 : i32
    %c0_i32_1 = arith.constant 0 : i32
    return %c0_i32, %c0_i32_0 : i32, i32
  }
  func.func @transform_5(%arg0: i32) -> (i32, i32) {
    %c0_i32 = arith.constant 0 : i32
    %c0_i32_0 = arith.constant 0 : i32
    %c0_i32_1 = arith.constant 0 : i32
    return %c0_i32, %c0_i32_0 : i32, i32
  }
  func.func @transform_6(%arg0: i32) -> (i32, i32) {
    %c0_i32 = arith.constant 0 : i32
    %c0_i32_0 = arith.constant 0 : i32
    %c0_i32_1 = arith.constant 0 : i32
    return %c0_i32, %c0_i32_0 : i32, i32
  }
  func.func @transform_7(%arg0: i32) -> (i32, i32) {
    %c0_i32 = arith.constant 0 : i32
    %c0_i32_0 = arith.constant 0 : i32
    return %arg0, %c0_i32 : i32, i32
  }
}

</mosaic_0001>

<bundles_post_ra>
// kernel: ffn_forward.1
= control target key start
LH: loop header
LB: loop body
LE: loop exit
PB: predicated region body
PF: predicated region fallthrough
CT: control target
= control target key end

     0   :  { %12 = vsyncpa [#allocation3], 0  ;;  %s5493_s0 = inlined_call_operand.hbm [shape: f32[512,256], index: 0, kind: input, shape index: {}]   ;;  %s5494_s1 = inlined_call_operand.hbm [shape: bf16[256,512], index: 1, kind: input, shape index: {}]   ;;  %s5495_s2 = inlined_call_operand.vmem [shape: f32[1,512], index: 2, kind: input, shape index: {}]   ;;  %s5496_s3 = inlined_call_operand.hbm [shape: bf16[512,256], index: 3, kind: input, shape index: {}]   ;;  %s5497_s4 = inlined_call_operand.vmem [shape: f32[1,256], index: 4, kind: input, shape index: {}]   ;;  %s5498_s5 = inlined_call_operand.vmem [shape: f32[1,256], index: 5, kind: input, shape index: {}]   ;;  %s5499_s6 = inlined_call_operand.vmem [shape: f32[1,256], index: 6, kind: input, shape index: {}]   ;;  %s5500_s7 = inlined_call_operand.hbm [shape: f32[512,256], index: 7, kind: output, shape index: {}]  }
   0x1   :  { %14 = vsyncpa [#allocation3 + $0x1], 0 }
   0x2   :  { %15 = vsyncpa [#allocation6], 0 }
   0x3   :  { %16 = vsyncpa [#allocation4], 0 }
   0x4   :  { %18 = vsyncpa [#allocation4 + $0x1], 0  ;;  %s3972_s24 = smov 0   ;;  %s3974_s25 = smov 0  }
   0x5   :  { %s3976_s26 = smov 0   ;;  %s3978_s27 = smov 0  }
   0x6 LB: > { %s3993_s28 = sadd.s32 4294967295, %s3920_s27   ;;  %s3091_s29 = sadd.s32 4294967294, %s3920_s27   ;;  %s3920_s27 = sphi %s3978_s27, %s5629_s27   ;;  %s3916_s26 = sphi %s3976_s26, %s5628_s26   ;;  %s3912_s25 = sphi %s3974_s25, %s5627_s25   ;;  %s3908_s24 = sphi %s3972_s24, %s5626_s24  }
   0x7   : > { %p44_p0 = scmp.ne.s32.totalorder %s3912_s25, %s3908_s24  ;;  %p5501_p1 = scmp.eq.s32.totalorder %s3993_s28, 0 }
   0x8   : > { %p200_p3 = scmp.eq.s32.totalorder %s3091_s29, 1  ;;  %p3092_p5 = scmp.ge.s32.totalorder %s3920_s27, 1 }
   0x9   : > { %p4002_p4 = por %p5501_p1, %p44_p0  ;;  %p207_p7 = scmp.lt.s32.totalorder %s3920_s27, 3 }
   0xa   : > { %p4007_p6 = por %p200_p3, %p44_p0  ;;  %s3922_s10 = smov [#allocation5]  }
   0xb   : > { %s5542_s30 = scalar_select %p4002_p4, 1, 0 }
   0xc   : > { %s5543_s8 = scalar_select %p4007_p6, 1, 0 }
   0xd   : > { %p4012_p8 = pnand %p3092_p5, %p207_p7  ;;  %s219_s11 = sshll.u32 %s3922_s10, 4  ;;  %s4016_s11 = int_to_ptr.vmem [resolvable:$true] %s219_s11 }
   0xe   : > { %s3923_s13 = smov [#allocation7]   ;;  %s3764_s17 = scalar_lea.hbm %s5494_s1, 8192 }
   0xf   : > { %p3383_p9 = pneg %p4012_p8  ;;  %s235_s14 = sshll.u32 %s3923_s13, 4  ;;  %s4027_s14 = int_to_ptr.vmem [resolvable:$true] %s235_s14 }
  0x10   : > { %p3765_p12 = scmp.ne.s32.totalorder %s5494_s1, %s3764_s17  ;;  %p3771_p5 = scmp.lt.u32.totalorder %s3764_s17, %s5494_s1 }
  0x11   : > { %p4023_p11 = pnand %p3383_p9, %p5501_p1 }
  0x13   : > { %p3766_p13 = pneg %p4023_p11 }
  0x15   : > { %p3767_p0 = pnand %p3766_p13, %p3765_p12 }
  0x17   : > { %p3768_p3 = pneg %p3767_p0 }
  0x19   : > { %p3773_p7 = pnand %p3771_p5, %p3768_p3 }
  0x1b   : > { %3776 = shalt.err (!%p3773_p7)
}
  0x1c   : > { %s3777_s22 = scalar_lea.vmem %s4016_s11, 8192  ;;  %p3785_p2 = scmp.lt.s32.totalorder %s4016_s11, %s4016_s11 }
  0x1d   : > { %p3778_p9 = scmp.ne.s32.totalorder %s4016_s11, %s3777_s22  ;;  %p3786_p12 = scmp.lt.s32.totalorder %s3777_s22, %s3777_s22 }
  0x1f   : > { %p3780_p10 = pnand %p3778_p9, %p3766_p13  ;;  %p3787_p0 = por %p3786_p12, %p3785_p2 }
  0x21   : > { %p3781_p1 = pneg %p3780_p10 }
  0x23   : > { %p3788_p6 = pnand %p3787_p0, %p3781_p1 }
  0x25   : > { %3791 = shalt.err (!%p3788_p6)
}
  0x26   : > { %s5502_s23 = smov 256   ;;  %s3925_s29 = smov 16  }
  0x27   : > { %3386 = dma.hbm_to_vmem [thread:$0]  (!%p4023_p11), %s5494_s1, 8192, %s4016_s11, [#allocation6], %s5502_s23, %s5502_s23, %s3925_s29  }
  0x28   : > { %s3792_s17 = scalar_lea.hbm %s5496_s3, 8192 }
  0x29   : > { %p3793_p1 = scmp.ne.s32.totalorder %s5496_s3, %s3792_s17  ;;  %p3799_p10 = scmp.lt.u32.totalorder %s3792_s17, %s5496_s3 }
  0x2b   : > { %p3795_p2 = pnand %p3793_p1, %p3766_p13 }
  0x2d   : > { %p3796_p6 = pneg %p3795_p2 }
  0x2f   : > { %p3801_p3 = pnand %p3799_p10, %p3796_p6 }
  0x31   : > { %3804 = shalt.err (!%p3801_p3)
}
  0x32   : > { %s3805_s11 = scalar_lea.vmem %s4027_s14, 8192  ;;  %p3813_p12 = scmp.lt.s32.totalorder %s4027_s14, %s4027_s14 }
  0x33   : > { %p3806_p5 = scmp.ne.s32.totalorder %s4027_s14, %s3805_s11  ;;  %p3814_p0 = scmp.lt.s32.totalorder %s3805_s11, %s3805_s11 }
  0x35   : > { %p3808_p7 = pnand %p3806_p5, %p3766_p13  ;;  %p3815_p1 = por %p3814_p0, %p3813_p12 }
  0x37   : > { %p3809_p9 = pneg %p3808_p7 }
  0x39   : > { %p3816_p2 = pnand %p3815_p1, %p3809_p9 }
  0x3b   : > { %3819 = shalt.err (!%p3816_p2)
}
  0x3c   : > { %s3926_s22 = smov 128   ;;  %s3927_s10 = smov 8  }
  0x3d   : > { %3389 = dma.hbm_to_vmem [thread:$0]  (!%p4023_p11), %s5496_s3, 8192, %s4027_s14, [#allocation6], %s3926_s22, %s3926_s22, %s3927_s10  }
  0x3e   : > { %s4085_s16 = sadd.s32 1, %s3920_s27   ;;  %s31_s18 = sadd.s32 1, %s3916_s26 }
  0x3f   : > { %s28_s17 = ssub.s32 %s3920_s27, %s4085_s16  ;;  %p38_p6 = scmp.ne.s32.totalorder %s3916_s26, %s3912_s25 }
  0x40   : > { %p29_p13 = scmp.eq.s32.totalorder %s28_s17, 0  ;;  %p39_p10 = scmp.eq.s32.totalorder %s3920_s27, 0 }
  0x41   : > { %p5546_p5 = scmp.eq.s32.totalorder %s3993_s28, 1  ;;  %p3400_p9 = scmp.lt.s32.totalorder %s3920_s27, 2 }
  0x42   : > { %s4094_s19 = scalar_select %p29_p13, %s3916_s26, %s31_s18  }
  0x43   : > { %p40_p3 = por %p39_p10, %p38_p6  ;;  %p4098_p7 = por %p5546_p5, %p38_p6 }
  0x44   : > { %s258_s12 = sand.u32 1, %s3916_s26   ;;  %s3240_s14 = sshll.u32 %s3920_s27, 13 }
  0x45   : > { %s5547_s20 = scalar_select %p4098_p7, 1, 0 }
  0x46   : > { %s3096_s21 = sshll.u32 %s258_s12, 9  ;;  %s4108_s10 = scalar_lea.hbm %s5493_s0, %s3240_s14 }
  0x47   : > { %s262_s13 = scalar_lea.vmem [#allocation2], %s3096_s21  ;;  %p4112_p11 = pnand %p3400_p9, %p40_p3 }
  0x48   : > { %s270_s15 = sshll.u32 %s262_s13, 4  ;;  %s4116_s18 = scalar_lea.sflag [#allocation3], %s258_s12  ;;  %s4110_s15 = int_to_ptr.vmem [resolvable:$true] %s270_s15 }
  0x49   : > { %s3820_s23 = scalar_lea.hbm %s4108_s10, 8192  ;;  %p3822_p0 = pneg %p4112_p11 }
  0x4a   : > { %p3821_p12 = scmp.ne.s32.totalorder %s4108_s10, %s3820_s23  ;;  %s3825_s11 = scalar_lea.hbm %s5493_s0, 16384 }
  0x4b   : > { %p3826_p13 = scmp.lt.u32.totalorder %s4108_s10, %s5493_s0  ;;  %p3827_p6 = scmp.lt.u32.totalorder %s3825_s11, %s3820_s23 }
  0x4c   : > { %p3823_p1 = pnand %p3822_p0, %p3821_p12  ;;  %p3829_p3 = scmp.lt.u32.totalorder %s3820_s23, %s4108_s10 }
  0x4d   : > { %p3828_p10 = por %p3827_p6, %p3826_p13 }
  0x4e   : > { %p3824_p2 = pneg %p3823_p1 }
  0x4f   : > { %p3830_p5 = por %p3829_p3, %p3828_p10 }
  0x51   : > { %p3831_p9 = pnand %p3830_p5, %p3824_p2 }
  0x53   : > { %3834 = shalt.err (!%p3831_p9)
}
  0x54   : > { %s3835_s12 = scalar_lea.vmem %s4110_s15, 8192  ;;  %s3928_s21 = smov [#allocation2]  }
  0x55   : > { %p3836_p12 = scmp.ne.s32.totalorder %s4110_s15, %s3835_s12  ;;  %s3840_s14 = sshll.u32 %s3928_s21, 4  ;;  %s3841_s14 = int_to_ptr.vmem [resolvable:$false] %s3840_s14 }
  0x56   : > { %s3842_s22 = scalar_lea.vmem %s3841_s14, 16384  ;;  %p3843_p4 = scmp.lt.s32.totalorder %s4110_s15, %s3841_s14 }
  0x57   : > { %p3838_p1 = pnand %p3836_p12, %p3822_p0  ;;  %p3844_p13 = scmp.lt.s32.totalorder %s3842_s22, %s3835_s12 }
  0x59   : > { %p3839_p7 = pneg %p3838_p1  ;;  %p3845_p6 = por %p3844_p13, %p3843_p4 }
  0x5b   : > { %p3846_p10 = pnand %p3845_p6, %p3839_p7 }
  0x5d   : > { %3849 = shalt.err (!%p3846_p10)
}
  0x5e   : > { %s5549_s23 = smov 256   ;;  %282 = sbr.rel (%p4012_p8) target bundleno = 1192 (0x4a8), region = 48 }
  0x5f   : > { %3393 = dma.hbm_to_vmem [thread:$0]  (!%p4112_p11), %s4108_s10, 8192, %s4110_s15, %s4116_s18, %s5549_s23, %s5549_s23, %s3925_s29  }
  0x65   : > { %s4150_s11 = sand.u32 1, %s3912_s25   ;;  %p5550_p4 = scmp.ne.s32.totalorder %s5542_s30, 0 }
  0x66   : > { %s3101_s13 = sshll.u32 %s4150_s11, 9  ;;  %s285_s12 = scalar_lea.sflag [#allocation3], %s4150_s11 }
  0x67   : > { %s4156_s17 = scalar_lea.vmem [#allocation2], %s3101_s13 }
  0x68   : > { %3895 = dma.done.wait (%p5550_p4), %s285_s12, 8192  }
  0x69   : > { %3897 = vsyncadd (%p5550_p4), %s285_s12, 4294959104  ;;  %p5551_p7 = scmp.eq.s32.totalorder %s3993_s28, 0 }
  0x6b   : > { %3899 = dma.done.wait (%p5551_p7), [#allocation6], 16384   ;;  %p5552_p8 = pmov %p5551_p7 }
  0x6c   : > { %v3444_v0 = vld [vmem:[#allocation5 + $0x4] ss:$16 sps:$4 sm:$0xff]   ;;  %v3446_v1 = vld [vmem:[#allocation5] ss:$16 sps:$4 sm:$0xff]   ;;  %v330_v13 = vld [vmem:[%s4156_s17 + $0x8] sm:$0xff]  ;;  %s5192_s22 = scalar_lea.vmem [#allocation8], %s3101_s13 }
  0x6d   : > { %3901 = vsyncadd (%p5552_p8), [#allocation6], 4294950912  ;;  %831 = vmatprep.subr.bf16.mxu1 %v3444_v0  ;;  %v3447_v2 = vld [vmem:[#allocation5 + $0x24] ss:$16 sps:$4 sm:$0xff]   ;;  %v3449_v3 = vld [vmem:[#allocation5 + $0x20] ss:$16 sps:$4 sm:$0xff]  }
  0x6e   : > { %832 = vmatpush1.bf16.msra.mxu1 %v3446_v1  ;;  %v3450_v4 = vld [vmem:[#allocation5 + $0x44] ss:$16 sps:$4 sm:$0xff]   ;;  %v3452_v5 = vld [vmem:[#allocation5 + $0x40] ss:$16 sps:$4 sm:$0xff]   ;;  %v332_v14 = vld [vmem:[%s4156_s17 + $0x18] sm:$0xff]  ;;  %s3242_s23 = sshll.u32 %s3993_s28, 13 }
  0x6f   : > { %833 = vmatprep.subr.bf16.mxu1 %v3447_v2  ;;  %v3453_v6 = vld [vmem:[#allocation5 + $0x64] ss:$16 sps:$4 sm:$0xff]   ;;  %v3455_v7 = vld [vmem:[#allocation5 + $0x60] ss:$16 sps:$4 sm:$0xff]   ;;  %v4168_v15 = vpack.c.bf16 %v332_v14, %v330_v13  ;;  %v3494_v37 = vld [vmem:[#allocation5 + $0xc] ss:$16 sps:$4 sm:$0xff]   ;;  %s5441_s30 = scalar_lea.hbm %s5500_s7, %s3242_s23 }
  0x70   : > { %v3456_v8 = vld [vmem:[#allocation5 + $0x84] ss:$16 sps:$4 sm:$0xff]   ;;  %v3458_v9 = vld [vmem:[#allocation5 + $0x80] ss:$16 sps:$4 sm:$0xff]   ;;  %v334_v38 = vld [vmem:[%s4156_s17 + $0x28] sm:$0xff]  ;;  %s2999_s13 = sshll.u32 %s5192_s22, 4  ;;  %s5443_s13 = int_to_ptr.vmem [resolvable:$true] %s2999_s13 }
  0x71   : > { %v3459_v10 = vld [vmem:[#allocation5 + $0xa4] ss:$16 sps:$4 sm:$0xff]   ;;  %v3461_v11 = vld [vmem:[#allocation5 + $0xa0] ss:$16 sps:$4 sm:$0xff]   ;;  %863 = vmatprep.mubr.bf16.mxu1 %v4168_v15  ;;  %v336_v39 = vld [vmem:[%s4156_s17 + $0x38] sm:$0xff]  ;;  %s2985_s28 = scalar_lea.sflag [#allocation4], %s4150_s11 }
  0x72   : > { %834 = vmatpush1.bf16.msra.mxu1 %v3449_v3  ;;  %v3462_v12 = vld [vmem:[#allocation5 + $0xc4] ss:$16 sps:$4 sm:$0xff]   ;;  %v3464_v16 = vld [vmem:[#allocation5 + $0xc0] ss:$16 sps:$4 sm:$0xff]   ;;  %v3492_v41 = vld [vmem:[#allocation5 + $0x8] ss:$16 sps:$4 sm:$0xff]   ;;  %v4177_v42 = vpack.c.bf16 %v336_v39, %v334_v38 }
  0x73   : > { %835 = vmatprep.subr.bf16.mxu1 %v3450_v4  ;;  %v3465_v17 = vld [vmem:[#allocation5 + $0xe4] ss:$16 sps:$4 sm:$0xff]   ;;  %v3467_v18 = vld [vmem:[#allocation5 + $0xe0] ss:$16 sps:$4 sm:$0xff]   ;;  %v3497_v43 = vld [vmem:[#allocation5 + $0x2c] ss:$16 sps:$4 sm:$0xff]  }
  0x74   : > { %v3468_v19 = vld [vmem:[#allocation5 + $0x104] ss:$16 sps:$4 sm:$0xff]   ;;  %v3470_v20 = vld [vmem:[#allocation5 + $0x100] ss:$16 sps:$4 sm:$0xff]   ;;  %v3495_v46 = vld [vmem:[#allocation5 + $0x28] ss:$16 sps:$4 sm:$0xff]  }
  0x75   : > { %v3471_v21 = vld [vmem:[#allocation5 + $0x124] ss:$16 sps:$4 sm:$0xff]   ;;  %v3473_v22 = vld [vmem:[#allocation5 + $0x120] ss:$16 sps:$4 sm:$0xff]   ;;  %v338_v47 = vld [vmem:[%s4156_s17 + $0x48] sm:$0xff]  ;;  %s3850_s9 = scalar_lea.vmem %s5443_s13, 8192 }
  0x76   : > { %836 = vmatpush1.bf16.msra.mxu1 %v3452_v5  ;;  %v3474_v23 = vld [vmem:[#allocation5 + $0x144] ss:$16 sps:$4 sm:$0xff]   ;;  %v3476_v24 = vld [vmem:[#allocation5 + $0x140] ss:$16 sps:$4 sm:$0xff]   ;;  %v340_v48 = vld [vmem:[%s4156_s17 + $0x58] sm:$0xff]  ;;  %p3851_p11 = scmp.ne.s32.totalorder %s5443_s13, %s3850_s9  ;;  %p5623_p0 = scmp.ne.s32.totalorder %s5547_s20, 0 }
  0x77   : > { %837 = vmatprep.subr.bf16.mxu1 %v3453_v6  ;;  %v3477_v25 = vld [vmem:[#allocation5 + $0x164] ss:$16 sps:$4 sm:$0xff]   ;;  %v3479_v26 = vld [vmem:[#allocation5 + $0x160] ss:$16 sps:$4 sm:$0xff]   ;;  %v3500_v49 = vld [vmem:[#allocation5 + $0x4c] ss:$16 sps:$4 sm:$0xff]   ;;  %v4187_v53 = vpack.c.bf16 %v340_v48, %v338_v47 }
  0x78   : > { %v3480_v27 = vld [vmem:[#allocation5 + $0x184] ss:$16 sps:$4 sm:$0xff]   ;;  %v3482_v28 = vld [vmem:[#allocation5 + $0x180] ss:$16 sps:$4 sm:$0xff]   ;;  %v3498_v50 = vld [vmem:[#allocation5 + $0x48] ss:$16 sps:$4 sm:$0xff]   ;;  %p3852_p2 = pnand %p3851_p11, %p5623_p0 }
  0x79   : > { %v3483_v29 = vld [vmem:[#allocation5 + $0x1a4] ss:$16 sps:$4 sm:$0xff]   ;;  %v3485_v30 = vld [vmem:[#allocation5 + $0x1a0] ss:$16 sps:$4 sm:$0xff]   ;;  %v3503_v52 = vld [vmem:[#allocation5 + $0x6c] ss:$16 sps:$4 sm:$0xff]  }
  0x7a   : > { %838 = vmatpush1.bf16.msra.mxu1 %v3455_v7  ;;  %v3486_v31 = vld [vmem:[#allocation5 + $0x1c4] ss:$16 sps:$4 sm:$0xff]   ;;  %v3488_v32 = vld [vmem:[#allocation5 + $0x1c0] ss:$16 sps:$4 sm:$0xff]   ;;  %v3501_v56 = vld [vmem:[#allocation5 + $0x68] ss:$16 sps:$4 sm:$0xff]   ;;  %p3853_p3 = pneg %p3852_p2 }
  0x7b   : > { %839 = vmatprep.subr.bf16.mxu1 %v3456_v8  ;;  %v3489_v33 = vld [vmem:[#allocation5 + $0x1e4] ss:$16 sps:$4 sm:$0xff]   ;;  %v3491_v34 = vld [vmem:[#allocation5 + $0x1e0] ss:$16 sps:$4 sm:$0xff]   ;;  %v342_v57 = vld [vmem:[%s4156_s17 + $0x68] sm:$0xff]  ;;  %s3929_s29 = smov [#allocation8]  }
  0x7c   : > { %v329_v35 = vld [vmem:[%s4156_s17] sm:$0xff]  ;;  %v331_v36 = vld [vmem:[%s4156_s17 + $0x10] sm:$0xff]  ;;  %v344_v58 = vld [vmem:[%s4156_s17 + $0x78] sm:$0xff]  ;;  %s3854_s10 = sshll.u32 %s3929_s29, 4  ;;  %s3855_s10 = int_to_ptr.vmem [resolvable:$false] %s3854_s10 }
  0x7d   : > { %v4175_v40 = vpack.c.bf16 %v331_v36, %v329_v35  ;;  %v333_v44 = vld [vmem:[%s4156_s17 + $0x20] sm:$0xff]  ;;  %v335_v45 = vld [vmem:[%s4156_s17 + $0x30] sm:$0xff]  ;;  %v3506_v59 = vld [vmem:[#allocation5 + $0x8c] ss:$16 sps:$4 sm:$0xff]   ;;  %v4197_v63 = vpack.c.bf16 %v344_v58, %v342_v57  ;;  %s3856_s15 = scalar_lea.vmem %s3855_s10, 16384  ;;  %p3857_p5 = scmp.lt.s32.totalorder %s5443_s13, %s3855_s10 }
  0x7e   : > { %840 = vmatpush1.bf16.msra.mxu1 %v3458_v9  ;;  %v4185_v51 = vpack.c.bf16 %v335_v45, %v333_v44  ;;  %v337_v54 = vld [vmem:[%s4156_s17 + $0x40] sm:$0xff]  ;;  %v339_v55 = vld [vmem:[%s4156_s17 + $0x50] sm:$0xff]  ;;  %v3504_v60 = vld [vmem:[#allocation5 + $0x88] ss:$16 sps:$4 sm:$0xff]   ;;  %p3858_p9 = scmp.lt.s32.totalorder %s3856_s15, %s3850_s9 }
  0x7f   : > { %841 = vmatprep.subr.bf16.mxu1 %v3459_v10  ;;  %v4195_v61 = vpack.c.bf16 %v339_v55, %v337_v54  ;;  %v3509_v62 = vld [vmem:[#allocation5 + $0xac] ss:$16 sps:$4 sm:$0xff]   ;;  %v341_v0 = vld [vmem:[%s4156_s17 + $0x60] sm:$0xff]  ;;  %v343_v1 = vld [vmem:[%s4156_s17 + $0x70] sm:$0xff] }
  0x80   : > { %v3507_v2 = vld [vmem:[#allocation5 + $0xa8] ss:$16 sps:$4 sm:$0xff]   ;;  %v3512_v5 = vld [vmem:[#allocation5 + $0xcc] ss:$16 sps:$4 sm:$0xff]   ;;  %v4205_v6 = vpack.c.bf16 %v343_v1, %v341_v0  ;;  %v345_v10 = vld [vmem:[%s4156_s17 + $0x80] sm:$0xff]  ;;  %p3859_p12 = por %p3858_p9, %p3857_p5 }
  0x81   : > { %v346_v3 = vld [vmem:[%s4156_s17 + $0x88] sm:$0xff]  ;;  %v348_v4 = vld [vmem:[%s4156_s17 + $0x98] sm:$0xff]  ;;  %v357_v58 = vld [vmem:[%s4156_s17 + $0xe0] sm:$0xff] }
  0x82   : > { %842 = vmatpush1.bf16.msra.mxu1 %v3461_v11  ;;  %v4207_v7 = vpack.c.bf16 %v348_v4, %v346_v3  ;;  %v3510_v8 = vld [vmem:[#allocation5 + $0xc8] ss:$16 sps:$4 sm:$0xff]   ;;  %v3515_v9 = vld [vmem:[#allocation5 + $0xec] ss:$16 sps:$4 sm:$0xff]   ;;  %p3860_p1 = pnand %p3859_p12, %p3853_p3 }
  0x83   : > { %843 = vmatprep.subr.bf16.mxu1 %v3462_v12  ;;  %v3540_v11 = vld [vmem:[#allocation7 + $0x4] ss:$8 sps:$4 sm:$0xff]   ;;  %v347_v12 = vld [vmem:[%s4156_s17 + $0x90] sm:$0xff]  ;;  %v3513_v13 = vld [vmem:[#allocation5 + $0xe8] ss:$16 sps:$4 sm:$0xff]  }
  0x84   : > { %v3542_v14 = vld [vmem:[#allocation7] ss:$8 sps:$4 sm:$0xff]   ;;  %1805 = vmatprep.subr.bf16.mxu0 %v3540_v11  ;;  %v3527_v36 = vld [vmem:[#allocation5 + $0x16c] ss:$16 sps:$4 sm:$0xff]   ;;  %v3551_v38 = vld [vmem:[#allocation7 + $0x30] ss:$8 sps:$4 sm:$0xff]  }
  0x85   : > { %1806 = vmatpush1.bf16.msra.mxu0 %v3542_v14  ;;  %v3522_v35 = vld [vmem:[#allocation5 + $0x148] ss:$16 sps:$4 sm:$0xff]   ;;  %v3552_v39 = vld [vmem:[#allocation7 + $0x44] ss:$8 sps:$4 sm:$0xff]   ;;  %v3555_v55 = vld [vmem:[#allocation7 + $0x54] ss:$8 sps:$4 sm:$0xff]  }
  0x86   : > { %844 = vmatpush1.bf16.msra.mxu1 %v3464_v16  ;;  %v350_v16 = vld [vmem:[%s4156_s17 + $0xa8] sm:$0xff]  ;;  %v364_v0 = vld [vmem:[%s4156_s17 + $0x118] sm:$0xff] }
  0x87   : > { %845 = vmatprep.subr.bf16.mxu1 %v3465_v17  ;;  %v352_v17 = vld [vmem:[%s4156_s17 + $0xb8] sm:$0xff]  ;;  %v358_v45 = vld [vmem:[%s4156_s17 + $0xe8] sm:$0xff] }
  0x88   : > { %v3525_v44 = vld [vmem:[#allocation5 + $0x168] ss:$16 sps:$4 sm:$0xff]   ;;  %v3530_v47 = vld [vmem:[#allocation5 + $0x18c] ss:$16 sps:$4 sm:$0xff]  }
  0x89   : > { %v3554_v48 = vld [vmem:[#allocation7 + $0x40] ss:$8 sps:$4 sm:$0xff]   ;;  %v3533_v54 = vld [vmem:[#allocation5 + $0x1ac] ss:$16 sps:$4 sm:$0xff]  }
  0x8a   : > { %846 = vmatpush1.bf16.msra.mxu1 %v3467_v18  ;;  %v3518_v18 = vld [vmem:[#allocation5 + $0x10c] ss:$16 sps:$4 sm:$0xff]   ;;  %v3537_v14 = vld [vmem:[#allocation5 + $0x1e8] ss:$16 sps:$4 sm:$0xff]  }
  0x8b   : > { %847 = vmatprep.subr.bf16.mxu1 %v3468_v19  ;;  %v4215_v19 = vpack.c.bf16 %v347_v12, %v345_v10  ;;  %v3558_v57 = vld [vmem:[#allocation7 + $0x64] ss:$8 sps:$4 sm:$0xff]   ;;  %v3563_v10 = vld [vmem:[#allocation7 + $0x70] ss:$8 sps:$4 sm:$0xff]  }
  0x8c   : > { %v3536_v1 = vld [vmem:[#allocation5 + $0x1cc] ss:$16 sps:$4 sm:$0xff]   ;;  %v361_v12 = vld [vmem:[%s4156_s17 + $0x100] sm:$0xff] }
  0x8d   : > { %v3564_v11 = vld [vmem:[#allocation7 + $0x84] ss:$8 sps:$4 sm:$0xff]  }
  0x8e   : > { %848 = vmatpush1.bf16.msra.mxu1 %v3470_v20  ;;  %v4217_v20 = vpack.c.bf16 %v352_v17, %v350_v16  ;;  %v366_v16 = vld [vmem:[%s4156_s17 + $0x128] sm:$0xff]  ;;  %v368_v17 = vld [vmem:[%s4156_s17 + $0x138] sm:$0xff] }
  0x8f   : > { %849 = vmatprep.subr.bf16.mxu1 %v3471_v21  ;;  %v3516_v21 = vld [vmem:[#allocation5 + $0x108] ss:$16 sps:$4 sm:$0xff]  }
  0x92   : > { %850 = vmatpush1.bf16.msra.mxu1 %v3473_v22  ;;  %v3521_v22 = vld [vmem:[#allocation5 + $0x12c] ss:$16 sps:$4 sm:$0xff]  }
  0x93   : > { %851 = vmatprep.subr.bf16.mxu1 %v3474_v23  ;;  %v3543_v23 = vld [vmem:[#allocation7 + $0x14] ss:$8 sps:$4 sm:$0xff]  }
  0x94   : > { %1807 = vmatprep.subr.bf16.mxu0 %v3543_v23  ;;  %v3567_v23 = vld [vmem:[#allocation7 + $0x94] ss:$8 sps:$4 sm:$0xff]  }
  0x96   : > { %852 = vmatpush1.bf16.msra.mxu1 %v3476_v24  ;;  %v3545_v24 = vld [vmem:[#allocation7 + $0x10] ss:$8 sps:$4 sm:$0xff]  }
  0x97   : > { %853 = vmatprep.subr.bf16.mxu1 %v3477_v25  ;;  %v3546_v25 = vld [vmem:[#allocation7 + $0x24] ss:$8 sps:$4 sm:$0xff]   ;;  %1808 = vmatpush1.bf16.msra.mxu0 %v3545_v24  ;;  %v3569_v24 = vld [vmem:[#allocation7 + $0x90] ss:$8 sps:$4 sm:$0xff]  }
  0x98   : > { %1809 = vmatprep.subr.bf16.mxu0 %v3546_v25  ;;  %v3570_v25 = vld [vmem:[#allocation7 + $0xa4] ss:$8 sps:$4 sm:$0xff]  }
  0x9a   : > { %854 = vmatpush1.bf16.msra.mxu1 %v3479_v26  ;;  %v349_v26 = vld [vmem:[%s4156_s17 + $0xa0] sm:$0xff] }
  0x9b   : > { %855 = vmatprep.subr.bf16.mxu1 %v3480_v27  ;;  %v351_v27 = vld [vmem:[%s4156_s17 + $0xb0] sm:$0xff] }
  0x9e   : > { %856 = vmatpush1.bf16.msra.mxu1 %v3482_v28  ;;  %v3519_v28 = vld [vmem:[#allocation5 + $0x128] ss:$16 sps:$4 sm:$0xff]  }
  0x9f   : > { %857 = vmatprep.subr.bf16.mxu1 %v3483_v29  ;;  %v354_v29 = vld [vmem:[%s4156_s17 + $0xc8] sm:$0xff] }
  0xa2   : > { %858 = vmatpush1.bf16.msra.mxu1 %v3485_v30  ;;  %v356_v30 = vld [vmem:[%s4156_s17 + $0xd8] sm:$0xff] }
  0xa3   : > { %859 = vmatprep.subr.bf16.mxu1 %v3486_v31  ;;  %v3524_v31 = vld [vmem:[#allocation5 + $0x14c] ss:$16 sps:$4 sm:$0xff]  }
  0xa6   : > { %860 = vmatpush1.bf16.msra.mxu1 %v3488_v32  ;;  %v3548_v32 = vld [vmem:[#allocation7 + $0x20] ss:$8 sps:$4 sm:$0xff]  }
  0xa7   : > { %861 = vmatprep.subr.bf16.mxu1 %v3489_v33  ;;  %v4225_v33 = vpack.c.bf16 %v351_v27, %v349_v26  ;;  %1810 = vmatpush1.bf16.msra.mxu0 %v3548_v32  ;;  %v365_v26 = vld [vmem:[%s4156_s17 + $0x120] sm:$0xff]  ;;  %v367_v27 = vld [vmem:[%s4156_s17 + $0x130] sm:$0xff] }
  0xaa   : > { %862 = vmatpush1.bf16.msra.mxu1 %v3491_v34  ;;  %v4227_v34 = vpack.c.bf16 %v356_v30, %v354_v29  ;;  %v372_v29 = vld [vmem:[%s4156_s17 + $0x158] sm:$0xff]  ;;  %v3572_v30 = vld [vmem:[#allocation7 + $0xa0] ss:$8 sps:$4 sm:$0xff]  }
  0xab   : > { %1024 = vmatprep.subr.bf16.mxu1 %v3494_v37  ;;  %v3549_v37 = vld [vmem:[#allocation7 + $0x34] ss:$8 sps:$4 sm:$0xff]  }
  0xac   : > { %1811 = vmatprep.subr.bf16.mxu0 %v3549_v37  ;;  %v3576_v37 = vld [vmem:[#allocation7 + $0xc4] ss:$8 sps:$4 sm:$0xff]  }
  0xad   : > { %864 = vmatmul.mubr.bf16.vlgmr.msra.gmra.mrb[0].mxu1 %v4175_v40  ;;  %1812 = vmatpush1.bf16.msra.mxu0 %v3551_v38  ;;  %v369_v38 = vld [vmem:[%s4156_s17 + $0x140] sm:$0xff] }
  0xae   : > { %1025 = vmatpush1.bf16.msra.mxu1 %v3492_v41  ;;  %873 = vmatprep.mubr.bf16.mxu1 %v4177_v42  ;;  %v353_v41 = vld [vmem:[%s4156_s17 + $0xc0] sm:$0xff] }
  0xaf   : > { %1026 = vmatprep.subr.bf16.mxu1 %v3497_v43  ;;  %v355_v43 = vld [vmem:[%s4156_s17 + $0xd0] sm:$0xff]  ;;  %1813 = vmatprep.subr.bf16.mxu0 %v3552_v39 }
  0xb0   : > { %v371_v39 = vld [vmem:[%s4156_s17 + $0x150] sm:$0xff] }
  0xb1   : > { %1814 = vmatpush1.bf16.msra.mxu0 %v3554_v48  ;;  %v373_v48 = vld [vmem:[%s4156_s17 + $0x160] sm:$0xff] }
  0xb2   : > { %1027 = vmatpush1.bf16.msra.mxu1 %v3495_v46  ;;  %v360_v46 = vld [vmem:[%s4156_s17 + $0xf8] sm:$0xff]  ;;  %1815 = vmatprep.subr.bf16.mxu0 %v3555_v55  ;;  %v378_v55 = vld [vmem:[%s4156_s17 + $0x188] sm:$0xff] }
  0xb3   : > { %1028 = vmatprep.subr.bf16.mxu1 %v3500_v49  ;;  %v4235_v49 = vpack.c.bf16 %v355_v43, %v353_v41  ;;  %v374_v41 = vld [vmem:[%s4156_s17 + $0x168] sm:$0xff]  ;;  %v376_v43 = vld [vmem:[%s4156_s17 + $0x178] sm:$0xff] }
  0xb5   : > { %874 = vmatmul.mubr.bf16.gmra.mrb[4].mxu1 %v4185_v51 }
  0xb6   : > { %883 = vmatprep.mubr.bf16.mxu1 %v4187_v53  ;;  %1029 = vmatpush1.bf16.msra.mxu1 %v3498_v50  ;;  %v4237_v50 = vpack.c.bf16 %v360_v46, %v358_v45  ;;  %v4275_v45 = vpack.c.bf16 %v371_v39, %v369_v38  ;;  %v4277_v46 = vpack.c.bf16 %v376_v43, %v374_v41  ;;  %v3593_v41 = vld [vmem:[#allocation7 + $0x114] ss:$8 sps:$4 sm:$0xff]  }
  0xb7   : > { %1030 = vmatprep.subr.bf16.mxu1 %v3503_v52  ;;  %v3528_v52 = vld [vmem:[#allocation5 + $0x188] ss:$16 sps:$4 sm:$0xff]  }
  0xba   : > { %1031 = vmatpush1.bf16.msra.mxu1 %v3501_v56  ;;  %v3557_v56 = vld [vmem:[#allocation7 + $0x50] ss:$8 sps:$4 sm:$0xff]  }
  0xbb   : > { %1032 = vmatprep.subr.bf16.mxu1 %v3506_v59  ;;  %v359_v59 = vld [vmem:[%s4156_s17 + $0xf0] sm:$0xff]  ;;  %1816 = vmatpush1.bf16.msra.mxu0 %v3557_v56  ;;  %v380_v56 = vld [vmem:[%s4156_s17 + $0x198] sm:$0xff] }
  0xbc   : > { %v4245_v3 = vpack.c.bf16 %v359_v59, %v357_v58  ;;  %1817 = vmatprep.subr.bf16.mxu0 %v3558_v57  ;;  %v3582_v58 = vld [vmem:[#allocation7 + $0xe4] ss:$8 sps:$4 sm:$0xff]   ;;  %v4287_v59 = vpack.c.bf16 %v380_v56, %v378_v55 }
  0xbd   : > { %884 = vmatmul.mubr.bf16.gmra.mrb[8].mxu1 %v4195_v61  ;;  %v3596_v55 = vld [vmem:[#allocation7 + $0x124] ss:$8 sps:$4 sm:$0xff]  }
  0xbe   : > { %893 = vmatprep.mubr.bf16.mxu1 %v4197_v63  ;;  %1033 = vmatpush1.bf16.msra.mxu1 %v3504_v60  ;;  %v3531_v60 = vld [vmem:[#allocation5 + $0x1a8] ss:$16 sps:$4 sm:$0xff]  }
  0xbf   : > { %1034 = vmatprep.subr.bf16.mxu1 %v3509_v62  ;;  %v362_v62 = vld [vmem:[%s4156_s17 + $0x108] sm:$0xff] }
  0xc0   : > { %v4247_v4 = vpack.c.bf16 %v364_v0, %v362_v62  ;;  %v3585_v62 = vld [vmem:[#allocation7 + $0xf4] ss:$8 sps:$4 sm:$0xff]   ;;  %v377_v0 = vld [vmem:[%s4156_s17 + $0x180] sm:$0xff] }
  0xc2   : > { %1035 = vmatpush1.bf16.msra.mxu1 %v3507_v2  ;;  %v3560_v2 = vld [vmem:[#allocation7 + $0x60] ss:$8 sps:$4 sm:$0xff]  }
  0xc3   : > { %1036 = vmatprep.subr.bf16.mxu1 %v3512_v5  ;;  %v3534_v5 = vld [vmem:[#allocation5 + $0x1c8] ss:$16 sps:$4 sm:$0xff]   ;;  %1818 = vmatpush1.bf16.msra.mxu0 %v3560_v2 }
  0xc4   : > { %v3587_v2 = vld [vmem:[#allocation7 + $0xf0] ss:$8 sps:$4 sm:$0xff]  }
  0xc5   : > { %894 = vmatmul.mubr.bf16.gmra.mrb[12].mxu1 %v4205_v6 }
  0xc6   : > { %903 = vmatprep.mubr.bf16.mxu1 %v4207_v7  ;;  %1037 = vmatpush1.bf16.msra.mxu1 %v3510_v8  ;;  %v3539_v8 = vld [vmem:[#allocation5 + $0x1ec] ss:$16 sps:$4 sm:$0xff]  }
  0xc7   : > { %1038 = vmatprep.subr.bf16.mxu1 %v3515_v9  ;;  %v3561_v9 = vld [vmem:[#allocation7 + $0x74] ss:$8 sps:$4 sm:$0xff]  }
  0xc8   : > { %1819 = vmatprep.subr.bf16.mxu0 %v3561_v9 }
  0xc9   : > { %1820 = vmatpush1.bf16.msra.mxu0 %v3563_v10 }
  0xca   : > { %1039 = vmatpush1.bf16.msra.mxu1 %v3513_v13  ;;  %v363_v13 = vld [vmem:[%s4156_s17 + $0x110] sm:$0xff]  ;;  %1821 = vmatprep.subr.bf16.mxu0 %v3564_v11  ;;  %v381_v11 = vld [vmem:[%s4156_s17 + $0x1a0] sm:$0xff] }
  0xcb   : > { %1040 = vmatprep.subr.bf16.mxu1 %v3518_v18  ;;  %v3566_v18 = vld [vmem:[#allocation7 + $0x80] ss:$8 sps:$4 sm:$0xff]  }
  0xcd   : > { %904 = vmatmul.mubr.bf16.gmra.mrb[16].mxu1 %v4215_v19  ;;  %1822 = vmatpush1.bf16.msra.mxu0 %v3566_v18 }
  0xce   : > { %913 = vmatprep.mubr.bf16.mxu1 %v4217_v20  ;;  %1041 = vmatpush1.bf16.msra.mxu1 %v3516_v21  ;;  %v4255_v21 = vpack.c.bf16 %v363_v13, %v361_v12  ;;  %v383_v12 = vld [vmem:[%s4156_s17 + $0x1b0] sm:$0xff]  ;;  %v386_v13 = vld [vmem:[%s4156_s17 + $0x1c8] sm:$0xff] }
  0xcf   : > { %1042 = vmatprep.subr.bf16.mxu1 %v3521_v22  ;;  %v4257_v22 = vpack.c.bf16 %v368_v17, %v366_v16  ;;  %1823 = vmatprep.subr.bf16.mxu0 %v3567_v23  ;;  %v3590_v16 = vld [vmem:[#allocation7 + $0x104] ss:$8 sps:$4 sm:$0xff]   ;;  %v4305_v17 = vpack.c.bf16 %v383_v12, %v381_v11  ;;  %v3597_v12 = vld [vmem:[#allocation7 + $0x130] ss:$8 sps:$4 sm:$0xff]  }
  0xd0   : > { %v385_v23 = vld [vmem:[%s4156_s17 + $0x1c0] sm:$0xff] }
  0xd1   : > { %1824 = vmatpush1.bf16.msra.mxu0 %v3569_v24  ;;  %v387_v24 = vld [vmem:[%s4156_s17 + $0x1d0] sm:$0xff] }
  0xd2   : > { %1043 = vmatpush1.bf16.msra.mxu1 %v3519_v28  ;;  %v370_v28 = vld [vmem:[%s4156_s17 + $0x148] sm:$0xff]  ;;  %1825 = vmatprep.subr.bf16.mxu0 %v3570_v25 }
  0xd3   : > { %1044 = vmatprep.subr.bf16.mxu1 %v3524_v31  ;;  %v4265_v31 = vpack.c.bf16 %v367_v27, %v365_v26  ;;  %v4267_v32 = vpack.c.bf16 %v372_v29, %v370_v28  ;;  %v390_v25 = vld [vmem:[%s4156_s17 + $0x1e8] sm:$0xff]  ;;  %v392_v26 = vld [vmem:[%s4156_s17 + $0x1f8] sm:$0xff]  ;;  %v4315_v27 = vpack.c.bf16 %v387_v24, %v385_v23  ;;  %v389_v29 = vld [vmem:[%s4156_s17 + $0x1e0] sm:$0xff] }
  0xd4   : > { %v4317_v28 = vpack.c.bf16 %v392_v26, %v390_v25 }
  0xd5   : > { %914 = vmatmul.mubr.bf16.gmra.mrb[20].mxu1 %v4225_v33  ;;  %1826 = vmatpush1.bf16.msra.mxu0 %v3572_v30  ;;  %v391_v30 = vld [vmem:[%s4156_s17 + $0x1f0] sm:$0xff] }
  0xd6   : > { %923 = vmatprep.mubr.bf16.mxu1 %v4227_v34  ;;  %1045 = vmatpush1.bf16.msra.mxu1 %v3522_v35  ;;  %v3573_v35 = vld [vmem:[#allocation7 + $0xb4] ss:$8 sps:$4 sm:$0xff]  }
  0xd7   : > { %1046 = vmatprep.subr.bf16.mxu1 %v3527_v36  ;;  %v3575_v36 = vld [vmem:[#allocation7 + $0xb0] ss:$8 sps:$4 sm:$0xff]   ;;  %1827 = vmatprep.subr.bf16.mxu0 %v3573_v35  ;;  %v4323_v35 = vpack.c.bf16 %v391_v30, %v389_v29  ;;  %v3600_v30 = vld [vmem:[#allocation7 + $0x140] ss:$8 sps:$4 sm:$0xff]  }
  0xd9   : > { %1828 = vmatpush1.bf16.msra.mxu0 %v3575_v36 }
  0xda   : > { %1047 = vmatpush1.bf16.msra.mxu1 %v3525_v44  ;;  %v3578_v44 = vld [vmem:[#allocation7 + $0xc0] ss:$8 sps:$4 sm:$0xff]   ;;  %1829 = vmatprep.subr.bf16.mxu0 %v3576_v37 }
  0xdb   : > { %1048 = vmatprep.subr.bf16.mxu1 %v3530_v47  ;;  %v3579_v47 = vld [vmem:[#allocation7 + $0xd4] ss:$8 sps:$4 sm:$0xff]   ;;  %v3588_v37 = vld [vmem:[#allocation7 + $0x100] ss:$8 sps:$4 sm:$0xff]  }
  0xdd   : > { %924 = vmatmul.mubr.bf16.gmra.mrb[24].mxu1 %v4235_v49  ;;  %1830 = vmatpush1.bf16.msra.mxu0 %v3578_v44 }
  0xde   : > { %933 = vmatprep.mubr.bf16.mxu1 %v4237_v50  ;;  %1049 = vmatpush1.bf16.msra.mxu1 %v3528_v52  ;;  %v375_v52 = vld [vmem:[%s4156_s17 + $0x170] sm:$0xff] }
  0xdf   : > { %1050 = vmatprep.subr.bf16.mxu1 %v3533_v54  ;;  %v3581_v54 = vld [vmem:[#allocation7 + $0xd0] ss:$8 sps:$4 sm:$0xff]   ;;  %1831 = vmatprep.subr.bf16.mxu0 %v3579_v47  ;;  %v4285_v57 = vpack.c.bf16 %v375_v52, %v373_v48 }
  0xe0   : > { %v3591_v48 = vld [vmem:[#allocation7 + $0x110] ss:$8 sps:$4 sm:$0xff]  }
  0xe1   : > { %1832 = vmatpush1.bf16.msra.mxu0 %v3581_v54 }
  0xe2   : > { %1051 = vmatpush1.bf16.msra.mxu1 %v3531_v60  ;;  %v3584_v60 = vld [vmem:[#allocation7 + $0xe0] ss:$8 sps:$4 sm:$0xff]   ;;  %1833 = vmatprep.subr.bf16.mxu0 %v3582_v58 }
  0xe3   : > { %1052 = vmatprep.subr.bf16.mxu1 %v3536_v1  ;;  %v379_v1 = vld [vmem:[%s4156_s17 + $0x190] sm:$0xff] }
  0xe4   : > { %v4295_v9 = vpack.c.bf16 %v379_v1, %v377_v0 }
  0xe5   : > { %934 = vmatmul.mubr.bf16.gmra.mrb[28].mxu1 %v4245_v3  ;;  %1834 = vmatpush1.bf16.msra.mxu0 %v3584_v60 }
  0xe6   : > { %943 = vmatprep.mubr.bf16.mxu1 %v4247_v4  ;;  %1053 = vmatpush1.bf16.msra.mxu1 %v3534_v5  ;;  %v382_v5 = vld [vmem:[%s4156_s17 + $0x1a8] sm:$0xff] }
  0xe7   : > { %1054 = vmatprep.subr.bf16.mxu1 %v3539_v8  ;;  %v384_v8 = vld [vmem:[%s4156_s17 + $0x1b8] sm:$0xff]  ;;  %1835 = vmatprep.subr.bf16.mxu0 %v3585_v62  ;;  %v3594_v62 = vld [vmem:[#allocation7 + $0x120] ss:$8 sps:$4 sm:$0xff]  }
  0xe8   : > { %v4297_v10 = vpack.c.bf16 %v384_v8, %v382_v5 }
  0xe9   : > { %1836 = vmatpush1.bf16.msra.mxu0 %v3587_v2  ;;  %v3599_v2 = vld [vmem:[#allocation7 + $0x134] ss:$8 sps:$4 sm:$0xff]  }
  0xea   : > { %1055 = vmatpush1.bf16.msra.mxu1 %v3537_v14  ;;  %v388_v14 = vld [vmem:[%s4156_s17 + $0x1d8] sm:$0xff]  ;;  %1998 = vmatprep.subr.bf16.mxu0 %v3590_v16  ;;  %v3602_v16 = vld [vmem:[#allocation7 + $0x144] ss:$8 sps:$4 sm:$0xff]  }
  0xeb   : > { %v4307_v18 = vpack.c.bf16 %v388_v14, %v386_v13 }
  0xed   : > { %944 = vmatmul.mubr.bf16.gmra.mrb[32].mxu1 %v4255_v21 }
  0xee   : > { %953 = vmatprep.mubr.bf16.mxu1 %v4257_v22 }
  0xf5   : > { %954 = vmatmul.mubr.bf16.gmra.mrb[36].mxu1 %v4265_v31 }
  0xf6   : > { %963 = vmatprep.mubr.bf16.mxu1 %v4267_v32 }
  0xfd   : > { %964 = vmatmul.mubr.bf16.gmra.mrb[40].mxu1 %v4275_v45 }
  0xfe   : > { %973 = vmatprep.mubr.bf16.mxu1 %v4277_v46 }
 0x105   : > { %974 = vmatmul.mubr.bf16.gmra.mrb[44].mxu1 %v4285_v57 }
 0x106   : > { %983 = vmatprep.mubr.bf16.mxu1 %v4287_v59 }
 0x10d   : > { %984 = vmatmul.mubr.bf16.gmra.mrb[48].mxu1 %v4295_v9 }
 0x10e   : > { %993 = vmatprep.mubr.bf16.mxu1 %v4297_v10 }
 0x115   : > { %994 = vmatmul.mubr.bf16.gmra.mrb[52].mxu1 %v4305_v17 }
 0x116   : > { %1003 = vmatprep.mubr.bf16.mxu1 %v4307_v18 }
 0x11d   : > { %1004 = vmatmul.mubr.bf16.gmra.mrb[56].mxu1 %v4315_v27 }
 0x11e   : > { %1013 = vmatprep.mubr.bf16.mxu1 %v4317_v28 }
 0x125   : > { %1014 = vmatmul.mubr.bf16.gmra.mrb[60].mxu1 %v4323_v35 }
 0x126   : > { %1056 = vmatprep.mubr.bf16.mxu1 %v4168_v15  ;;  %v491_v15 = vlaneseq }
 0x12d   : > { %1057 = vmatmul.mubr.bf16.vlgmr.msra.gmra.mrb[64].mxu1 %v4175_v40  ;;  %v4346_v40 = vshrl.u32 %v491_v15, 7 }
 0x12e   : > { %1066 = vmatprep.mubr.bf16.mxu1 %v4177_v42 }
 0x12f   : > { %v4350_v42 = vsub.s32 0, %v4346_v40 }
 0x131   : > { %5553 = vst [vmem:[#allocation12_spill] sm:$0xff] %v4350_v42 }
 0x135   : > { %1067 = vmatmul.mubr.bf16.gmra.mrb[68].mxu1 %v4185_v51  ;;  %v4355_v51 = vld [vmem:[%s5495_s2] sm:$0xf] }
 0x136   : > { %1076 = vmatprep.mubr.bf16.mxu1 %v4187_v53  ;;  %v4358_v53 = vsub.s32 1, %v4346_v40 }
 0x138   : > { %5554 = vst [vmem:[#allocation13_spill] sm:$0xff] %v4358_v53 }
 0x13d   : > { %1077 = vmatmul.mubr.bf16.gmra.mrb[72].mxu1 %v4195_v61  ;;  %v4363_v61 = vrot.slane %v4355_v51, %v4350_v42 }
 0x13e   : > { %1086 = vmatprep.mubr.bf16.mxu1 %v4197_v63  ;;  %v4367_v63 = vrot.slane %v4355_v51, %v4358_v53 }
 0x145   : > { %1087 = vmatmul.mubr.bf16.gmra.mrb[76].mxu1 %v4205_v6 }
 0x146   : > { %1096 = vmatprep.mubr.bf16.mxu1 %v4207_v7 }
 0x14d   : > { %1097 = vmatmul.mubr.bf16.gmra.mrb[80].mxu1 %v4215_v19 }
 0x14e   : > { %1106 = vmatprep.mubr.bf16.mxu1 %v4217_v20 }
 0x155   : > { %1107 = vmatmul.mubr.bf16.gmra.mrb[84].mxu1 %v4225_v33 }
 0x156   : > { %1116 = vmatprep.mubr.bf16.mxu1 %v4227_v34 }
 0x15d   : > { %1117 = vmatmul.mubr.bf16.gmra.mrb[88].mxu1 %v4235_v49 }
 0x15e   : > { %1126 = vmatprep.mubr.bf16.mxu1 %v4237_v50 }
 0x165   : > { %1127 = vmatmul.mubr.bf16.gmra.mrb[92].mxu1 %v4245_v3 }
 0x166   : > { %1136 = vmatprep.mubr.bf16.mxu1 %v4247_v4 }
 0x16d   : > { %1137 = vmatmul.mubr.bf16.gmra.mrb[96].mxu1 %v4255_v21 }
 0x16e   : > { %1146 = vmatprep.mubr.bf16.mxu1 %v4257_v22 }
 0x175   : > { %1147 = vmatmul.mubr.bf16.gmra.mrb[100].mxu1 %v4265_v31 }
 0x176   : > { %1156 = vmatprep.mubr.bf16.mxu1 %v4267_v32 }
 0x17d   : > { %1157 = vmatmul.mubr.bf16.gmra.mrb[104].mxu1 %v4275_v45 }
 0x17e   : > { %1166 = vmatprep.mubr.bf16.mxu1 %v4277_v46 }
 0x180   : > { %v865_v6 = vpop.f32.mrb[0].mxu1 }
 0x181   : > { %v866_v7 = vadd.f32 %v865_v6, %v4363_v61  ;;  %v867_v19 = vpop.f32.mrb[1].mxu1 }
 0x182   : > { %v868_v20 = vadd.f32 %v867_v19, %v4367_v63  ;;  %v869_v33 = vpop.f32.mrb[2].mxu1 }
 0x183   : > { %v870_v34 = vadd.f32 %v869_v33, %v4363_v61  ;;  %v871_v49 = vpop.f32.mrb[3].mxu1  ;;  %v1217_v3 = vmax.f32 %v866_v7, 0.0  ;;  %v3605_v7 = vld [vmem:[#allocation7 + $0x154] ss:$8 sps:$4 sm:$0xff]  }
 0x184   : > { %v872_v50 = vadd.f32 %v871_v49, %v4367_v63  ;;  %v1218_v21 = vmax.f32 %v868_v20, 0.0 }
 0x185   : > { %v1221_v4 = vmax.f32 %v870_v34, 0.0  ;;  %1167 = vmatmul.mubr.bf16.gmra.mrb[108].mxu1 %v4285_v57  ;;  %v3603_v34 = vld [vmem:[#allocation7 + $0x150] ss:$8 sps:$4 sm:$0xff]  }
 0x186   : > { %v1222_v22 = vmax.f32 %v872_v50, 0.0  ;;  %1176 = vmatprep.mubr.bf16.mxu1 %v4287_v59 }
 0x187   : > { %v1345_v31 = vpack.c.bf16 %v1221_v4, %v1217_v3  ;;  %v3608_v3 = vld [vmem:[#allocation7 + $0x164] ss:$8 sps:$4 sm:$0xff]  }
 0x188   : > { %v875_v32 = vpop.f32.mrb[4].mxu1  ;;  %v1346_v36 = vpack.c.bf16 %v1222_v22, %v1218_v21 }
 0x189   : > { %v876_v38 = vadd.f32 %v875_v32, %v4363_v61  ;;  %v877_v39 = vpop.f32.mrb[5].mxu1 }
 0x18a   : > { %v878_v43 = vadd.f32 %v877_v39, %v4367_v63  ;;  %v879_v44 = vpop.f32.mrb[6].mxu1  ;;  %1837 = vmatprep.mubr.bf16.mxu0 %v1346_v36  ;;  %v3606_v36 = vld [vmem:[#allocation7 + $0x160] ss:$8 sps:$4 sm:$0xff]   ;;  %v3611_v39 = vld [vmem:[#allocation7 + $0x174] ss:$8 sps:$4 sm:$0xff]  }
 0x18b   : > { %v880_v45 = vadd.f32 %v879_v44, %v4363_v61  ;;  %v881_v46 = vpop.f32.mrb[7].mxu1  ;;  %1838 = vmatmul.mubr.bf16.vlgmr.msra.gmra.mrb[0].mxu0 %v1345_v31  ;;  %v1225_v52 = vmax.f32 %v876_v38, 0.0 }
 0x18c   : > { %v882_v47 = vadd.f32 %v881_v46, %v4367_v63  ;;  %1999 = vmatpush1.bf16.msra.mxu0 %v3588_v37  ;;  %v1226_v56 = vmax.f32 %v878_v43, 0.0 }
 0x18d   : > { %v1229_v54 = vmax.f32 %v880_v45, 0.0  ;;  %1177 = vmatmul.mubr.bf16.gmra.mrb[112].mxu1 %v4295_v9  ;;  %2000 = vmatprep.subr.bf16.mxu0 %v3593_v41  ;;  %v3609_v45 = vld [vmem:[#allocation7 + $0x170] ss:$8 sps:$4 sm:$0xff]  }
 0x18e   : > { %v1230_v57 = vmax.f32 %v882_v47, 0.0  ;;  %1186 = vmatprep.mubr.bf16.mxu1 %v4297_v10 }
 0x18f   : > { %v1349_v58 = vpack.c.bf16 %v1229_v54, %v1225_v52 }
 0x190   : > { %v1350_v59 = vpack.c.bf16 %v1230_v57, %v1226_v56  ;;  %v885_v60 = vpop.f32.mrb[8].mxu1  ;;  %2001 = vmatpush1.bf16.msra.mxu0 %v3591_v48  ;;  %v3614_v48 = vld [vmem:[#allocation7 + $0x184] ss:$8 sps:$4 sm:$0xff]  }
 0x191   : > { %v886_v0 = vadd.f32 %v885_v60, %v4363_v61  ;;  %v887_v1 = vpop.f32.mrb[9].mxu1  ;;  %2002 = vmatprep.subr.bf16.mxu0 %v3596_v55 }
 0x192   : > { %v888_v5 = vadd.f32 %v887_v1, %v4367_v63  ;;  %v889_v8 = vpop.f32.mrb[10].mxu1  ;;  %1847 = vmatprep.mubr.bf16.mxu0 %v1350_v59 }
 0x193   : > { %v890_v9 = vadd.f32 %v889_v8, %v4363_v61  ;;  %v891_v11 = vpop.f32.mrb[11].mxu1  ;;  %1848 = vmatmul.mubr.bf16.gmra.mrb[4].mxu0 %v1349_v58  ;;  %v1233_v13 = vmax.f32 %v886_v0, 0.0  ;;  %v3612_v58 = vld [vmem:[#allocation7 + $0x180] ss:$8 sps:$4 sm:$0xff]   ;;  %v3615_v8 = vld [vmem:[#allocation7 + $0x190] ss:$8 sps:$4 sm:$0xff]  }
 0x194   : > { %v892_v10 = vadd.f32 %v891_v11, %v4367_v63  ;;  %2003 = vmatpush1.bf16.msra.mxu0 %v3594_v62  ;;  %v1234_v23 = vmax.f32 %v888_v5, 0.0  ;;  %v3617_v62 = vld [vmem:[#allocation7 + $0x194] ss:$8 sps:$4 sm:$0xff]  }
 0x195   : > { %v1237_v14 = vmax.f32 %v890_v9, 0.0  ;;  %1187 = vmatmul.mubr.bf16.gmra.mrb[116].mxu1 %v4305_v17  ;;  %2004 = vmatprep.subr.bf16.mxu0 %v3599_v2 }
 0x196   : > { %v1238_v24 = vmax.f32 %v892_v10, 0.0  ;;  %1196 = vmatprep.mubr.bf16.mxu1 %v4307_v18  ;;  %v3620_v10 = vld [vmem:[#allocation7 + $0x1a4] ss:$8 sps:$4 sm:$0xff]  }
 0x197   : > { %v1353_v25 = vpack.c.bf16 %v1237_v14, %v1233_v13 }
 0x198   : > { %v1354_v26 = vpack.c.bf16 %v1238_v24, %v1234_v23  ;;  %v895_v29 = vpop.f32.mrb[12].mxu1  ;;  %2005 = vmatpush1.bf16.msra.mxu0 %v3597_v12  ;;  %v3618_v24 = vld [vmem:[#allocation7 + $0x1a0] ss:$8 sps:$4 sm:$0xff]  }
 0x199   : > { %v896_v15 = vadd.f32 %v895_v29, %v4363_v61  ;;  %v897_v6 = vpop.f32.mrb[13].mxu1  ;;  %2006 = vmatprep.subr.bf16.mxu0 %v3602_v16  ;;  %v3623_v29 = vld [vmem:[#allocation7 + $0x1b4] ss:$8 sps:$4 sm:$0xff]  }
 0x19a   : > { %v898_v19 = vadd.f32 %v897_v6, %v4367_v63  ;;  %v899_v20 = vpop.f32.mrb[14].mxu1  ;;  %1857 = vmatprep.mubr.bf16.mxu0 %v1354_v26 }
 0x19b   : > { %v900_v17 = vadd.f32 %v899_v20, %v4363_v61  ;;  %v901_v33 = vpop.f32.mrb[15].mxu1  ;;  %1858 = vmatmul.mubr.bf16.gmra.mrb[8].mxu0 %v1353_v25  ;;  %v1241_v49 = vmax.f32 %v896_v15, 0.0  ;;  %v3621_v20 = vld [vmem:[#allocation7 + $0x1b0] ss:$8 sps:$4 sm:$0xff]  }
 0x19c   : > { %v902_v18 = vadd.f32 %v901_v33, %v4367_v63  ;;  %2007 = vmatpush1.bf16.msra.mxu0 %v3600_v30  ;;  %v1242_v4 = vmax.f32 %v898_v19, 0.0 }
 0x19d   : > { %v1245_v50 = vmax.f32 %v900_v17, 0.0  ;;  %1197 = vmatmul.mubr.bf16.gmra.mrb[120].mxu1 %v4315_v27  ;;  %2008 = vmatprep.subr.bf16.mxu0 %v3605_v7 }
 0x19e   : > { %v1246_v21 = vmax.f32 %v902_v18, 0.0  ;;  %1206 = vmatprep.mubr.bf16.mxu1 %v4317_v28  ;;  %v3626_v18 = vld [vmem:[#allocation7 + $0x1c4] ss:$8 sps:$4 sm:$0xff]  }
 0x19f   : > { %v1357_v22 = vpack.c.bf16 %v1245_v50, %v1241_v49 }
 0x1a0   : > { %v1358_v31 = vpack.c.bf16 %v1246_v21, %v1242_v4  ;;  %v905_v32 = vpop.f32.mrb[16].mxu1  ;;  %2009 = vmatpush1.bf16.msra.mxu0 %v3603_v34  ;;  %v3624_v21 = vld [vmem:[#allocation7 + $0x1c0] ss:$8 sps:$4 sm:$0xff]  }
 0x1a1   : > { %v906_v37 = vadd.f32 %v905_v32, %v4363_v61  ;;  %v907_v38 = vpop.f32.mrb[17].mxu1  ;;  %2010 = vmatprep.subr.bf16.mxu0 %v3608_v3  ;;  %v3629_v32 = vld [vmem:[#allocation7 + $0x1d4] ss:$8 sps:$4 sm:$0xff]  }
 0x1a2   : > { %v908_v41 = vadd.f32 %v907_v38, %v4367_v63  ;;  %v909_v43 = vpop.f32.mrb[18].mxu1  ;;  %1867 = vmatprep.mubr.bf16.mxu0 %v1358_v31 }
 0x1a3   : > { %v910_v27 = vadd.f32 %v909_v43, %v4363_v61  ;;  %v911_v44 = vpop.f32.mrb[19].mxu1  ;;  %1868 = vmatmul.mubr.bf16.gmra.mrb[12].mxu0 %v1357_v22  ;;  %v1249_v46 = vmax.f32 %v906_v37, 0.0  ;;  %v3627_v43 = vld [vmem:[#allocation7 + $0x1d0] ss:$8 sps:$4 sm:$0xff]  }
 0x1a4   : > { %v912_v28 = vadd.f32 %v911_v44, %v4367_v63  ;;  %2011 = vmatpush1.bf16.msra.mxu0 %v3606_v36  ;;  %v1250_v52 = vmax.f32 %v908_v41, 0.0 }
 0x1a5   : > { %v1253_v47 = vmax.f32 %v910_v27, 0.0  ;;  %1207 = vmatmul.mubr.bf16.gmra.mrb[124].mxu1 %v4323_v35  ;;  %2012 = vmatprep.subr.bf16.mxu0 %v3611_v39 }
 0x1a6   : > { %v1254_v54 = vmax.f32 %v912_v28, 0.0  ;;  %v3632_v28 = vld [vmem:[#allocation7 + $0x1e4] ss:$8 sps:$4 sm:$0xff]  }
 0x1a7   : > { %v1361_v55 = vpack.c.bf16 %v1253_v47, %v1249_v46 }
 0x1a8   : > { %v1362_v56 = vpack.c.bf16 %v1254_v54, %v1250_v52  ;;  %v915_v57 = vpop.f32.mrb[20].mxu1  ;;  %2013 = vmatpush1.bf16.msra.mxu0 %v3609_v45  ;;  %v3630_v54 = vld [vmem:[#allocation7 + $0x1e0] ss:$8 sps:$4 sm:$0xff]  }
 0x1a9   : > { %v916_v59 = vadd.f32 %v915_v57, %v4363_v61  ;;  %v917_v60 = vpop.f32.mrb[21].mxu1  ;;  %2014 = vmatprep.subr.bf16.mxu0 %v3614_v48  ;;  %v3635_v57 = vld [vmem:[#allocation7 + $0x1f4] ss:$8 sps:$4 sm:$0xff]  }
 0x1aa   : > { %v918_v0 = vadd.f32 %v917_v60, %v4367_v63  ;;  %v919_v1 = vpop.f32.mrb[22].mxu1  ;;  %1877 = vmatprep.mubr.bf16.mxu0 %v1362_v56 }
 0x1ab   : > { %v920_v35 = vadd.f32 %v919_v1, %v4363_v61  ;;  %v921_v2 = vpop.f32.mrb[23].mxu1  ;;  %1878 = vmatmul.mubr.bf16.gmra.mrb[16].mxu0 %v1361_v55  ;;  %v1257_v9 = vmax.f32 %v916_v59, 0.0  ;;  %v3633_v1 = vld [vmem:[#allocation7 + $0x1f0] ss:$8 sps:$4 sm:$0xff]  }
 0x1ac   : > { %v922_v5 = vadd.f32 %v921_v2, %v4367_v63  ;;  %2015 = vmatpush1.bf16.msra.mxu0 %v3612_v58  ;;  %v1258_v12 = vmax.f32 %v918_v0, 0.0 }
 0x1ad   : > { %v1261_v11 = vmax.f32 %v920_v35, 0.0  ;;  %2016 = vmatprep.subr.bf16.mxu0 %v3617_v62 }
 0x1ae   : > { %v1262_v13 = vmax.f32 %v922_v5, 0.0 }
 0x1af   : > { %v1365_v14 = vpack.c.bf16 %v1261_v11, %v1257_v9 }
 0x1b0   : > { %v1366_v16 = vpack.c.bf16 %v1262_v13, %v1258_v12  ;;  %v925_v23 = vpop.f32.mrb[24].mxu1  ;;  %2017 = vmatpush1.bf16.msra.mxu0 %v3615_v8 }
 0x1b1   : > { %v926_v25 = vadd.f32 %v925_v23, %v4363_v61  ;;  %v927_v26 = vpop.f32.mrb[25].mxu1  ;;  %2018 = vmatprep.subr.bf16.mxu0 %v3620_v10 }
 0x1b2   : > { %v928_v30 = vadd.f32 %v927_v26, %v4367_v63  ;;  %v929_v15 = vpop.f32.mrb[26].mxu1  ;;  %1887 = vmatprep.mubr.bf16.mxu0 %v1366_v16 }
 0x1b3   : > { %v930_v6 = vadd.f32 %v929_v15, %v4363_v61  ;;  %v931_v7 = vpop.f32.mrb[27].mxu1  ;;  %1888 = vmatmul.mubr.bf16.gmra.mrb[20].mxu0 %v1365_v14  ;;  %v1265_v17 = vmax.f32 %v926_v25, 0.0 }
 0x1b4   : > { %v932_v19 = vadd.f32 %v931_v7, %v4367_v63  ;;  %2019 = vmatpush1.bf16.msra.mxu0 %v3618_v24  ;;  %v1266_v34 = vmax.f32 %v928_v30, 0.0 }
 0x1b5   : > { %v1269_v33 = vmax.f32 %v930_v6, 0.0  ;;  %2020 = vmatprep.subr.bf16.mxu0 %v3623_v29 }
 0x1b6   : > { %v1270_v49 = vmax.f32 %v932_v19, 0.0 }
 0x1b7   : > { %v1369_v50 = vpack.c.bf16 %v1269_v33, %v1265_v17 }
 0x1b8   : > { %v1370_v3 = vpack.c.bf16 %v1270_v49, %v1266_v34  ;;  %v935_v4 = vpop.f32.mrb[28].mxu1  ;;  %2021 = vmatpush1.bf16.msra.mxu0 %v3621_v20 }
 0x1b9   : > { %v936_v22 = vadd.f32 %v935_v4, %v4363_v61  ;;  %v937_v31 = vpop.f32.mrb[29].mxu1  ;;  %2022 = vmatprep.subr.bf16.mxu0 %v3626_v18 }
 0x1ba   : > { %v938_v36 = vadd.f32 %v937_v31, %v4367_v63  ;;  %v939_v37 = vpop.f32.mrb[30].mxu1  ;;  %1897 = vmatprep.mubr.bf16.mxu0 %v1370_v3 }
 0x1bb   : > { %v940_v38 = vadd.f32 %v939_v37, %v4363_v61  ;;  %v941_v39 = vpop.f32.mrb[31].mxu1  ;;  %1898 = vmatmul.mubr.bf16.gmra.mrb[24].mxu0 %v1369_v50  ;;  %v1273_v27 = vmax.f32 %v936_v22, 0.0 }
 0x1bc   : > { %v942_v41 = vadd.f32 %v941_v39, %v4367_v63  ;;  %2023 = vmatpush1.bf16.msra.mxu0 %v3624_v21  ;;  %v1274_v45 = vmax.f32 %v938_v36, 0.0 }
 0x1bd   : > { %v1277_v44 = vmax.f32 %v940_v38, 0.0  ;;  %2024 = vmatprep.subr.bf16.mxu0 %v3629_v32 }
 0x1be   : > { %v1278_v46 = vmax.f32 %v942_v41, 0.0 }
 0x1bf   : > { %v1373_v47 = vpack.c.bf16 %v1277_v44, %v1273_v27 }
 0x1c0   : > { %v1374_v48 = vpack.c.bf16 %v1278_v46, %v1274_v45  ;;  %v945_v52 = vpop.f32.mrb[32].mxu1  ;;  %2025 = vmatpush1.bf16.msra.mxu0 %v3627_v43 }
 0x1c1   : > { %v946_v55 = vadd.f32 %v945_v52, %v4363_v61  ;;  %v947_v56 = vpop.f32.mrb[33].mxu1  ;;  %2026 = vmatprep.subr.bf16.mxu0 %v3632_v28 }
 0x1c2   : > { %v948_v58 = vadd.f32 %v947_v56, %v4367_v63  ;;  %v949_v59 = vpop.f32.mrb[34].mxu1  ;;  %1907 = vmatprep.mubr.bf16.mxu0 %v1374_v48 }
 0x1c3   : > { %v950_v60 = vadd.f32 %v949_v59, %v4363_v61  ;;  %v951_v62 = vpop.f32.mrb[35].mxu1  ;;  %1908 = vmatmul.mubr.bf16.gmra.mrb[28].mxu0 %v1373_v47  ;;  %v1281_v35 = vmax.f32 %v946_v55, 0.0 }
 0x1c4   : > { %v952_v0 = vadd.f32 %v951_v62, %v4367_v63  ;;  %2027 = vmatpush1.bf16.msra.mxu0 %v3630_v54  ;;  %v1282_v5 = vmax.f32 %v948_v58, 0.0 }
 0x1c5   : > { %v1285_v2 = vmax.f32 %v950_v60, 0.0  ;;  %2028 = vmatprep.subr.bf16.mxu0 %v3635_v57 }
 0x1c6   : > { %v1286_v8 = vmax.f32 %v952_v0, 0.0 }
 0x1c7   : > { %v1377_v9 = vpack.c.bf16 %v1285_v2, %v1281_v35 }
 0x1c8   : > { %v1378_v11 = vpack.c.bf16 %v1286_v8, %v1282_v5  ;;  %v955_v10 = vpop.f32.mrb[36].mxu1  ;;  %2029 = vmatpush1.bf16.msra.mxu0 %v3633_v1 }
 0x1c9   : > { %v956_v12 = vadd.f32 %v955_v10, %v4363_v61  ;;  %v957_v13 = vpop.f32.mrb[37].mxu1 }
 0x1ca   : > { %v958_v14 = vadd.f32 %v957_v13, %v4367_v63  ;;  %v959_v16 = vpop.f32.mrb[38].mxu1  ;;  %1917 = vmatprep.mubr.bf16.mxu0 %v1378_v11 }
 0x1cb   : > { %v960_v23 = vadd.f32 %v959_v16, %v4363_v61  ;;  %v961_v24 = vpop.f32.mrb[39].mxu1  ;;  %1918 = vmatmul.mubr.bf16.gmra.mrb[32].mxu0 %v1377_v9  ;;  %v1289_v26 = vmax.f32 %v956_v12, 0.0 }
 0x1cc   : > { %v962_v25 = vadd.f32 %v961_v24, %v4367_v63  ;;  %v1290_v30 = vmax.f32 %v958_v14, 0.0 }
 0x1cd   : > { %v1293_v29 = vmax.f32 %v960_v23, 0.0 }
 0x1ce   : > { %v1294_v15 = vmax.f32 %v962_v25, 0.0 }
 0x1cf   : > { %v1381_v6 = vpack.c.bf16 %v1293_v29, %v1289_v26 }
 0x1d0   : > { %v1382_v7 = vpack.c.bf16 %v1294_v15, %v1290_v30  ;;  %v965_v19 = vpop.f32.mrb[40].mxu1 }
 0x1d1   : > { %v966_v20 = vadd.f32 %v965_v19, %v4363_v61  ;;  %v967_v17 = vpop.f32.mrb[41].mxu1 }
 0x1d2   : > { %v968_v33 = vadd.f32 %v967_v17, %v4367_v63  ;;  %v969_v18 = vpop.f32.mrb[42].mxu1  ;;  %1927 = vmatprep.mubr.bf16.mxu0 %v1382_v7 }
 0x1d3   : > { %v970_v34 = vadd.f32 %v969_v18, %v4363_v61  ;;  %v971_v49 = vpop.f32.mrb[43].mxu1  ;;  %1928 = vmatmul.mubr.bf16.gmra.mrb[36].mxu0 %v1381_v6  ;;  %v1297_v3 = vmax.f32 %v966_v20, 0.0 }
 0x1d4   : > { %v972_v50 = vadd.f32 %v971_v49, %v4367_v63  ;;  %v1298_v21 = vmax.f32 %v968_v33, 0.0 }
 0x1d5   : > { %v1301_v4 = vmax.f32 %v970_v34, 0.0 }
 0x1d6   : > { %v1302_v22 = vmax.f32 %v972_v50, 0.0 }
 0x1d7   : > { %v1385_v31 = vpack.c.bf16 %v1301_v4, %v1297_v3 }
 0x1d8   : > { %v1386_v32 = vpack.c.bf16 %v1302_v22, %v1298_v21  ;;  %v975_v36 = vpop.f32.mrb[44].mxu1 }
 0x1d9   : > { %v976_v37 = vadd.f32 %v975_v36, %v4363_v61  ;;  %v977_v38 = vpop.f32.mrb[45].mxu1 }
 0x1da   : > { %v978_v39 = vadd.f32 %v977_v38, %v4367_v63  ;;  %v979_v41 = vpop.f32.mrb[46].mxu1  ;;  %1937 = vmatprep.mubr.bf16.mxu0 %v1386_v32 }
 0x1db   : > { %v980_v43 = vadd.f32 %v979_v41, %v4363_v61  ;;  %v981_v27 = vpop.f32.mrb[47].mxu1  ;;  %1938 = vmatmul.mubr.bf16.gmra.mrb[40].mxu0 %v1385_v31  ;;  %v1305_v28 = vmax.f32 %v976_v37, 0.0  ;;  %v501_v37 = vsub.s32 2, %v4346_v40  ;;  %v505_v41 = vsub.s32 3, %v4346_v40 }
 0x1dc   : > { %v982_v44 = vadd.f32 %v981_v27, %v4367_v63  ;;  %v1306_v46 = vmax.f32 %v978_v39, 0.0 }
 0x1dd   : > { %v1309_v45 = vmax.f32 %v980_v43, 0.0 }
 0x1de   : > { %v1310_v47 = vmax.f32 %v982_v44, 0.0 }
 0x1df   : > { %v1389_v48 = vpack.c.bf16 %v1309_v45, %v1305_v28 }
 0x1e0   : > { %v1390_v52 = vpack.c.bf16 %v1310_v47, %v1306_v46  ;;  %v985_v54 = vpop.f32.mrb[48].mxu1  ;;  %v4446_v46 = vrot.slane %v4355_v51, %v501_v37 }
 0x1e1   : > { %v986_v55 = vadd.f32 %v985_v54, %v4363_v61  ;;  %v987_v56 = vpop.f32.mrb[49].mxu1 }
 0x1e2   : > { %v988_v57 = vadd.f32 %v987_v56, %v4367_v63  ;;  %v989_v58 = vpop.f32.mrb[50].mxu1  ;;  %1947 = vmatprep.mubr.bf16.mxu0 %v1390_v52  ;;  %v4449_v52 = vrot.slane %v4355_v51, %v505_v41 }
 0x1e3   : > { %v990_v59 = vadd.f32 %v989_v58, %v4363_v61  ;;  %v991_v60 = vpop.f32.mrb[51].mxu1  ;;  %1948 = vmatmul.mubr.bf16.gmra.mrb[44].mxu0 %v1389_v48  ;;  %v1313_v0 = vmax.f32 %v986_v55, 0.0 }
 0x1e4   : > { %v992_v62 = vadd.f32 %v991_v60, %v4367_v63  ;;  %v1314_v35 = vmax.f32 %v988_v57, 0.0 }
 0x1e5   : > { %v1317_v1 = vmax.f32 %v990_v59, 0.0 }
 0x1e6   : > { %v1318_v2 = vmax.f32 %v992_v62, 0.0 }
 0x1e7   : > { %v1393_v5 = vpack.c.bf16 %v1317_v1, %v1313_v0 }
 0x1e8   : > { %v1394_v8 = vpack.c.bf16 %v1318_v2, %v1314_v35  ;;  %v995_v9 = vpop.f32.mrb[52].mxu1 }
 0x1e9   : > { %v996_v11 = vadd.f32 %v995_v9, %v4363_v61  ;;  %v997_v10 = vpop.f32.mrb[53].mxu1 }
 0x1ea   : > { %v998_v12 = vadd.f32 %v997_v10, %v4367_v63  ;;  %v999_v13 = vpop.f32.mrb[54].mxu1  ;;  %1957 = vmatprep.mubr.bf16.mxu0 %v1394_v8 }
 0x1eb   : > { %v1000_v14 = vadd.f32 %v999_v13, %v4363_v61  ;;  %v1001_v16 = vpop.f32.mrb[55].mxu1  ;;  %1958 = vmatmul.mubr.bf16.gmra.mrb[48].mxu0 %v1393_v5  ;;  %v1321_v24 = vmax.f32 %v996_v11, 0.0 }
 0x1ec   : > { %v1002_v23 = vadd.f32 %v1001_v16, %v4367_v63  ;;  %v1322_v26 = vmax.f32 %v998_v12, 0.0 }
 0x1ed   : > { %v1325_v25 = vmax.f32 %v1000_v14, 0.0 }
 0x1ee   : > { %v1326_v29 = vmax.f32 %v1002_v23, 0.0 }
 0x1ef   : > { %v1397_v30 = vpack.c.bf16 %v1325_v25, %v1321_v24 }
 0x1f0   : > { %v1398_v15 = vpack.c.bf16 %v1326_v29, %v1322_v26  ;;  %v1005_v6 = vpop.f32.mrb[56].mxu1 }
 0x1f1   : > { %v1006_v7 = vadd.f32 %v1005_v6, %v4363_v61  ;;  %v1007_v19 = vpop.f32.mrb[57].mxu1 }
 0x1f2   : > { %v1008_v20 = vadd.f32 %v1007_v19, %v4367_v63  ;;  %v1009_v17 = vpop.f32.mrb[58].mxu1  ;;  %1967 = vmatprep.mubr.bf16.mxu0 %v1398_v15 }
 0x1f3   : > { %v1010_v33 = vadd.f32 %v1009_v17, %v4363_v61  ;;  %v1011_v18 = vpop.f32.mrb[59].mxu1  ;;  %1968 = vmatmul.mubr.bf16.gmra.mrb[52].mxu0 %v1397_v30  ;;  %v1329_v49 = vmax.f32 %v1006_v7, 0.0 }
 0x1f4   : > { %v1012_v34 = vadd.f32 %v1011_v18, %v4367_v63  ;;  %v1330_v3 = vmax.f32 %v1008_v20, 0.0 }
 0x1f5   : > { %v1333_v50 = vmax.f32 %v1010_v33, 0.0 }
 0x1f6   : > { %v1334_v4 = vmax.f32 %v1012_v34, 0.0 }
 0x1f7   : > { %v1401_v21 = vpack.c.bf16 %v1333_v50, %v1329_v49 }
 0x1f8   : > { %v1402_v22 = vpack.c.bf16 %v1334_v4, %v1330_v3  ;;  %v1015_v31 = vpop.f32.mrb[60].mxu1 }
 0x1f9   : > { %v1016_v32 = vadd.f32 %v1015_v31, %v4363_v61  ;;  %v1017_v36 = vpop.f32.mrb[61].mxu1 }
 0x1fa   : > { %v1018_v38 = vadd.f32 %v1017_v36, %v4367_v63  ;;  %v1019_v39 = vpop.f32.mrb[62].mxu1  ;;  %1977 = vmatprep.mubr.bf16.mxu0 %v1402_v22 }
 0x1fb   : > { %v1020_v43 = vadd.f32 %v1019_v39, %v4363_v61  ;;  %v1021_v27 = vpop.f32.mrb[63].mxu1  ;;  %1978 = vmatmul.mubr.bf16.gmra.mrb[56].mxu0 %v1401_v21  ;;  %v1337_v28 = vmax.f32 %v1016_v32, 0.0 }
 0x1fc   : > { %v1022_v44 = vadd.f32 %v1021_v27, %v4367_v63  ;;  %v1338_v47 = vmax.f32 %v1018_v38, 0.0 }
 0x1fd   : > { %v1341_v45 = vmax.f32 %v1020_v43, 0.0 }
 0x1fe   : > { %v1342_v48 = vmax.f32 %v1022_v44, 0.0 }
 0x1ff   : > { %v1405_v54 = vpack.c.bf16 %v1341_v45, %v1337_v28 }
 0x200   : > { %v1406_v55 = vpack.c.bf16 %v1342_v48, %v1338_v47  ;;  %v1058_v56 = vpop.f32.mrb[64].mxu1 }
 0x201   : > { %v1059_v40 = vadd.f32 %v1058_v56, %v4446_v46  ;;  %v1060_v61 = vpop.f32.mrb[65].mxu1 }
 0x202   : > { %v1061_v57 = vadd.f32 %v1060_v61, %v4449_v52  ;;  %v1062_v58 = vpop.f32.mrb[66].mxu1  ;;  %1987 = vmatprep.mubr.bf16.mxu0 %v1406_v55 }
 0x203   : > { %v1063_v63 = vadd.f32 %v1062_v58, %v4446_v46  ;;  %v1064_v59 = vpop.f32.mrb[67].mxu1  ;;  %1988 = vmatmul.mubr.bf16.gmra.mrb[60].mxu0 %v1405_v54  ;;  %v1219_v62 = vmax.f32 %v1059_v40, 0.0 }
 0x204   : > { %v1065_v60 = vadd.f32 %v1064_v59, %v4449_v52  ;;  %v1220_v51 = vmax.f32 %v1061_v57, 0.0 }
 0x205   : > { %v1223_v0 = vmax.f32 %v1063_v63, 0.0 }
 0x206   : > { %v1224_v1 = vmax.f32 %v1065_v60, 0.0 }
 0x207   : > { %v1347_v35 = vpack.c.bf16 %v1223_v0, %v1219_v62 }
 0x208   : > { %v1348_v2 = vpack.c.bf16 %v1224_v1, %v1220_v51  ;;  %v1068_v5 = vpop.f32.mrb[68].mxu1 }
 0x209   : > { %v1069_v8 = vadd.f32 %v1068_v5, %v4446_v46  ;;  %v1070_v9 = vpop.f32.mrb[69].mxu1 }
 0x20a   : > { %v1071_v11 = vadd.f32 %v1070_v9, %v4449_v52  ;;  %v1072_v10 = vpop.f32.mrb[70].mxu1  ;;  %2030 = vmatprep.mubr.bf16.mxu0 %v1348_v2 }
 0x20b   : > { %v1073_v12 = vadd.f32 %v1072_v10, %v4446_v46  ;;  %v1074_v13 = vpop.f32.mrb[71].mxu1  ;;  %2031 = vmatmul.mubr.bf16.vlgmr.msra.gmra.mrb[0].mxu0 %v1347_v35  ;;  %v1227_v16 = vmax.f32 %v1069_v8, 0.0 }
 0x20c   : > { %v1075_v14 = vadd.f32 %v1074_v13, %v4449_v52  ;;  %v1228_v24 = vmax.f32 %v1071_v11, 0.0 }
 0x20d   : > { %v1231_v23 = vmax.f32 %v1073_v12, 0.0 }
 0x20e   : > { %v1232_v25 = vmax.f32 %v1075_v14, 0.0 }
 0x20f   : > { %v1351_v26 = vpack.c.bf16 %v1231_v23, %v1227_v16 }
 0x210   : > { %v1352_v29 = vpack.c.bf16 %v1232_v25, %v1228_v24  ;;  %v1078_v30 = vpop.f32.mrb[72].mxu1 }
 0x211   : > { %v1079_v15 = vadd.f32 %v1078_v30, %v4446_v46  ;;  %v1080_v6 = vpop.f32.mrb[73].mxu1 }
 0x212   : > { %v1081_v7 = vadd.f32 %v1080_v6, %v4449_v52  ;;  %v1082_v19 = vpop.f32.mrb[74].mxu1  ;;  %2040 = vmatprep.mubr.bf16.mxu0 %v1352_v29 }
 0x213   : > { %v1083_v20 = vadd.f32 %v1082_v19, %v4446_v46  ;;  %v1084_v17 = vpop.f32.mrb[75].mxu1  ;;  %2041 = vmatmul.mubr.bf16.gmra.mrb[4].mxu0 %v1351_v26  ;;  %v1235_v18 = vmax.f32 %v1079_v15, 0.0 }
 0x214   : > { %v1085_v33 = vadd.f32 %v1084_v17, %v4449_v52  ;;  %v1236_v49 = vmax.f32 %v1081_v7, 0.0 }
 0x215   : > { %v1239_v34 = vmax.f32 %v1083_v20, 0.0 }
 0x216   : > { %v1240_v50 = vmax.f32 %v1085_v33, 0.0 }
 0x217   : > { %v1355_v3 = vpack.c.bf16 %v1239_v34, %v1235_v18 }
 0x218   : > { %v1356_v4 = vpack.c.bf16 %v1240_v50, %v1236_v49  ;;  %v1088_v21 = vpop.f32.mrb[76].mxu1 }
 0x219   : > { %v1089_v22 = vadd.f32 %v1088_v21, %v4446_v46  ;;  %v1090_v31 = vpop.f32.mrb[77].mxu1 }
 0x21a   : > { %v1091_v32 = vadd.f32 %v1090_v31, %v4449_v52  ;;  %v1092_v36 = vpop.f32.mrb[78].mxu1  ;;  %2050 = vmatprep.mubr.bf16.mxu0 %v1356_v4 }
 0x21b   : > { %v1093_v37 = vadd.f32 %v1092_v36, %v4446_v46  ;;  %v1094_v38 = vpop.f32.mrb[79].mxu1  ;;  %2051 = vmatmul.mubr.bf16.gmra.mrb[8].mxu0 %v1355_v3  ;;  %v1243_v41 = vmax.f32 %v1089_v22, 0.0 }
 0x21c   : > { %v1095_v39 = vadd.f32 %v1094_v38, %v4449_v52  ;;  %v1244_v27 = vmax.f32 %v1091_v32, 0.0 }
 0x21d   : > { %v1247_v43 = vmax.f32 %v1093_v37, 0.0 }
 0x21e   : > { %v1248_v44 = vmax.f32 %v1095_v39, 0.0 }
 0x21f   : > { %v1359_v28 = vpack.c.bf16 %v1247_v43, %v1243_v41 }
 0x220   : > { %v1360_v45 = vpack.c.bf16 %v1248_v44, %v1244_v27  ;;  %v1098_v47 = vpop.f32.mrb[80].mxu1 }
 0x221   : > { %v1099_v48 = vadd.f32 %v1098_v47, %v4446_v46  ;;  %v1100_v54 = vpop.f32.mrb[81].mxu1 }
 0x222   : > { %v1101_v55 = vadd.f32 %v1100_v54, %v4449_v52  ;;  %v1102_v56 = vpop.f32.mrb[82].mxu1  ;;  %2060 = vmatprep.mubr.bf16.mxu0 %v1360_v45 }
 0x223   : > { %v1103_v40 = vadd.f32 %v1102_v56, %v4446_v46  ;;  %v1104_v61 = vpop.f32.mrb[83].mxu1  ;;  %2061 = vmatmul.mubr.bf16.gmra.mrb[12].mxu0 %v1359_v28  ;;  %v1251_v58 = vmax.f32 %v1099_v48, 0.0 }
 0x224   : > { %v1105_v57 = vadd.f32 %v1104_v61, %v4449_v52  ;;  %v1252_v59 = vmax.f32 %v1101_v55, 0.0 }
 0x225   : > { %v1255_v63 = vmax.f32 %v1103_v40, 0.0 }
 0x226   : > { %v1256_v60 = vmax.f32 %v1105_v57, 0.0 }
 0x227   : > { %v1363_v62 = vpack.c.bf16 %v1255_v63, %v1251_v58 }
 0x228   : > { %v1364_v0 = vpack.c.bf16 %v1256_v60, %v1252_v59  ;;  %v1108_v51 = vpop.f32.mrb[84].mxu1 }
 0x229   : > { %v1109_v1 = vadd.f32 %v1108_v51, %v4446_v46  ;;  %v1110_v35 = vpop.f32.mrb[85].mxu1 }
 0x22a   : > { %v1111_v2 = vadd.f32 %v1110_v35, %v4449_v52  ;;  %v1112_v5 = vpop.f32.mrb[86].mxu1  ;;  %2070 = vmatprep.mubr.bf16.mxu0 %v1364_v0 }
 0x22b   : > { %v1113_v8 = vadd.f32 %v1112_v5, %v4446_v46  ;;  %v1114_v9 = vpop.f32.mrb[87].mxu1  ;;  %2071 = vmatmul.mubr.bf16.gmra.mrb[16].mxu0 %v1363_v62  ;;  %v1259_v10 = vmax.f32 %v1109_v1, 0.0 }
 0x22c   : > { %v1115_v11 = vadd.f32 %v1114_v9, %v4449_v52  ;;  %v1260_v13 = vmax.f32 %v1111_v2, 0.0 }
 0x22d   : > { %v1263_v12 = vmax.f32 %v1113_v8, 0.0 }
 0x22e   : > { %v1264_v14 = vmax.f32 %v1115_v11, 0.0 }
 0x22f   : > { %v1367_v16 = vpack.c.bf16 %v1263_v12, %v1259_v10 }
 0x230   : > { %v1368_v23 = vpack.c.bf16 %v1264_v14, %v1260_v13  ;;  %v1118_v24 = vpop.f32.mrb[88].mxu1 }
 0x231   : > { %v1119_v25 = vadd.f32 %v1118_v24, %v4446_v46  ;;  %v1120_v26 = vpop.f32.mrb[89].mxu1 }
 0x232   : > { %v1121_v29 = vadd.f32 %v1120_v26, %v4449_v52  ;;  %v1122_v30 = vpop.f32.mrb[90].mxu1  ;;  %2080 = vmatprep.mubr.bf16.mxu0 %v1368_v23 }
 0x233   : > { %v1123_v15 = vadd.f32 %v1122_v30, %v4446_v46  ;;  %v1124_v6 = vpop.f32.mrb[91].mxu1  ;;  %2081 = vmatmul.mubr.bf16.gmra.mrb[20].mxu0 %v1367_v16  ;;  %v1267_v19 = vmax.f32 %v1119_v25, 0.0 }
 0x234   : > { %v1125_v7 = vadd.f32 %v1124_v6, %v4449_v52  ;;  %v1268_v17 = vmax.f32 %v1121_v29, 0.0 }
 0x235   : > { %v1271_v20 = vmax.f32 %v1123_v15, 0.0 }
 0x236   : > { %v1272_v33 = vmax.f32 %v1125_v7, 0.0 }
 0x237   : > { %v1371_v18 = vpack.c.bf16 %v1271_v20, %v1267_v19 }
 0x238   : > { %v1372_v34 = vpack.c.bf16 %v1272_v33, %v1268_v17  ;;  %v1128_v49 = vpop.f32.mrb[92].mxu1 }
 0x239   : > { %v1129_v50 = vadd.f32 %v1128_v49, %v4446_v46  ;;  %v1130_v3 = vpop.f32.mrb[93].mxu1 }
 0x23a   : > { %v1131_v4 = vadd.f32 %v1130_v3, %v4449_v52  ;;  %v1132_v21 = vpop.f32.mrb[94].mxu1  ;;  %2090 = vmatprep.mubr.bf16.mxu0 %v1372_v34 }
 0x23b   : > { %v1133_v22 = vadd.f32 %v1132_v21, %v4446_v46  ;;  %v1134_v31 = vpop.f32.mrb[95].mxu1  ;;  %2091 = vmatmul.mubr.bf16.gmra.mrb[24].mxu0 %v1371_v18  ;;  %v1275_v36 = vmax.f32 %v1129_v50, 0.0 }
 0x23c   : > { %v1135_v32 = vadd.f32 %v1134_v31, %v4449_v52  ;;  %v1276_v38 = vmax.f32 %v1131_v4, 0.0 }
 0x23d   : > { %v1279_v37 = vmax.f32 %v1133_v22, 0.0 }
 0x23e   : > { %v1280_v39 = vmax.f32 %v1135_v32, 0.0 }
 0x23f   : > { %v1375_v41 = vpack.c.bf16 %v1279_v37, %v1275_v36 }
 0x240   : > { %v1376_v43 = vpack.c.bf16 %v1280_v39, %v1276_v38  ;;  %v1138_v27 = vpop.f32.mrb[96].mxu1 }
 0x241   : > { %v1139_v44 = vadd.f32 %v1138_v27, %v4446_v46  ;;  %v1140_v28 = vpop.f32.mrb[97].mxu1 }
 0x242   : > { %v1141_v45 = vadd.f32 %v1140_v28, %v4449_v52  ;;  %v1142_v47 = vpop.f32.mrb[98].mxu1  ;;  %2100 = vmatprep.mubr.bf16.mxu0 %v1376_v43 }
 0x243   : > { %v1143_v48 = vadd.f32 %v1142_v47, %v4446_v46  ;;  %v1144_v54 = vpop.f32.mrb[99].mxu1  ;;  %2101 = vmatmul.mubr.bf16.gmra.mrb[28].mxu0 %v1375_v41  ;;  %v1283_v56 = vmax.f32 %v1139_v44, 0.0 }
 0x244   : > { %v1145_v55 = vadd.f32 %v1144_v54, %v4449_v52  ;;  %v1284_v61 = vmax.f32 %v1141_v45, 0.0 }
 0x245   : > { %v1287_v40 = vmax.f32 %v1143_v48, 0.0 }
 0x246   : > { %v1288_v57 = vmax.f32 %v1145_v55, 0.0 }
 0x247   : > { %v1379_v58 = vpack.c.bf16 %v1287_v40, %v1283_v56 }
 0x248   : > { %v1380_v63 = vpack.c.bf16 %v1288_v57, %v1284_v61  ;;  %v1148_v59 = vpop.f32.mrb[100].mxu1 }
 0x249   : > { %v1149_v60 = vadd.f32 %v1148_v59, %v4446_v46  ;;  %v1150_v62 = vpop.f32.mrb[101].mxu1 }
 0x24a   : > { %v1151_v0 = vadd.f32 %v1150_v62, %v4449_v52  ;;  %v1152_v51 = vpop.f32.mrb[102].mxu1  ;;  %2110 = vmatprep.mubr.bf16.mxu0 %v1380_v63 }
 0x24b   : > { %v1153_v1 = vadd.f32 %v1152_v51, %v4446_v46  ;;  %v1154_v35 = vpop.f32.mrb[103].mxu1  ;;  %2111 = vmatmul.mubr.bf16.gmra.mrb[32].mxu0 %v1379_v58  ;;  %v1291_v5 = vmax.f32 %v1149_v60, 0.0 }
 0x24c   : > { %v1155_v2 = vadd.f32 %v1154_v35, %v4449_v52  ;;  %v1292_v9 = vmax.f32 %v1151_v0, 0.0 }
 0x24d   : > { %v1295_v8 = vmax.f32 %v1153_v1, 0.0 }
 0x24e   : > { %v1296_v11 = vmax.f32 %v1155_v2, 0.0 }
 0x24f   : > { %v1383_v10 = vpack.c.bf16 %v1295_v8, %v1291_v5 }
 0x250   : > { %v1384_v12 = vpack.c.bf16 %v1296_v11, %v1292_v9  ;;  %v1158_v13 = vpop.f32.mrb[104].mxu1 }
 0x251   : > { %v1159_v14 = vadd.f32 %v1158_v13, %v4446_v46  ;;  %v1160_v16 = vpop.f32.mrb[105].mxu1 }
 0x252   : > { %v1161_v23 = vadd.f32 %v1160_v16, %v4449_v52  ;;  %v1162_v24 = vpop.f32.mrb[106].mxu1  ;;  %2120 = vmatprep.mubr.bf16.mxu0 %v1384_v12 }
 0x253   : > { %v1163_v25 = vadd.f32 %v1162_v24, %v4446_v46  ;;  %v1164_v26 = vpop.f32.mrb[107].mxu1  ;;  %2121 = vmatmul.mubr.bf16.gmra.mrb[36].mxu0 %v1383_v10  ;;  %v1299_v30 = vmax.f32 %v1159_v14, 0.0 }
 0x254   : > { %v1165_v29 = vadd.f32 %v1164_v26, %v4449_v52  ;;  %v1300_v6 = vmax.f32 %v1161_v23, 0.0 }
 0x255   : > { %v1303_v15 = vmax.f32 %v1163_v25, 0.0 }
 0x256   : > { %v1304_v7 = vmax.f32 %v1165_v29, 0.0 }
 0x257   : > { %v1387_v19 = vpack.c.bf16 %v1303_v15, %v1299_v30 }
 0x258   : > { %v1388_v20 = vpack.c.bf16 %v1304_v7, %v1300_v6  ;;  %v1168_v17 = vpop.f32.mrb[108].mxu1 }
 0x259   : > { %v1169_v33 = vadd.f32 %v1168_v17, %v4446_v46  ;;  %v1170_v18 = vpop.f32.mrb[109].mxu1 }
 0x25a   : > { %v1171_v34 = vadd.f32 %v1170_v18, %v4449_v52  ;;  %v1172_v49 = vpop.f32.mrb[110].mxu1  ;;  %2130 = vmatprep.mubr.bf16.mxu0 %v1388_v20 }
 0x25b   : > { %v1173_v50 = vadd.f32 %v1172_v49, %v4446_v46  ;;  %v1174_v3 = vpop.f32.mrb[111].mxu1  ;;  %2131 = vmatmul.mubr.bf16.gmra.mrb[40].mxu0 %v1387_v19  ;;  %v1307_v21 = vmax.f32 %v1169_v33, 0.0 }
 0x25c   : > { %v1175_v4 = vadd.f32 %v1174_v3, %v4449_v52  ;;  %v1308_v31 = vmax.f32 %v1171_v34, 0.0 }
 0x25d   : > { %v1311_v22 = vmax.f32 %v1173_v50, 0.0 }
 0x25e   : > { %v1312_v32 = vmax.f32 %v1175_v4, 0.0 }
 0x25f   : > { %v1391_v36 = vpack.c.bf16 %v1311_v22, %v1307_v21 }
 0x260   : > { %v1392_v37 = vpack.c.bf16 %v1312_v32, %v1308_v31  ;;  %v1178_v38 = vpop.f32.mrb[112].mxu1  ;;  %v1473_v31 = vld [vmem:[%s5497_s4] sm:$0x3] }
 0x261   : > { %v1179_v39 = vadd.f32 %v1178_v38, %v4446_v46  ;;  %v1180_v41 = vpop.f32.mrb[113].mxu1 }
 0x262   : > { %v1181_v43 = vadd.f32 %v1180_v41, %v4449_v52  ;;  %v1182_v27 = vpop.f32.mrb[114].mxu1  ;;  %2140 = vmatprep.mubr.bf16.mxu0 %v1392_v37 }
 0x263   : > { %v1183_v44 = vadd.f32 %v1182_v27, %v4446_v46  ;;  %v1184_v28 = vpop.f32.mrb[115].mxu1  ;;  %2141 = vmatmul.mubr.bf16.gmra.mrb[44].mxu0 %v1391_v36  ;;  %v1315_v47 = vmax.f32 %v1179_v39, 0.0  ;;  %v3700_v27 = vld [vmem:[%s4156_s17] sm:$0xff] }
 0x264   : > { %v1185_v45 = vadd.f32 %v1184_v28, %v4449_v52  ;;  %v1316_v54 = vmax.f32 %v1181_v43, 0.0 }
 0x265   : > { %v1319_v48 = vmax.f32 %v1183_v44, 0.0 }
 0x266   : > { %v1320_v55 = vmax.f32 %v1185_v45, 0.0  ;;  %v3701_v45 = vld [vmem:[%s4156_s17 + $0x8] sm:$0xff] }
 0x267   : > { %v1395_v56 = vpack.c.bf16 %v1319_v48, %v1315_v47  ;;  %v3702_v48 = vld [vmem:[%s4156_s17 + $0x10] sm:$0xff] }
 0x268   : > { %v1396_v40 = vpack.c.bf16 %v1320_v55, %v1316_v54  ;;  %v1188_v61 = vpop.f32.mrb[116].mxu1  ;;  %v3703_v55 = vld [vmem:[%s4156_s17 + $0x18] sm:$0xff] }
 0x269   : > { %v1189_v57 = vadd.f32 %v1188_v61, %v4446_v46  ;;  %v1190_v58 = vpop.f32.mrb[117].mxu1 }
 0x26a   : > { %v1191_v63 = vadd.f32 %v1190_v58, %v4449_v52  ;;  %v1192_v59 = vpop.f32.mrb[118].mxu1  ;;  %2150 = vmatprep.mubr.bf16.mxu0 %v1396_v40 }
 0x26b   : > { %v1193_v60 = vadd.f32 %v1192_v59, %v4446_v46  ;;  %v1194_v62 = vpop.f32.mrb[119].mxu1  ;;  %2151 = vmatmul.mubr.bf16.gmra.mrb[48].mxu0 %v1395_v56  ;;  %v1323_v51 = vmax.f32 %v1189_v57, 0.0 }
 0x26c   : > { %v1195_v0 = vadd.f32 %v1194_v62, %v4449_v52  ;;  %v1324_v35 = vmax.f32 %v1191_v63, 0.0 }
 0x26d   : > { %v1327_v1 = vmax.f32 %v1193_v60, 0.0 }
 0x26e   : > { %v1328_v2 = vmax.f32 %v1195_v0, 0.0 }
 0x26f   : > { %v1399_v5 = vpack.c.bf16 %v1327_v1, %v1323_v51  ;;  %v3704_v51 = vld [vmem:[%s4156_s17 + $0x20] sm:$0xff] }
 0x270   : > { %v1400_v8 = vpack.c.bf16 %v1328_v2, %v1324_v35  ;;  %v1198_v9 = vpop.f32.mrb[120].mxu1  ;;  %v3705_v2 = vld [vmem:[%s4156_s17 + $0x28] sm:$0xff] }
 0x271   : > { %v1199_v11 = vadd.f32 %v1198_v9, %v4446_v46  ;;  %v1200_v10 = vpop.f32.mrb[121].mxu1 }
 0x272   : > { %v1201_v12 = vadd.f32 %v1200_v10, %v4449_v52  ;;  %v1202_v13 = vpop.f32.mrb[122].mxu1  ;;  %2160 = vmatprep.mubr.bf16.mxu0 %v1400_v8  ;;  %v3706_v8 = vld [vmem:[%s4156_s17 + $0x30] sm:$0xff] }
 0x273   : > { %v1203_v14 = vadd.f32 %v1202_v13, %v4446_v46  ;;  %v1204_v16 = vpop.f32.mrb[123].mxu1  ;;  %2161 = vmatmul.mubr.bf16.gmra.mrb[52].mxu0 %v1399_v5  ;;  %v1331_v24 = vmax.f32 %v1199_v11, 0.0  ;;  %v3707_v11 = vld [vmem:[%s4156_s17 + $0x38] sm:$0xff] }
 0x274   : > { %v1205_v23 = vadd.f32 %v1204_v16, %v4449_v52  ;;  %v1332_v26 = vmax.f32 %v1201_v12, 0.0 }
 0x275   : > { %v1335_v25 = vmax.f32 %v1203_v14, 0.0 }
 0x276   : > { %v1336_v29 = vmax.f32 %v1205_v23, 0.0 }
 0x277   : > { %v1403_v30 = vpack.c.bf16 %v1335_v25, %v1331_v24 }
 0x278   : > { %v1404_v15 = vpack.c.bf16 %v1336_v29, %v1332_v26  ;;  %v1208_v6 = vpop.f32.mrb[124].mxu1  ;;  %v3708_v26 = vld [vmem:[%s4156_s17 + $0x40] sm:$0xff] }
 0x279   : > { %v1209_v7 = vadd.f32 %v1208_v6, %v4446_v46  ;;  %v1210_v19 = vpop.f32.mrb[125].mxu1  ;;  %v3709_v6 = vld [vmem:[%s4156_s17 + $0x48] sm:$0xff] }
 0x27a   : > { %v1211_v20 = vadd.f32 %v1210_v19, %v4449_v52  ;;  %v1212_v17 = vpop.f32.mrb[126].mxu1  ;;  %2170 = vmatprep.mubr.bf16.mxu0 %v1404_v15 }
 0x27b   : > { %v1213_v33 = vadd.f32 %v1212_v17, %v4446_v46  ;;  %v1214_v18 = vpop.f32.mrb[127].mxu1  ;;  %2171 = vmatmul.mubr.bf16.gmra.mrb[56].mxu0 %v1403_v30  ;;  %v1339_v49 = vmax.f32 %v1209_v7, 0.0  ;;  %v4519_v46 = vrot.slane %v1473_v31, %v4350_v42  ;;  %v3750_v42 = vld [vmem:[%s4156_s17 + $0x190] sm:$0xff] }
 0x27c   : > { %v1215_v34 = vadd.f32 %v1214_v18, %v4449_v52  ;;  %v1340_v3 = vmax.f32 %v1211_v20, 0.0  ;;  %v4522_v52 = vrot.slane %v1473_v31, %v4358_v53  ;;  %v3710_v20 = vld [vmem:[%s4156_s17 + $0x50] sm:$0xff]  ;;  %v3712_v31 = vld [vmem:[%s4156_s17 + $0x60] sm:$0xff] }
 0x27d   : > { %v1343_v50 = vmax.f32 %v1213_v33, 0.0  ;;  %v3711_v33 = vld [vmem:[%s4156_s17 + $0x58] sm:$0xff] }
 0x27e   : > { %v1344_v4 = vmax.f32 %v1215_v34, 0.0 }
 0x27f   : > { %v1407_v21 = vpack.c.bf16 %v1343_v50, %v1339_v49 }
 0x280   : > { %v1408_v22 = vpack.c.bf16 %v1344_v4, %v1340_v3 }
 0x282   : > { %2180 = vmatprep.mubr.bf16.mxu0 %v1408_v22 }
 0x283   : > { %2181 = vmatmul.mubr.bf16.gmra.mrb[60].mxu0 %v1407_v21 }
 0x2de   : > { %v2032_v32 = vpop.f32.mrb[0].mxu0 }
 0x2df   : > { %v3243_v36 = vadd.f32 %v2032_v32, %v4519_v46  ;;  %v2034_v37 = vpop.f32.mrb[1].mxu0 }
 0x2e0   : > { %v3244_v38 = vadd.f32 %v2034_v37, %v4522_v52  ;;  %v2036_v39 = vpop.f32.mrb[2].mxu0 }
 0x2e1   : > { %v3245_v41 = vadd.f32 %v2036_v39, %v4519_v46  ;;  %v2038_v43 = vpop.f32.mrb[3].mxu0  ;;  %v4528_v44 = vadd.f32 %v3700_v27, %v3243_v36 }
 0x2e2   : > { %v3246_v28 = vadd.f32 %v2038_v43, %v4522_v52  ;;  %v4532_v47 = vadd.f32 %v3701_v45, %v3244_v38  ;;  %v3713_v38 = vld [vmem:[%s4156_s17 + $0x68] sm:$0xff]  ;;  %v3714_v43 = vld [vmem:[%s4156_s17 + $0x70] sm:$0xff] }
 0x2e3   : > { %v4535_v54 = vadd.f32 %v3702_v48, %v3245_v41 }
 0x2e4   : > { %v4538_v56 = vadd.f32 %v3703_v55, %v3246_v28  ;;  %v2255_v40 = vadd.f32 %v4532_v47, %v4528_v44  ;;  %v3715_v28 = vld [vmem:[%s4156_s17 + $0x78] sm:$0xff] }
 0x2e6   : > { %v2042_v61 = vpop.f32.mrb[4].mxu0  ;;  %2256 = vadd.xlane.f32.xlu0 %v2255_v40  ;;  %v2258_v60 = vadd.f32 %v4538_v56, %v4535_v54 }
 0x2e7   : > { %v3247_v57 = vadd.f32 %v2042_v61, %v4519_v46  ;;  %v2044_v58 = vpop.f32.mrb[5].mxu0 }
 0x2e8   : > { %v3248_v63 = vadd.f32 %v2044_v58, %v4522_v52  ;;  %v2046_v59 = vpop.f32.mrb[6].mxu0 }
 0x2e9   : > { %v3249_v62 = vadd.f32 %v2046_v59, %v4519_v46  ;;  %v2048_v0 = vpop.f32.mrb[7].mxu0  ;;  %v4548_v1 = vadd.f32 %v3704_v51, %v3247_v57  ;;  %v3716_v59 = vld [vmem:[%s4156_s17 + $0x80] sm:$0xff]  ;;  %v3717_v51 = vld [vmem:[%s4156_s17 + $0x88] sm:$0xff] }
 0x2ea   : > { %v3250_v35 = vadd.f32 %v2048_v0, %v4522_v52  ;;  %2259 = vadd.xlane.f32.xlu0 %v2258_v60  ;;  %v4552_v5 = vadd.f32 %v3705_v2, %v3248_v63 }
 0x2eb   : > { %v4555_v9 = vadd.f32 %v3706_v8, %v3249_v62  ;;  %v3718_v8 = vld [vmem:[%s4156_s17 + $0x90] sm:$0xff] }
 0x2ec   : > { %v4558_v10 = vadd.f32 %v3707_v11, %v3250_v35  ;;  %v2261_v12 = vadd.f32 %v4552_v5, %v4548_v1 }
 0x2ee   : > { %v2052_v13 = vpop.f32.mrb[8].mxu0  ;;  %2262 = vadd.xlane.f32.xlu1 %v2261_v12  ;;  %v2264_v25 = vadd.f32 %v4558_v10, %v4555_v9  ;;  %v3719_v12 = vld [vmem:[%s4156_s17 + $0x98] sm:$0xff] }
 0x2ef   : > { %v3251_v14 = vadd.f32 %v2052_v13, %v4519_v46  ;;  %v2054_v16 = vpop.f32.mrb[9].mxu0 }
 0x2f0   : > { %v3252_v23 = vadd.f32 %v2054_v16, %v4522_v52  ;;  %v2056_v24 = vpop.f32.mrb[10].mxu0 }
 0x2f1   : > { %v4567_v29 = vadd.f32 %v3708_v26, %v3251_v14  ;;  %v3253_v30 = vadd.f32 %v2056_v24, %v4519_v46  ;;  %v2058_v15 = vpop.f32.mrb[11].mxu0 }
 0x2f2   : > { %v4571_v7 = vadd.f32 %v3709_v6, %v3252_v23  ;;  %v3254_v19 = vadd.f32 %v2058_v15, %v4522_v52  ;;  %2265 = vadd.xlane.f32.xlu1 %v2264_v25  ;;  %v3720_v15 = vld [vmem:[%s4156_s17 + $0xa0] sm:$0xff] }
 0x2f3   : > { %v4575_v17 = vadd.f32 %v3710_v20, %v3253_v30 }
 0x2f4   : > { %v4578_v18 = vadd.f32 %v3711_v33, %v3254_v19  ;;  %v2267_v34 = vadd.f32 %v4571_v7, %v4567_v29  ;;  %v3721_v33 = vld [vmem:[%s4156_s17 + $0xa8] sm:$0xff] }
 0x2f6   : > { %v2062_v49 = vpop.f32.mrb[12].mxu0  ;;  %2268 = vadd.xlane.f32.xlu0 %v2267_v34  ;;  %v2270_v50 = vadd.f32 %v4578_v18, %v4575_v17 }
 0x2f7   : > { %v3255_v3 = vadd.f32 %v2062_v49, %v4519_v46  ;;  %v2064_v4 = vpop.f32.mrb[13].mxu0 }
 0x2f8   : > { %v3256_v21 = vadd.f32 %v2064_v4, %v4522_v52  ;;  %v2066_v22 = vpop.f32.mrb[14].mxu0  ;;  %2271 = vadd.xlane.f32.xlu1 %v2270_v50  ;;  %v3722_v50 = vld [vmem:[%s4156_s17 + $0xb0] sm:$0xff]  ;;  %v3723_v4 = vld [vmem:[%s4156_s17 + $0xb8] sm:$0xff] }
 0x2f9   : > { %v4587_v32 = vadd.f32 %v3712_v31, %v3255_v3  ;;  %v3257_v36 = vadd.f32 %v2066_v22, %v4519_v46  ;;  %v2068_v37 = vpop.f32.mrb[15].mxu0 }
 0x2fa   : > { %v4591_v39 = vadd.f32 %v3713_v38, %v3256_v21  ;;  %v3258_v41 = vadd.f32 %v2068_v37, %v4522_v52 }
 0x2fb   : > { %v4595_v27 = vadd.f32 %v3714_v43, %v3257_v36 }
 0x2fc   : > { %v4598_v45 = vadd.f32 %v3715_v28, %v3258_v41  ;;  %v2273_v48 = vadd.f32 %v4591_v39, %v4587_v32  ;;  %v3724_v28 = vld [vmem:[%s4156_s17 + $0xc0] sm:$0xff] }
 0x2fe   : > { %v2072_v55 = vpop.f32.mrb[16].mxu0  ;;  %2274 = vadd.xlane.f32.xlu0 %v2273_v48  ;;  %v2276_v40 = vadd.f32 %v4598_v45, %v4595_v27 }
 0x2ff   : > { %v3259_v61 = vadd.f32 %v2072_v55, %v4519_v46  ;;  %v2074_v57 = vpop.f32.mrb[17].mxu0 }
 0x300   : > { %v3260_v58 = vadd.f32 %v2074_v57, %v4522_v52  ;;  %v2076_v63 = vpop.f32.mrb[18].mxu0  ;;  %2277 = vadd.xlane.f32.xlu1 %v2276_v40 }
 0x301   : > { %v4607_v60 = vadd.f32 %v3716_v59, %v3259_v61  ;;  %v3261_v62 = vadd.f32 %v2076_v63, %v4519_v46  ;;  %v2078_v0 = vpop.f32.mrb[19].mxu0  ;;  %v3725_v61 = vld [vmem:[%s4156_s17 + $0xc8] sm:$0xff]  ;;  %v3726_v63 = vld [vmem:[%s4156_s17 + $0xd0] sm:$0xff] }
 0x302   : > { %v4611_v35 = vadd.f32 %v3717_v51, %v3260_v58  ;;  %v3262_v2 = vadd.f32 %v2078_v0, %v4522_v52 }
 0x303   : > { %v4615_v11 = vadd.f32 %v3718_v8, %v3261_v62  ;;  %v3727_v62 = vld [vmem:[%s4156_s17 + $0xd8] sm:$0xff] }
 0x304   : > { %v4618_v13 = vadd.f32 %v3719_v12, %v3262_v2  ;;  %v2279_v14 = vadd.f32 %v4611_v35, %v4607_v60 }
 0x306   : > { %v2082_v16 = vpop.f32.mrb[20].mxu0  ;;  %2280 = vadd.xlane.f32.xlu0 %v2279_v14  ;;  %v2282_v23 = vadd.f32 %v4618_v13, %v4615_v11 }
 0x307   : > { %v3263_v24 = vadd.f32 %v2082_v16, %v4519_v46  ;;  %v2084_v25 = vpop.f32.mrb[21].mxu0 }
 0x308   : > { %v3264_v26 = vadd.f32 %v2084_v25, %v4522_v52  ;;  %v2086_v30 = vpop.f32.mrb[22].mxu0  ;;  %2283 = vadd.xlane.f32.xlu1 %v2282_v23 }
 0x309   : > { %v4627_v6 = vadd.f32 %v3720_v15, %v3263_v24  ;;  %v3265_v19 = vadd.f32 %v2086_v30, %v4519_v46  ;;  %v2088_v20 = vpop.f32.mrb[23].mxu0  ;;  %v3728_v24 = vld [vmem:[%s4156_s17 + $0xe0] sm:$0xff]  ;;  %v3729_v15 = vld [vmem:[%s4156_s17 + $0xe8] sm:$0xff] }
 0x30a   : > { %v4631_v34 = vadd.f32 %v3721_v33, %v3264_v26  ;;  %v3266_v49 = vadd.f32 %v2088_v20, %v4522_v52  ;;  %v3730_v33 = vld [vmem:[%s4156_s17 + $0xf0] sm:$0xff] }
 0x30b   : > { %v4635_v3 = vadd.f32 %v3722_v50, %v3265_v19  ;;  %v3731_v50 = vld [vmem:[%s4156_s17 + $0xf8] sm:$0xff] }
 0x30c   : > { %v4638_v21 = vadd.f32 %v3723_v4, %v3266_v49  ;;  %v2285_v22 = vadd.f32 %v4631_v34, %v4627_v6 }
 0x30e   : > { %v2092_v31 = vpop.f32.mrb[24].mxu0  ;;  %2286 = vadd.xlane.f32.xlu0 %v2285_v22  ;;  %v2288_v36 = vadd.f32 %v4638_v21, %v4635_v3 }
 0x30f   : > { %v3267_v37 = vadd.f32 %v2092_v31, %v4519_v46  ;;  %v2094_v38 = vpop.f32.mrb[25].mxu0 }
 0x310   : > { %v3268_v41 = vadd.f32 %v2094_v38, %v4522_v52  ;;  %v2096_v43 = vpop.f32.mrb[26].mxu0  ;;  %2289 = vadd.xlane.f32.xlu1 %v2288_v36 }
 0x311   : > { %v4647_v48 = vadd.f32 %v3724_v28, %v3267_v37  ;;  %v3269_v55 = vadd.f32 %v2096_v43, %v4519_v46  ;;  %v2098_v40 = vpop.f32.mrb[27].mxu0  ;;  %v3732_v28 = vld [vmem:[%s4156_s17 + $0x100] sm:$0xff] }
 0x312   : > { %v4651_v57 = vadd.f32 %v3725_v61, %v3268_v41  ;;  %v3270_v58 = vadd.f32 %v2098_v40, %v4522_v52 }
 0x313   : > { %v4655_v59 = vadd.f32 %v3726_v63, %v3269_v55 }
 0x314   : > { %v4658_v0 = vadd.f32 %v3727_v62, %v3270_v58  ;;  %v2291_v51 = vadd.f32 %v4651_v57, %v4647_v48  ;;  %v3733_v58 = vld [vmem:[%s4156_s17 + $0x108] sm:$0xff] }
 0x316   : > { %v2102_v2 = vpop.f32.mrb[28].mxu0  ;;  %2292 = vadd.xlane.f32.xlu0 %v2291_v51  ;;  %v2294_v8 = vadd.f32 %v4658_v0, %v4655_v59  ;;  %v3734_v51 = vld [vmem:[%s4156_s17 + $0x110] sm:$0xff] }
 0x317   : > { %v3271_v12 = vadd.f32 %v2102_v2, %v4519_v46  ;;  %v2104_v14 = vpop.f32.mrb[29].mxu0 }
 0x318   : > { %v3272_v16 = vadd.f32 %v2104_v14, %v4522_v52  ;;  %v2106_v23 = vpop.f32.mrb[30].mxu0  ;;  %2295 = vadd.xlane.f32.xlu1 %v2294_v8  ;;  %v3735_v8 = vld [vmem:[%s4156_s17 + $0x118] sm:$0xff] }
 0x319   : > { %v4667_v25 = vadd.f32 %v3728_v24, %v3271_v12  ;;  %v3273_v26 = vadd.f32 %v2106_v23, %v4519_v46  ;;  %v2108_v30 = vpop.f32.mrb[31].mxu0 }
 0x31a   : > { %v4671_v19 = vadd.f32 %v3729_v15, %v3272_v16  ;;  %v3274_v20 = vadd.f32 %v2108_v30, %v4522_v52 }
 0x31b   : > { %v4675_v49 = vadd.f32 %v3730_v33, %v3273_v26 }
 0x31c   : > { %v4678_v4 = vadd.f32 %v3731_v50, %v3274_v20  ;;  %v2297_v22 = vadd.f32 %v4671_v19, %v4667_v25  ;;  %v3736_v20 = vld [vmem:[%s4156_s17 + $0x120] sm:$0xff] }
 0x31e   : > { %v2112_v31 = vpop.f32.mrb[32].mxu0  ;;  %2298 = vadd.xlane.f32.xlu0 %v2297_v22  ;;  %v2300_v36 = vadd.f32 %v4678_v4, %v4675_v49 }
 0x31f   : > { %v3275_v37 = vadd.f32 %v2112_v31, %v4519_v46  ;;  %v2114_v38 = vpop.f32.mrb[33].mxu0  ;;  %v3737_v31 = vld [vmem:[%s4156_s17 + $0x128] sm:$0xff] }
 0x320   : > { %v3276_v41 = vadd.f32 %v2114_v38, %v4522_v52  ;;  %v2116_v43 = vpop.f32.mrb[34].mxu0  ;;  %2301 = vadd.xlane.f32.xlu1 %v2300_v36  ;;  %v3738_v38 = vld [vmem:[%s4156_s17 + $0x130] sm:$0xff] }
 0x321   : > { %v4687_v55 = vadd.f32 %v3732_v28, %v3275_v37  ;;  %v3277_v40 = vadd.f32 %v2116_v43, %v4519_v46  ;;  %v2118_v61 = vpop.f32.mrb[35].mxu0  ;;  %v3739_v43 = vld [vmem:[%s4156_s17 + $0x138] sm:$0xff] }
 0x322   : > { %v4691_v63 = vadd.f32 %v3733_v58, %v3276_v41  ;;  %v3278_v62 = vadd.f32 %v2118_v61, %v4522_v52 }
 0x323   : > { %v4695_v2 = vadd.f32 %v3734_v51, %v3277_v40 }
 0x324   : > { %v4698_v12 = vadd.f32 %v3735_v8, %v3278_v62  ;;  %v2303_v14 = vadd.f32 %v4691_v63, %v4687_v55 }
 0x326   : > { %v2122_v16 = vpop.f32.mrb[36].mxu0  ;;  %2304 = vadd.xlane.f32.xlu0 %v2303_v14  ;;  %v2306_v23 = vadd.f32 %v4698_v12, %v4695_v2 }
 0x327   : > { %v3279_v24 = vadd.f32 %v2122_v16, %v4519_v46  ;;  %v2124_v26 = vpop.f32.mrb[37].mxu0  ;;  %v3740_v16 = vld [vmem:[%s4156_s17 + $0x140] sm:$0xff] }
 0x328   : > { %v3280_v30 = vadd.f32 %v2124_v26, %v4522_v52  ;;  %v2126_v15 = vpop.f32.mrb[38].mxu0  ;;  %2307 = vadd.xlane.f32.xlu1 %v2306_v23 }
 0x329   : > { %v4707_v33 = vadd.f32 %v3736_v20, %v3279_v24  ;;  %v3281_v50 = vadd.f32 %v2126_v15, %v4519_v46  ;;  %v2128_v22 = vpop.f32.mrb[39].mxu0 }
 0x32a   : > { %v4711_v36 = vadd.f32 %v3737_v31, %v3280_v30  ;;  %v3282_v37 = vadd.f32 %v2128_v22, %v4522_v52  ;;  %v3741_v30 = vld [vmem:[%s4156_s17 + $0x148] sm:$0xff]  ;;  %v3743_v31 = vld [vmem:[%s4156_s17 + $0x158] sm:$0xff] }
 0x32b   : > { %v4715_v41 = vadd.f32 %v3738_v38, %v3281_v50  ;;  %v3742_v50 = vld [vmem:[%s4156_s17 + $0x150] sm:$0xff] }
 0x32c   : > { %v4718_v28 = vadd.f32 %v3739_v43, %v3282_v37  ;;  %v2309_v40 = vadd.f32 %v4711_v36, %v4707_v33 }
 0x32e   : > { %v2132_v61 = vpop.f32.mrb[40].mxu0  ;;  %2310 = vadd.xlane.f32.xlu0 %v2309_v40  ;;  %v2312_v58 = vadd.f32 %v4718_v28, %v4715_v41 }
 0x32f   : > { %v3283_v62 = vadd.f32 %v2132_v61, %v4519_v46  ;;  %v2134_v51 = vpop.f32.mrb[41].mxu0 }
 0x330   : > { %v3284_v8 = vadd.f32 %v2134_v51, %v4522_v52  ;;  %v2136_v14 = vpop.f32.mrb[42].mxu0  ;;  %2313 = vadd.xlane.f32.xlu1 %v2312_v58 }
 0x331   : > { %v4727_v23 = vadd.f32 %v3740_v16, %v3283_v62  ;;  %v3285_v24 = vadd.f32 %v2136_v14, %v4519_v46  ;;  %v2138_v26 = vpop.f32.mrb[43].mxu0 }
 0x332   : > { %v4731_v15 = vadd.f32 %v3741_v30, %v3284_v8  ;;  %v3286_v20 = vadd.f32 %v2138_v26, %v4522_v52  ;;  %v3744_v8 = vld [vmem:[%s4156_s17 + $0x160] sm:$0xff]  ;;  %v3745_v26 = vld [vmem:[%s4156_s17 + $0x168] sm:$0xff] }
 0x333   : > { %v4735_v22 = vadd.f32 %v3742_v50, %v3285_v24  ;;  %v3746_v50 = vld [vmem:[%s4156_s17 + $0x170] sm:$0xff] }
 0x334   : > { %v4738_v37 = vadd.f32 %v3743_v31, %v3286_v20  ;;  %v2315_v38 = vadd.f32 %v4731_v15, %v4727_v23 }
 0x336   : > { %v2142_v43 = vpop.f32.mrb[44].mxu0  ;;  %2316 = vadd.xlane.f32.xlu0 %v2315_v38  ;;  %v2318_v40 = vadd.f32 %v4738_v37, %v4735_v22  ;;  %v3747_v38 = vld [vmem:[%s4156_s17 + $0x178] sm:$0xff] }
 0x337   : > { %v3287_v61 = vadd.f32 %v2142_v43, %v4519_v46  ;;  %v2144_v58 = vpop.f32.mrb[45].mxu0 }
 0x338   : > { %v3288_v62 = vadd.f32 %v2144_v58, %v4522_v52  ;;  %v2146_v51 = vpop.f32.mrb[46].mxu0  ;;  %2319 = vadd.xlane.f32.xlu1 %v2318_v40 }
 0x339   : > { %v4747_v14 = vadd.f32 %v3744_v8, %v3287_v61  ;;  %v3289_v16 = vadd.f32 %v2146_v51, %v4519_v46  ;;  %v2148_v24 = vpop.f32.mrb[47].mxu0 }
 0x33a   : > { %v4751_v30 = vadd.f32 %v3745_v26, %v3288_v62  ;;  %v3290_v20 = vadd.f32 %v2148_v24, %v4522_v52  ;;  %v3748_v24 = vld [vmem:[%s4156_s17 + $0x180] sm:$0xff] }
 0x33b   : > { %v4755_v31 = vadd.f32 %v3746_v50, %v3289_v16 }
 0x33c   : > { %v4758_v43 = vadd.f32 %v3747_v38, %v3290_v20  ;;  %v2321_v40 = vadd.f32 %v4751_v30, %v4747_v14  ;;  %v3749_v38 = vld [vmem:[%s4156_s17 + $0x188] sm:$0xff] }
 0x33d   : > { %5555 = vst [vmem:[#allocation14_spill] sm:$0xff] %v4755_v31 }
 0x33e   : > { %5556 = vst [vmem:[#allocation15_spill] sm:$0xff] %v4758_v43  ;;  %v2152_v61 = vpop.f32.mrb[48].mxu0  ;;  %2322 = vadd.xlane.f32.xlu0 %v2321_v40  ;;  %v2324_v58 = vadd.f32 %v4758_v43, %v4755_v31  ;;  %v3762_v31 = vld [vmem:[%s4156_s17 + $0x1f0] sm:$0xff] }
 0x33f   : > { %v3291_v62 = vadd.f32 %v2152_v61, %v4519_v46  ;;  %v2154_v51 = vpop.f32.mrb[49].mxu0  ;;  %v3751_v61 = vld [vmem:[%s4156_s17 + $0x198] sm:$0xff] }
 0x340   : > { %v3292_v8 = vadd.f32 %v2154_v51, %v4522_v52  ;;  %v2156_v16 = vpop.f32.mrb[50].mxu0  ;;  %2325 = vadd.xlane.f32.xlu1 %v2324_v58 }
 0x341   : > { %v4767_v26 = vadd.f32 %v3748_v24, %v3291_v62  ;;  %v3293_v20 = vadd.f32 %v2156_v16, %v4519_v46  ;;  %v2158_v50 = vpop.f32.mrb[51].mxu0 }
 0x342   : > { %v4771_v40 = vadd.f32 %v3749_v38, %v3292_v8  ;;  %v3294_v53 = vadd.f32 %v2158_v50, %v4522_v52  ;;  %v3752_v50 = vld [vmem:[%s4156_s17 + $0x1a0] sm:$0xff] }
 0x343   : > { %5557 = vst [vmem:[#allocation16_spill] sm:$0xff] %v4767_v26  ;;  %v4775_v43 = vadd.f32 %v3750_v42, %v3293_v20 }
 0x344   : > { %5558 = vst [vmem:[#allocation17_spill] sm:$0xff] %v4771_v40  ;;  %v4778_v51 = vadd.f32 %v3751_v61, %v3294_v53  ;;  %v2327_v58 = vadd.f32 %v4771_v40, %v4767_v26  ;;  %v3753_v40 = vld [vmem:[%s4156_s17 + $0x1a8] sm:$0xff] }
 0x345   : > { %5559 = vst [vmem:[#allocation18_spill] sm:$0xff] %v4775_v43 }
 0x346   : > { %5560 = vst [vmem:[#allocation19_spill] sm:$0xff] %v4778_v51  ;;  %v2162_v62 = vpop.f32.mrb[52].mxu0  ;;  %2328 = vadd.xlane.f32.xlu0 %v2327_v58  ;;  %v2330_v8 = vadd.f32 %v4778_v51, %v4775_v43  ;;  %v3754_v51 = vld [vmem:[%s4156_s17 + $0x1b0] sm:$0xff] }
 0x347   : > { %v3295_v16 = vadd.f32 %v2162_v62, %v4519_v46  ;;  %v2164_v24 = vpop.f32.mrb[53].mxu0  ;;  %v3755_v62 = vld [vmem:[%s4156_s17 + $0x1b8] sm:$0xff] }
 0x348   : > { %v3296_v42 = vadd.f32 %v2164_v24, %v4522_v52  ;;  %v2166_v20 = vpop.f32.mrb[54].mxu0  ;;  %2331 = vadd.xlane.f32.xlu1 %v2330_v8 }
 0x349   : > { %v4787_v53 = vadd.f32 %v3752_v50, %v3295_v16  ;;  %v3297_v38 = vadd.f32 %v2166_v20, %v4519_v46  ;;  %v2168_v61 = vpop.f32.mrb[55].mxu0 }
 0x34a   : > { %v4791_v58 = vadd.f32 %v3753_v40, %v3296_v42  ;;  %v3298_v26 = vadd.f32 %v2168_v61, %v4522_v52 }
 0x34b   : > { %5561 = vst [vmem:[#allocation20_spill] sm:$0xff] %v4787_v53  ;;  %v4795_v43 = vadd.f32 %v3754_v51, %v3297_v38  ;;  %v3756_v38 = vld [vmem:[%s4156_s17 + $0x1c0] sm:$0xff] }
 0x34c   : > { %5562 = vst [vmem:[#allocation21_spill] sm:$0xff] %v4791_v58  ;;  %v4798_v24 = vadd.f32 %v3755_v62, %v3298_v26  ;;  %v2333_v8 = vadd.f32 %v4791_v58, %v4787_v53  ;;  %v3757_v58 = vld [vmem:[%s4156_s17 + $0x1c8] sm:$0xff] }
 0x34d   : > { %5563 = vst [vmem:[#allocation22_spill] sm:$0xff] %v4795_v43 }
 0x34e   : > { %5564 = vst [vmem:[#allocation23_spill] sm:$0xff] %v4798_v24  ;;  %v2172_v16 = vpop.f32.mrb[56].mxu0  ;;  %2334 = vadd.xlane.f32.xlu0 %v2333_v8  ;;  %v2336_v40 = vadd.f32 %v4798_v24, %v4795_v43  ;;  %v3758_v24 = vld [vmem:[%s4156_s17 + $0x1d0] sm:$0xff] }
 0x34f   : > { %v3299_v42 = vadd.f32 %v2172_v16, %v4519_v46  ;;  %v2174_v20 = vpop.f32.mrb[57].mxu0  ;;  %v3759_v16 = vld [vmem:[%s4156_s17 + $0x1d8] sm:$0xff] }
 0x350   : > { %v3300_v51 = vadd.f32 %v2174_v20, %v4522_v52  ;;  %v2176_v50 = vpop.f32.mrb[58].mxu0  ;;  %2337 = vadd.xlane.f32.xlu1 %v2336_v40 }
 0x351   : > { %v4807_v26 = vadd.f32 %v3756_v38, %v3299_v42  ;;  %v3301_v61 = vadd.f32 %v2176_v50, %v4519_v46  ;;  %v2178_v62 = vpop.f32.mrb[59].mxu0 }
 0x352   : > { %v4811_v8 = vadd.f32 %v3757_v58, %v3300_v51  ;;  %v3302_v53 = vadd.f32 %v2178_v62, %v4522_v52 }
 0x353   : > { %5565 = vst [vmem:[#allocation24_spill] sm:$0xff] %v4807_v26  ;;  %v4815_v43 = vadd.f32 %v3758_v24, %v3301_v61  ;;  %v3760_v61 = vld [vmem:[%s4156_s17 + $0x1e0] sm:$0xff] }
 0x354   : > { %5566 = vst [vmem:[#allocation25_spill] sm:$0xff] %v4811_v8  ;;  %v4818_v20 = vadd.f32 %v3759_v16, %v3302_v53  ;;  %v2339_v40 = vadd.f32 %v4811_v8, %v4807_v26  ;;  %v3761_v8 = vld [vmem:[%s4156_s17 + $0x1e8] sm:$0xff] }
 0x355   : > { %5567 = vst [vmem:[#allocation26_spill] sm:$0xff] %v4815_v43 }
 0x356   : > { %5568 = vst [vmem:[#allocation27_spill] sm:$0xff] %v4818_v20  ;;  %v2182_v42 = vpop.f32.mrb[60].mxu0  ;;  %2340 = vadd.xlane.f32.xlu0 %v2339_v40  ;;  %v2342_v58 = vadd.f32 %v4818_v20, %v4815_v43 }
 0x357   : > { %v3303_v51 = vadd.f32 %v2182_v42, %v4519_v46  ;;  %v2184_v50 = vpop.f32.mrb[61].mxu0  ;;  %v3763_v42 = vld [vmem:[%s4156_s17 + $0x1f8] sm:$0xff] }
 0x358   : > { %v3304_v24 = vadd.f32 %v2184_v50, %v4522_v52  ;;  %v2186_v38 = vpop.f32.mrb[62].mxu0  ;;  %2343 = vadd.xlane.f32.xlu1 %v2342_v58 }
 0x359   : > { %v4827_v53 = vadd.f32 %v3760_v61, %v3303_v51  ;;  %v3305_v62 = vadd.f32 %v2186_v38, %v4519_v46  ;;  %v2188_v16 = vpop.f32.mrb[63].mxu0 }
 0x35a   : > { %v4831_v26 = vadd.f32 %v3761_v8, %v3304_v24  ;;  %v3306_v40 = vadd.f32 %v2188_v16, %v4522_v52 }
 0x35b   : > { %v4835_v20 = vadd.f32 %v3762_v31, %v3305_v62 }
 0x35c   : > { %v4838_v43 = vadd.f32 %v3763_v42, %v3306_v40  ;;  %v2345_v58 = vadd.f32 %v4831_v26, %v4827_v53 }
 0x35e   : > { %2346 = vadd.xlane.f32.xlu0 %v2345_v58  ;;  %v2348_v51 = vadd.f32 %v4838_v43, %v4835_v20 }
 0x360   : > { %2349 = vadd.xlane.f32.xlu1 %v2348_v51 }
 0x373   : > { %v2257_v46 = vpop.xlane.xlu0 %2256 }
 0x374   : > { %v2352_v50 = vmul.f32 0.00390625, %v2257_v46 }
 0x376   : > { %v4845_v8 = vsub.f32 %v4528_v44, %v2352_v50  ;;  %v4848_v52 = vsub.f32 %v4532_v47, %v2352_v50 }
 0x377   : > { %v2260_v31 = vpop.xlane.xlu0 %2259 }
 0x378   : > { %v2353_v24 = vmul.f32 0.00390625, %v2260_v31  ;;  %v2448_v38 = vmul.f32 %v4845_v8, %v4845_v8  ;;  %v2449_v61 = vmul.f32 %v4848_v52, %v4848_v52 }
 0x37a   : > { %v4855_v62 = vsub.f32 %v4535_v54, %v2353_v24  ;;  %v4858_v16 = vsub.f32 %v4538_v56, %v2353_v24  ;;  %v2512_v40 = vadd.f32 %v2449_v61, %v2448_v38 }
 0x37b   : > { %v2263_v44 = vpop.xlane.xlu1 %2262 }
 0x37c   : > { %v2354_v42 = vmul.f32 0.00390625, %v2263_v44  ;;  %2513 = vadd.xlane.f32.xlu0 %v2512_v40  ;;  %v2450_v47 = vmul.f32 %v4855_v62, %v4855_v62  ;;  %v2451_v58 = vmul.f32 %v4858_v16, %v4858_v16 }
 0x37e   : > { %v4865_v51 = vsub.f32 %v4548_v1, %v2354_v42  ;;  %v4868_v46 = vsub.f32 %v4552_v5, %v2354_v42  ;;  %v2515_v54 = vadd.f32 %v2451_v58, %v2450_v47 }
 0x37f   : > { %v2266_v50 = vpop.xlane.xlu1 %2265 }
 0x380   : > { %v2355_v56 = vmul.f32 0.00390625, %v2266_v50  ;;  %2516 = vadd.xlane.f32.xlu1 %v2515_v54  ;;  %v2452_v31 = vmul.f32 %v4865_v51, %v4865_v51  ;;  %v2453_v24 = vmul.f32 %v4868_v46, %v4868_v46 }
 0x382   : > { %v4875_v38 = vsub.f32 %v4555_v9, %v2355_v56  ;;  %v4878_v61 = vsub.f32 %v4558_v10, %v2355_v56  ;;  %v2518_v1 = vadd.f32 %v2453_v24, %v2452_v31 }
 0x383   : > { %v2269_v40 = vpop.xlane.xlu0 %2268 }
 0x384   : > { %v2356_v5 = vmul.f32 0.00390625, %v2269_v40  ;;  %2519 = vadd.xlane.f32.xlu0 %v2518_v1  ;;  %v2454_v44 = vmul.f32 %v4875_v38, %v4875_v38  ;;  %v2455_v42 = vmul.f32 %v4878_v61, %v4878_v61 }
 0x385   : > { %v2272_v47 = vpop.xlane.xlu1 %2271 }
 0x386   : > { %v4885_v58 = vsub.f32 %v4567_v29, %v2356_v5  ;;  %v4888_v9 = vsub.f32 %v4571_v7, %v2356_v5  ;;  %v2357_v54 = vmul.f32 0.00390625, %v2272_v47  ;;  %v2521_v10 = vadd.f32 %v2455_v42, %v2454_v44 }
 0x388   : > { %v4891_v50 = vsub.f32 %v4575_v17, %v2357_v54  ;;  %v4894_v56 = vsub.f32 %v4578_v18, %v2357_v54  ;;  %2522 = vadd.xlane.f32.xlu1 %v2521_v10  ;;  %v2456_v31 = vmul.f32 %v4885_v58, %v4885_v58  ;;  %v2457_v24 = vmul.f32 %v4888_v9, %v4888_v9 }
 0x38a   : > { %v2524_v29 = vadd.f32 %v2457_v24, %v2456_v31  ;;  %v2458_v7 = vmul.f32 %v4891_v50, %v4891_v50  ;;  %v2459_v1 = vmul.f32 %v4894_v56, %v4894_v56 }
 0x38b   : > { %v2275_v40 = vpop.xlane.xlu0 %2274 }
 0x38c   : > { %v2358_v17 = vmul.f32 0.00390625, %v2275_v40  ;;  %2525 = vadd.xlane.f32.xlu0 %v2524_v29  ;;  %v2527_v5 = vadd.f32 %v2459_v1, %v2458_v7 }
 0x38d   : > { %v2278_v18 = vpop.xlane.xlu1 %2277 }
 0x38e   : > { %v4905_v44 = vsub.f32 %v4587_v32, %v2358_v17  ;;  %v4908_v42 = vsub.f32 %v4591_v39, %v2358_v17  ;;  %v2359_v47 = vmul.f32 0.00390625, %v2278_v18  ;;  %2528 = vadd.xlane.f32.xlu1 %v2527_v5 }
 0x390   : > { %v4911_v54 = vsub.f32 %v4595_v27, %v2359_v47  ;;  %v4914_v10 = vsub.f32 %v4598_v45, %v2359_v47  ;;  %v2460_v31 = vmul.f32 %v4905_v44, %v4905_v44  ;;  %v2461_v24 = vmul.f32 %v4908_v42, %v4908_v42 }
 0x392   : > { %v2530_v29 = vadd.f32 %v2461_v24, %v2460_v31  ;;  %v2462_v32 = vmul.f32 %v4911_v54, %v4911_v54  ;;  %v2463_v39 = vmul.f32 %v4914_v10, %v4914_v10 }
 0x393   : > { %v2281_v7 = vpop.xlane.xlu0 %2280 }
 0x394   : > { %v2360_v1 = vmul.f32 0.00390625, %v2281_v7  ;;  %2531 = vadd.xlane.f32.xlu0 %v2530_v29  ;;  %v2533_v27 = vadd.f32 %v2463_v39, %v2462_v32 }
 0x395   : > { %v2284_v40 = vpop.xlane.xlu1 %2283 }
 0x396   : > { %v4925_v45 = vsub.f32 %v4607_v60, %v2360_v1  ;;  %v4928_v17 = vsub.f32 %v4611_v35, %v2360_v1  ;;  %v2361_v5 = vmul.f32 0.00390625, %v2284_v40  ;;  %2534 = vadd.xlane.f32.xlu1 %v2533_v27 }
 0x398   : > { %v4931_v18 = vsub.f32 %v4615_v11, %v2361_v5  ;;  %v4934_v47 = vsub.f32 %v4618_v13, %v2361_v5  ;;  %v2464_v31 = vmul.f32 %v4925_v45, %v4925_v45  ;;  %v2465_v24 = vmul.f32 %v4928_v17, %v4928_v17 }
 0x39a   : > { %v2536_v29 = vadd.f32 %v2465_v24, %v2464_v31  ;;  %v2466_v60 = vmul.f32 %v4931_v18, %v4931_v18  ;;  %v2467_v35 = vmul.f32 %v4934_v47, %v4934_v47 }
 0x39b   : > { %v2287_v32 = vpop.xlane.xlu0 %2286 }
 0x39c   : > { %v2362_v39 = vmul.f32 0.00390625, %v2287_v32  ;;  %2537 = vadd.xlane.f32.xlu0 %v2536_v29  ;;  %v2539_v11 = vadd.f32 %v2467_v35, %v2466_v60 }
 0x39d   : > { %v2290_v7 = vpop.xlane.xlu1 %2289 }
 0x39e   : > { %v4945_v13 = vsub.f32 %v4627_v6, %v2362_v39  ;;  %v4948_v1 = vsub.f32 %v4631_v34, %v2362_v39  ;;  %v2363_v27 = vmul.f32 0.00390625, %v2290_v7  ;;  %2540 = vadd.xlane.f32.xlu1 %v2539_v11 }
 0x3a0   : > { %v4951_v40 = vsub.f32 %v4635_v3, %v2363_v27  ;;  %v4954_v5 = vsub.f32 %v4638_v21, %v2363_v27  ;;  %v2468_v31 = vmul.f32 %v4945_v13, %v4945_v13  ;;  %v2469_v24 = vmul.f32 %v4948_v1, %v4948_v1 }
 0x3a2   : > { %v2542_v29 = vadd.f32 %v2469_v24, %v2468_v31  ;;  %v2470_v6 = vmul.f32 %v4951_v40, %v4951_v40  ;;  %v2471_v34 = vmul.f32 %v4954_v5, %v4954_v5 }
 0x3a3   : > { %v2293_v60 = vpop.xlane.xlu0 %2292 }
 0x3a4   : > { %v2364_v35 = vmul.f32 0.00390625, %v2293_v60  ;;  %2543 = vadd.xlane.f32.xlu0 %v2542_v29  ;;  %v2545_v3 = vadd.f32 %v2471_v34, %v2470_v6 }
 0x3a5   : > { %v2296_v32 = vpop.xlane.xlu1 %2295 }
 0x3a6   : > { %v4965_v21 = vsub.f32 %v4647_v48, %v2364_v35  ;;  %v4968_v39 = vsub.f32 %v4651_v57, %v2364_v35  ;;  %v2365_v11 = vmul.f32 0.00390625, %v2296_v32  ;;  %2546 = vadd.xlane.f32.xlu1 %v2545_v3 }
 0x3a8   : > { %v4971_v7 = vsub.f32 %v4655_v59, %v2365_v11  ;;  %v4974_v27 = vsub.f32 %v4658_v0, %v2365_v11  ;;  %v2472_v31 = vmul.f32 %v4965_v21, %v4965_v21  ;;  %v2473_v24 = vmul.f32 %v4968_v39, %v4968_v39 }
 0x3aa   : > { %v2548_v29 = vadd.f32 %v2473_v24, %v2472_v31  ;;  %v2474_v48 = vmul.f32 %v4971_v7, %v4971_v7  ;;  %v2475_v57 = vmul.f32 %v4974_v27, %v4974_v27 }
 0x3ab   : > { %v2299_v6 = vpop.xlane.xlu0 %2298 }
 0x3ac   : > { %v2366_v34 = vmul.f32 0.00390625, %v2299_v6  ;;  %2549 = vadd.xlane.f32.xlu0 %v2548_v29  ;;  %v2551_v59 = vadd.f32 %v2475_v57, %v2474_v48 }
 0x3ad   : > { %v2302_v60 = vpop.xlane.xlu1 %2301 }
 0x3ae   : > { %v4985_v0 = vsub.f32 %v4667_v25, %v2366_v34  ;;  %v4988_v35 = vsub.f32 %v4671_v19, %v2366_v34  ;;  %v2367_v3 = vmul.f32 0.00390625, %v2302_v60  ;;  %2552 = vadd.xlane.f32.xlu1 %v2551_v59 }
 0x3b0   : > { %v4991_v32 = vsub.f32 %v4675_v49, %v2367_v3  ;;  %v4994_v11 = vsub.f32 %v4678_v4, %v2367_v3  ;;  %v2476_v31 = vmul.f32 %v4985_v0, %v4985_v0  ;;  %v2477_v24 = vmul.f32 %v4988_v35, %v4988_v35 }
 0x3b2   : > { %v2554_v29 = vadd.f32 %v2477_v24, %v2476_v31  ;;  %v2478_v25 = vmul.f32 %v4991_v32, %v4991_v32  ;;  %v2479_v19 = vmul.f32 %v4994_v11, %v4994_v11 }
 0x3b3   : > { %v2305_v48 = vpop.xlane.xlu0 %2304 }
 0x3b4   : > { %v2368_v57 = vmul.f32 0.00390625, %v2305_v48  ;;  %2555 = vadd.xlane.f32.xlu0 %v2554_v29  ;;  %v2557_v49 = vadd.f32 %v2479_v19, %v2478_v25 }
 0x3b5   : > { %v2308_v6 = vpop.xlane.xlu1 %2307 }
 0x3b6   : > { %v5005_v4 = vsub.f32 %v4687_v55, %v2368_v57  ;;  %v5008_v34 = vsub.f32 %v4691_v63, %v2368_v57  ;;  %v2369_v59 = vmul.f32 0.00390625, %v2308_v6  ;;  %2558 = vadd.xlane.f32.xlu1 %v2557_v49 }
 0x3b8   : > { %v5011_v60 = vsub.f32 %v4695_v2, %v2369_v59  ;;  %v5014_v3 = vsub.f32 %v4698_v12, %v2369_v59  ;;  %v2480_v31 = vmul.f32 %v5005_v4, %v5005_v4  ;;  %v2481_v24 = vmul.f32 %v5008_v34, %v5008_v34 }
 0x3ba   : > { %v2560_v29 = vadd.f32 %v2481_v24, %v2480_v31  ;;  %v2482_v55 = vmul.f32 %v5011_v60, %v5011_v60  ;;  %v2483_v63 = vmul.f32 %v5014_v3, %v5014_v3 }
 0x3bb   : > { %v2311_v25 = vpop.xlane.xlu0 %2310 }
 0x3bc   : > { %v2370_v19 = vmul.f32 0.00390625, %v2311_v25  ;;  %2561 = vadd.xlane.f32.xlu0 %v2560_v29  ;;  %v2563_v2 = vadd.f32 %v2483_v63, %v2482_v55 }
 0x3bd   : > { %v2314_v48 = vpop.xlane.xlu1 %2313 }
 0x3be   : > { %v5025_v12 = vsub.f32 %v4707_v33, %v2370_v19  ;;  %v5028_v57 = vsub.f32 %v4711_v36, %v2370_v19  ;;  %v2371_v49 = vmul.f32 0.00390625, %v2314_v48  ;;  %2564 = vadd.xlane.f32.xlu1 %v2563_v2 }
 0x3c0   : > { %v5031_v6 = vsub.f32 %v4715_v41, %v2371_v49  ;;  %v5034_v59 = vsub.f32 %v4718_v28, %v2371_v49  ;;  %v2484_v31 = vmul.f32 %v5025_v12, %v5025_v12  ;;  %v2485_v24 = vmul.f32 %v5028_v57, %v5028_v57 }
 0x3c2   : > { %v2566_v29 = vadd.f32 %v2485_v24, %v2484_v31  ;;  %v2486_v33 = vmul.f32 %v5031_v6, %v5031_v6  ;;  %v2487_v36 = vmul.f32 %v5034_v59, %v5034_v59 }
 0x3c3   : > { %v2317_v55 = vpop.xlane.xlu0 %2316 }
 0x3c4   : > { %v2372_v63 = vmul.f32 0.00390625, %v2317_v55  ;;  %2567 = vadd.xlane.f32.xlu0 %v2566_v29  ;;  %v2569_v41 = vadd.f32 %v2487_v36, %v2486_v33 }
 0x3c5   : > { %v2320_v25 = vpop.xlane.xlu1 %2319 }
 0x3c6   : > { %v5045_v28 = vsub.f32 %v4727_v23, %v2372_v63  ;;  %v5048_v19 = vsub.f32 %v4731_v15, %v2372_v63  ;;  %v2373_v2 = vmul.f32 0.00390625, %v2320_v25  ;;  %2570 = vadd.xlane.f32.xlu1 %v2569_v41  ;;  %v5572_v25 = vld [vmem:[#allocation14_spill] sm:$0xff] }
 0x3c8   : > { %v5051_v48 = vsub.f32 %v4735_v22, %v2373_v2  ;;  %v5054_v49 = vsub.f32 %v4738_v37, %v2373_v2  ;;  %v2488_v31 = vmul.f32 %v5045_v28, %v5045_v28  ;;  %v2489_v24 = vmul.f32 %v5048_v19, %v5048_v19 }
 0x3ca   : > { %5569 = vst [vmem:[#allocation28_spill] sm:$0xff] %v5054_v49  ;;  %v2572_v29 = vadd.f32 %v2489_v24, %v2488_v31  ;;  %v2490_v23 = vmul.f32 %v5051_v48, %v5051_v48  ;;  %v2491_v15 = vmul.f32 %v5054_v49, %v5054_v49  ;;  %v5574_v31 = vld [vmem:[#allocation15_spill] sm:$0xff] }
 0x3cb   : > { %v2323_v33 = vpop.xlane.xlu0 %2322 }
 0x3cc   : > { %v2374_v36 = vmul.f32 0.00390625, %v2323_v33  ;;  %2573 = vadd.xlane.f32.xlu0 %v2572_v29  ;;  %v2575_v22 = vadd.f32 %v2491_v15, %v2490_v23 }
 0x3cd   : > { %v2326_v55 = vpop.xlane.xlu1 %2325 }
 0x3ce   : > { %v5065_v37 = vsub.f32 %v4747_v14, %v2374_v36  ;;  %v5068_v63 = vsub.f32 %v4751_v30, %v2374_v36  ;;  %v2375_v41 = vmul.f32 0.00390625, %v2326_v55  ;;  %2576 = vadd.xlane.f32.xlu1 %v2575_v22 }
 0x3d0   : > { %5570 = vst [vmem:[#allocation29_spill] sm:$0xff] %v5065_v37  ;;  %5571 = vst [vmem:[#allocation30_spill] sm:$0xff] %v5068_v63  ;;  %v5071_v2 = vsub.f32 %v5572_v25, %v2375_v41  ;;  %v5074_v24 = vsub.f32 %v5574_v31, %v2375_v41  ;;  %v2492_v33 = vmul.f32 %v5065_v37, %v5065_v37  ;;  %v5576_v41 = vld [vmem:[#allocation16_spill] sm:$0xff]  ;;  %v5578_v31 = vld [vmem:[#allocation17_spill] sm:$0xff] }
 0x3d1   : > { %v2493_v29 = vmul.f32 %v5068_v63, %v5068_v63 }
 0x3d2   : > { %5573 = vst [vmem:[#allocation14_spill] sm:$0xff] %v5071_v2  ;;  %5575 = vst [vmem:[#allocation15_spill] sm:$0xff] %v5074_v24  ;;  %v2494_v14 = vmul.f32 %v5071_v2, %v5071_v2  ;;  %v2495_v30 = vmul.f32 %v5074_v24, %v5074_v24  ;;  %v5582_v2 = vld [vmem:[#allocation19_spill] sm:$0xff] }
 0x3d3   : > { %v2578_v23 = vadd.f32 %v2493_v29, %v2492_v33  ;;  %v2329_v15 = vpop.xlane.xlu0 %2328  ;;  %v5580_v33 = vld [vmem:[#allocation18_spill] sm:$0xff] }
 0x3d4   : > { %v2376_v36 = vmul.f32 0.00390625, %v2329_v15  ;;  %v2581_v22 = vadd.f32 %v2495_v30, %v2494_v14 }
 0x3d5   : > { %2579 = vadd.xlane.f32.xlu0 %v2578_v23  ;;  %v2332_v55 = vpop.xlane.xlu1 %2331 }
 0x3d6   : > { %v5085_v25 = vsub.f32 %v5576_v41, %v2376_v36  ;;  %v5088_v37 = vsub.f32 %v5578_v31, %v2376_v36  ;;  %v2377_v49 = vmul.f32 0.00390625, %v2332_v55  ;;  %2582 = vadd.xlane.f32.xlu1 %v2581_v22 }
 0x3d8   : > { %5577 = vst [vmem:[#allocation16_spill] sm:$0xff] %v5085_v25  ;;  %5579 = vst [vmem:[#allocation17_spill] sm:$0xff] %v5088_v37  ;;  %v5091_v29 = vsub.f32 %v5580_v33, %v2377_v49  ;;  %v5094_v63 = vsub.f32 %v5582_v2, %v2377_v49  ;;  %v2496_v15 = vmul.f32 %v5085_v25, %v5085_v25  ;;  %v5584_v49 = vld [vmem:[#allocation20_spill] sm:$0xff]  ;;  %v5586_v33 = vld [vmem:[#allocation21_spill] sm:$0xff] }
 0x3d9   : > { %v2497_v23 = vmul.f32 %v5088_v37, %v5088_v37 }
 0x3da   : > { %5581 = vst [vmem:[#allocation18_spill] sm:$0xff] %v5091_v29  ;;  %5583 = vst [vmem:[#allocation19_spill] sm:$0xff] %v5094_v63  ;;  %v2498_v30 = vmul.f32 %v5091_v29, %v5091_v29  ;;  %v2499_v36 = vmul.f32 %v5094_v63, %v5094_v63  ;;  %v5590_v29 = vld [vmem:[#allocation23_spill] sm:$0xff] }
 0x3db   : > { %v2584_v14 = vadd.f32 %v2497_v23, %v2496_v15  ;;  %v2335_v22 = vpop.xlane.xlu0 %2334  ;;  %v5588_v15 = vld [vmem:[#allocation22_spill] sm:$0xff] }
 0x3dc   : > { %v2378_v55 = vmul.f32 0.00390625, %v2335_v22  ;;  %v2587_v41 = vadd.f32 %v2499_v36, %v2498_v30 }
 0x3dd   : > { %2585 = vadd.xlane.f32.xlu0 %v2584_v14  ;;  %v2338_v31 = vpop.xlane.xlu1 %2337 }
 0x3de   : > { %v5105_v2 = vsub.f32 %v5584_v49, %v2378_v55  ;;  %v5108_v25 = vsub.f32 %v5586_v33, %v2378_v55  ;;  %v2379_v24 = vmul.f32 0.00390625, %v2338_v31  ;;  %2588 = vadd.xlane.f32.xlu1 %v2587_v41 }
 0x3e0   : > { %5585 = vst [vmem:[#allocation20_spill] sm:$0xff] %v5105_v2  ;;  %5587 = vst [vmem:[#allocation21_spill] sm:$0xff] %v5108_v25  ;;  %v5111_v23 = vsub.f32 %v5588_v15, %v2379_v24  ;;  %v5114_v37 = vsub.f32 %v5590_v29, %v2379_v24  ;;  %v2500_v22 = vmul.f32 %v5105_v2, %v5105_v2  ;;  %v5591_v24 = vld [vmem:[#allocation24_spill] sm:$0xff]  ;;  %v5592_v15 = vld [vmem:[#allocation25_spill] sm:$0xff] }
 0x3e1   : > { %v2501_v14 = vmul.f32 %v5108_v25, %v5108_v25 }
 0x3e2   : > { %5589 = vst [vmem:[#allocation22_spill] sm:$0xff] %v5111_v23  ;;  %v2502_v36 = vmul.f32 %v5111_v23, %v5111_v23  ;;  %v2503_v55 = vmul.f32 %v5114_v37, %v5114_v37  ;;  %v5596_v23 = vld [vmem:[#allocation27_spill] sm:$0xff] }
 0x3e3   : > { %v2590_v30 = vadd.f32 %v2501_v14, %v2500_v22  ;;  %v2341_v41 = vpop.xlane.xlu0 %2340  ;;  %v5594_v22 = vld [vmem:[#allocation26_spill] sm:$0xff] }
 0x3e4   : > { %v2380_v31 = vmul.f32 0.00390625, %v2341_v41  ;;  %v2593_v49 = vadd.f32 %v2503_v55, %v2502_v36 }
 0x3e5   : > { %2591 = vadd.xlane.f32.xlu0 %v2590_v30  ;;  %v2344_v33 = vpop.xlane.xlu1 %2343 }
 0x3e6   : > { %v5125_v29 = vsub.f32 %v5591_v24, %v2380_v31  ;;  %v5128_v2 = vsub.f32 %v5592_v15, %v2380_v31  ;;  %v2381_v63 = vmul.f32 0.00390625, %v2344_v33  ;;  %2594 = vadd.xlane.f32.xlu1 %v2593_v49 }
 0x3e8   : > { %5593 = vst [vmem:[#allocation23_spill] sm:$0xff] %v5128_v2  ;;  %v5131_v14 = vsub.f32 %v5594_v22, %v2381_v63  ;;  %v5134_v25 = vsub.f32 %v5596_v23, %v2381_v63  ;;  %v2504_v41 = vmul.f32 %v5125_v29, %v5125_v29  ;;  %v2505_v30 = vmul.f32 %v5128_v2, %v5128_v2 }
 0x3ea   : > { %5595 = vst [vmem:[#allocation24_spill] sm:$0xff] %v5131_v14  ;;  %5597 = vst [vmem:[#allocation25_spill] sm:$0xff] %v5134_v25  ;;  %v2596_v36 = vadd.f32 %v2505_v30, %v2504_v41  ;;  %v2506_v55 = vmul.f32 %v5131_v14, %v5131_v14  ;;  %v2507_v31 = vmul.f32 %v5134_v25, %v5134_v25 }
 0x3eb   : > { %v2347_v49 = vpop.xlane.xlu0 %2346 }
 0x3ec   : > { %v2382_v33 = vmul.f32 0.00390625, %v2347_v49  ;;  %2597 = vadd.xlane.f32.xlu0 %v2596_v36  ;;  %v2599_v24 = vadd.f32 %v2507_v31, %v2506_v55 }
 0x3ed   : > { %v2350_v15 = vpop.xlane.xlu1 %2349 }
 0x3ee   : > { %v5145_v63 = vsub.f32 %v4827_v53, %v2382_v33  ;;  %v5148_v23 = vsub.f32 %v4831_v26, %v2382_v33  ;;  %v2383_v22 = vmul.f32 0.00390625, %v2350_v15  ;;  %2600 = vadd.xlane.f32.xlu1 %v2599_v24 }
 0x3f0   : > { %5598 = vst [vmem:[#allocation26_spill] sm:$0xff] %v5145_v63  ;;  %5599 = vst [vmem:[#allocation27_spill] sm:$0xff] %v5148_v23  ;;  %v5151_v41 = vsub.f32 %v4835_v20, %v2383_v22  ;;  %v5154_v30 = vsub.f32 %v4838_v43, %v2383_v22  ;;  %v2508_v49 = vmul.f32 %v5145_v63, %v5145_v63 }
 0x3f1   : > { %v2509_v36 = vmul.f32 %v5148_v23, %v5148_v23 }
 0x3f2   : > { %5600 = vst [vmem:[#allocation31_spill] sm:$0xff] %v5151_v41  ;;  %5601 = vst [vmem:[#allocation32_spill] sm:$0xff] %v5154_v30  ;;  %v2510_v53 = vmul.f32 %v5151_v41, %v5151_v41  ;;  %v2511_v26 = vmul.f32 %v5154_v30, %v5154_v30 }
 0x3f3   : > { %v2602_v55 = vadd.f32 %v2509_v36, %v2508_v49  ;;  %v2768_v49 = vld [vmem:[%s5498_s5] sm:$0x3] }
 0x3f4   : > { %v2605_v31 = vadd.f32 %v2511_v26, %v2510_v53  ;;  %v5602_v26 = vld [vmem:[#allocation12_spill] sm:$0xff] }
 0x3f5   : > { %2603 = vadd.xlane.f32.xlu0 %v2602_v55  ;;  %v2844_v55 = vld [vmem:[%s5499_s6] sm:$0x3] }
 0x3f6   : > { %2606 = vadd.xlane.f32.xlu1 %v2605_v31  ;;  %v5171_v31 = vrot.slane %v2768_v49, %v5602_v26 }
 0x409   : > { %v2514_v20 = vpop.xlane.xlu0 %2513 }
 0x40a   : > { %v2608_v33 = vmul.f32 0.00390625, %v2514_v20  ;;  %v5603_v20 = vld [vmem:[#allocation13_spill] sm:$0xff] }
 0x40c   : > { %v2640_v43 = vadd.f32 1e-05, %v2608_v33  ;;  %v5174_v33 = vrot.slane %v2768_v49, %v5603_v20 }
 0x40d   : > { %v2517_v24 = vpop.xlane.xlu1 %2516 }
 0x40e   : > { %3636 = vrsqrt.f32 %v2640_v43  ;;  %v2609_v15 = vmul.f32 0.00390625, %v2517_v24  ;;  %v5177_v24 = vrot.slane %v2844_v55, %v5602_v26 }
 0x410   : > { %v2641_v22 = vadd.f32 1e-05, %v2609_v15 }
 0x411   : > { %v2520_v63 = vpop.xlane.xlu0 %2519 }
 0x412   : > { %3638 = vrsqrt.f32 %v2641_v22  ;;  %v2610_v23 = vmul.f32 0.00390625, %v2520_v63 }
 0x414   : > { %v2642_v36 = vadd.f32 1e-05, %v2610_v23  ;;  %v5180_v23 = vrot.slane %v2844_v55, %v5603_v20 }
 0x415   : > { %v2523_v41 = vpop.xlane.xlu1 %2522 }
 0x416   : > { %3640 = vrsqrt.f32 %v2642_v36  ;;  %v2611_v53 = vmul.f32 0.00390625, %v2523_v41 }
 0x418   : > { %v3637_v43 = vpop.eup %3636  ;;  %v2643_v63 = vadd.f32 1e-05, %v2611_v53 }
 0x419   : > { %v2704_v15 = vmul.f32 %v3637_v43, %v4845_v8  ;;  %v2705_v22 = vmul.f32 %v3637_v43, %v4848_v52  ;;  %v2526_v41 = vpop.xlane.xlu0 %2525 }
 0x41a   : > { %3642 = vrsqrt.f32 %v2643_v63  ;;  %v2612_v36 = vmul.f32 0.00390625, %v2526_v41 }
 0x41b   : > { %v2780_v30 = vmul.f32 %v5171_v31, %v2704_v15  ;;  %v2781_v49 = vmul.f32 %v5174_v33, %v2705_v22  ;;  %v2529_v25 = vpop.xlane.xlu1 %2528 }
 0x41c   : > { %v3639_v53 = vpop.eup %3638  ;;  %v2644_v14 = vadd.f32 1e-05, %v2612_v36  ;;  %v2613_v26 = vmul.f32 0.00390625, %v2529_v25 }
 0x41d   : > { %v2856_v2 = vadd.f32 %v5177_v24, %v2780_v30  ;;  %v2857_v55 = vadd.f32 %v5180_v23, %v2781_v49  ;;  %v2706_v8 = vmul.f32 %v3639_v53, %v4855_v62  ;;  %v2707_v52 = vmul.f32 %v3639_v53, %v4858_v16 }
 0x41e   : > { %3644 = vrsqrt.f32 %v2644_v14  ;;  %v2645_v20 = vadd.f32 1e-05, %v2613_v26 }
 0x41f   : > { %2920 = vst [vmem:[%s5192_s22] sm:$0xff] %v2856_v2  ;;  %2921 = vst [vmem:[%s5192_s22 + $0x8] sm:$0xff] %v2857_v55  ;;  %v2782_v25 = vmul.f32 %v5171_v31, %v2706_v8  ;;  %v2783_v30 = vmul.f32 %v5174_v33, %v2707_v52 }
 0x420   : > { %v3641_v43 = vpop.eup %3640  ;;  %3646 = vrsqrt.f32 %v2645_v20 }
 0x421   : > { %v2858_v62 = vadd.f32 %v5177_v24, %v2782_v25  ;;  %v2859_v16 = vadd.f32 %v5180_v23, %v2783_v30  ;;  %v2708_v14 = vmul.f32 %v3641_v43, %v4865_v51  ;;  %v2709_v63 = vmul.f32 %v3641_v43, %v4868_v46  ;;  %v2532_v15 = vpop.xlane.xlu0 %2531 }
 0x422   : > { %v2614_v22 = vmul.f32 0.00390625, %v2532_v15 }
 0x423   : > { %2922 = vst [vmem:[%s5192_s22 + $0x10] sm:$0xff] %v2858_v62  ;;  %2923 = vst [vmem:[%s5192_s22 + $0x18] sm:$0xff] %v2859_v16  ;;  %v2784_v2 = vmul.f32 %v5171_v31, %v2708_v14  ;;  %v2785_v41 = vmul.f32 %v5174_v33, %v2709_v63  ;;  %v2535_v36 = vpop.xlane.xlu1 %2534 }
 0x424   : > { %v3643_v49 = vpop.eup %3642  ;;  %v2646_v53 = vadd.f32 1e-05, %v2614_v22  ;;  %v2615_v26 = vmul.f32 0.00390625, %v2535_v36 }
 0x425   : > { %v2860_v55 = vadd.f32 %v5177_v24, %v2784_v2  ;;  %v2861_v51 = vadd.f32 %v5180_v23, %v2785_v41  ;;  %v2710_v46 = vmul.f32 %v3643_v49, %v4875_v38  ;;  %v2711_v8 = vmul.f32 %v3643_v49, %v4878_v61 }
 0x426   : > { %3648 = vrsqrt.f32 %v2646_v53  ;;  %v2647_v52 = vadd.f32 1e-05, %v2615_v26 }
 0x427   : > { %2924 = vst [vmem:[%s5192_s22 + $0x20] sm:$0xff] %v2860_v55  ;;  %2925 = vst [vmem:[%s5192_s22 + $0x28] sm:$0xff] %v2861_v51  ;;  %v2786_v20 = vmul.f32 %v5171_v31, %v2710_v46  ;;  %v2787_v25 = vmul.f32 %v5174_v33, %v2711_v8 }
 0x428   : > { %v3645_v30 = vpop.eup %3644  ;;  %3650 = vrsqrt.f32 %v2647_v52 }
 0x429   : > { %v2862_v43 = vadd.f32 %v5177_v24, %v2786_v20  ;;  %v2863_v62 = vadd.f32 %v5180_v23, %v2787_v25  ;;  %v2712_v38 = vmul.f32 %v3645_v30, %v4885_v58  ;;  %v2713_v61 = vmul.f32 %v3645_v30, %v4888_v9  ;;  %v2538_v16 = vpop.xlane.xlu0 %2537 }
 0x42a   : > { %v3647_v14 = vpop.eup %3646  ;;  %v2616_v63 = vmul.f32 0.00390625, %v2538_v16 }
 0x42b   : > { %2926 = vst [vmem:[%s5192_s22 + $0x30] sm:$0xff] %v2862_v43  ;;  %2927 = vst [vmem:[%s5192_s22 + $0x38] sm:$0xff] %v2863_v62  ;;  %v2788_v15 = vmul.f32 %v5171_v31, %v2712_v38  ;;  %v2789_v22 = vmul.f32 %v5174_v33, %v2713_v61  ;;  %v2714_v2 = vmul.f32 %v3647_v14, %v4891_v50  ;;  %v2541_v36 = vpop.xlane.xlu1 %2540 }
 0x42c   : > { %v2715_v41 = vmul.f32 %v3647_v14, %v4894_v56  ;;  %v2648_v58 = vadd.f32 1e-05, %v2616_v63  ;;  %v2617_v9 = vmul.f32 0.00390625, %v2541_v36 }
 0x42d   : > { %v2864_v49 = vadd.f32 %v5177_v24, %v2788_v15  ;;  %v2865_v53 = vadd.f32 %v5180_v23, %v2789_v22  ;;  %v2790_v26 = vmul.f32 %v5171_v31, %v2714_v2 }
 0x42e   : > { %v2791_v55 = vmul.f32 %v5174_v33, %v2715_v41  ;;  %3652 = vrsqrt.f32 %v2648_v58  ;;  %v2649_v51 = vadd.f32 1e-05, %v2617_v9 }
 0x42f   : > { %2928 = vst [vmem:[%s5192_s22 + $0x40] sm:$0xff] %v2864_v49  ;;  %2929 = vst [vmem:[%s5192_s22 + $0x48] sm:$0xff] %v2865_v53  ;;  %v2866_v50 = vadd.f32 %v5177_v24, %v2790_v26 }
 0x430   : > { %v2867_v56 = vadd.f32 %v5180_v23, %v2791_v55  ;;  %v3649_v46 = vpop.eup %3648  ;;  %3654 = vrsqrt.f32 %v2649_v51 }
 0x431   : > { %2930 = vst [vmem:[%s5192_s22 + $0x50] sm:$0xff] %v2866_v50  ;;  %v2716_v8 = vmul.f32 %v3649_v46, %v4905_v44  ;;  %v2717_v52 = vmul.f32 %v3649_v46, %v4908_v42  ;;  %v2544_v20 = vpop.xlane.xlu0 %2543 }
 0x432   : > { %2931 = vst [vmem:[%s5192_s22 + $0x58] sm:$0xff] %v2867_v56  ;;  %v3651_v25 = vpop.eup %3650  ;;  %v2618_v30 = vmul.f32 0.00390625, %v2544_v20 }
 0x433   : > { %v2792_v43 = vmul.f32 %v5171_v31, %v2716_v8  ;;  %v2793_v62 = vmul.f32 %v5174_v33, %v2717_v52  ;;  %v2718_v38 = vmul.f32 %v3651_v25, %v4911_v54  ;;  %v2719_v61 = vmul.f32 %v3651_v25, %v4914_v10  ;;  %v2547_v16 = vpop.xlane.xlu1 %2546 }
 0x434   : > { %v2650_v14 = vadd.f32 1e-05, %v2618_v30  ;;  %v2619_v44 = vmul.f32 0.00390625, %v2547_v16 }
 0x435   : > { %v2868_v42 = vadd.f32 %v5177_v24, %v2792_v43  ;;  %v2869_v63 = vadd.f32 %v5180_v23, %v2793_v62  ;;  %v2794_v15 = vmul.f32 %v5171_v31, %v2718_v38  ;;  %v2795_v22 = vmul.f32 %v5174_v33, %v2719_v61 }
 0x436   : > { %3656 = vrsqrt.f32 %v2650_v14  ;;  %v2651_v2 = vadd.f32 1e-05, %v2619_v44 }
 0x437   : > { %2932 = vst [vmem:[%s5192_s22 + $0x60] sm:$0xff] %v2868_v42  ;;  %2933 = vst [vmem:[%s5192_s22 + $0x68] sm:$0xff] %v2869_v63  ;;  %v2870_v54 = vadd.f32 %v5177_v24, %v2794_v15  ;;  %v2871_v10 = vadd.f32 %v5180_v23, %v2795_v22 }
 0x438   : > { %v3653_v41 = vpop.eup %3652  ;;  %3658 = vrsqrt.f32 %v2651_v2 }
 0x439   : > { %2934 = vst [vmem:[%s5192_s22 + $0x70] sm:$0xff] %v2870_v54  ;;  %2935 = vst [vmem:[%s5192_s22 + $0x78] sm:$0xff] %v2871_v10  ;;  %v2720_v36 = vmul.f32 %v3653_v41, %v4925_v45  ;;  %v2721_v58 = vmul.f32 %v3653_v41, %v4928_v17  ;;  %v2550_v9 = vpop.xlane.xlu0 %2549 }
 0x43a   : > { %v3655_v49 = vpop.eup %3654  ;;  %v2620_v53 = vmul.f32 0.00390625, %v2550_v9 }
 0x43b   : > { %v2796_v26 = vmul.f32 %v5171_v31, %v2720_v36  ;;  %v2797_v55 = vmul.f32 %v5174_v33, %v2721_v58  ;;  %v2722_v51 = vmul.f32 %v3655_v49, %v4931_v18  ;;  %v2723_v50 = vmul.f32 %v3655_v49, %v4934_v47  ;;  %v2553_v56 = vpop.xlane.xlu1 %2552 }
 0x43c   : > { %v2652_v46 = vadd.f32 1e-05, %v2620_v53  ;;  %v2621_v45 = vmul.f32 0.00390625, %v2553_v56 }
 0x43d   : > { %v2872_v17 = vadd.f32 %v5177_v24, %v2796_v26  ;;  %v2873_v8 = vadd.f32 %v5180_v23, %v2797_v55  ;;  %v2798_v52 = vmul.f32 %v5171_v31, %v2722_v51  ;;  %v2799_v20 = vmul.f32 %v5174_v33, %v2723_v50 }
 0x43e   : > { %3660 = vrsqrt.f32 %v2652_v46  ;;  %v2653_v25 = vadd.f32 1e-05, %v2621_v45 }
 0x43f   : > { %2936 = vst [vmem:[%s5192_s22 + $0x80] sm:$0xff] %v2872_v17  ;;  %2937 = vst [vmem:[%s5192_s22 + $0x88] sm:$0xff] %v2873_v8  ;;  %v2874_v18 = vadd.f32 %v5177_v24, %v2798_v52  ;;  %v2875_v47 = vadd.f32 %v5180_v23, %v2799_v20 }
 0x440   : > { %v3657_v30 = vpop.eup %3656  ;;  %3662 = vrsqrt.f32 %v2653_v25 }
 0x441   : > { %2938 = vst [vmem:[%s5192_s22 + $0x90] sm:$0xff] %v2874_v18  ;;  %2939 = vst [vmem:[%s5192_s22 + $0x98] sm:$0xff] %v2875_v47  ;;  %v2724_v43 = vmul.f32 %v3657_v30, %v4945_v13  ;;  %v2725_v62 = vmul.f32 %v3657_v30, %v4948_v1  ;;  %v2556_v38 = vpop.xlane.xlu0 %2555 }
 0x442   : > { %v3659_v61 = vpop.eup %3658  ;;  %v2622_v16 = vmul.f32 0.00390625, %v2556_v38 }
 0x443   : > { %v2800_v14 = vmul.f32 %v5171_v31, %v2724_v43  ;;  %v2801_v44 = vmul.f32 %v5174_v33, %v2725_v62  ;;  %v2726_v42 = vmul.f32 %v3659_v61, %v4951_v40  ;;  %v2727_v63 = vmul.f32 %v3659_v61, %v4954_v5  ;;  %v2559_v15 = vpop.xlane.xlu1 %2558 }
 0x444   : > { %v2654_v22 = vadd.f32 1e-05, %v2622_v16  ;;  %v2623_v13 = vmul.f32 0.00390625, %v2559_v15 }
 0x445   : > { %v2876_v1 = vadd.f32 %v5177_v24, %v2800_v14  ;;  %v2877_v2 = vadd.f32 %v5180_v23, %v2801_v44  ;;  %v2802_v54 = vmul.f32 %v5171_v31, %v2726_v42  ;;  %v2803_v10 = vmul.f32 %v5174_v33, %v2727_v63 }
 0x446   : > { %3664 = vrsqrt.f32 %v2654_v22  ;;  %v2655_v41 = vadd.f32 1e-05, %v2623_v13 }
 0x447   : > { %2940 = vst [vmem:[%s5192_s22 + $0xa0] sm:$0xff] %v2876_v1  ;;  %2941 = vst [vmem:[%s5192_s22 + $0xa8] sm:$0xff] %v2877_v2  ;;  %v2878_v40 = vadd.f32 %v5177_v24, %v2802_v54  ;;  %v2879_v5 = vadd.f32 %v5180_v23, %v2803_v10 }
 0x448   : > { %v3661_v36 = vpop.eup %3660  ;;  %3666 = vrsqrt.f32 %v2655_v41 }
 0x449   : > { %2942 = vst [vmem:[%s5192_s22 + $0xb0] sm:$0xff] %v2878_v40  ;;  %2943 = vst [vmem:[%s5192_s22 + $0xb8] sm:$0xff] %v2879_v5  ;;  %v2728_v58 = vmul.f32 %v3661_v36, %v4965_v21  ;;  %v2729_v9 = vmul.f32 %v3661_v36, %v4968_v39  ;;  %v2562_v49 = vpop.xlane.xlu0 %2561 }
 0x44a   : > { %v3663_v53 = vpop.eup %3662  ;;  %v2624_v26 = vmul.f32 0.00390625, %v2562_v49 }
 0x44b   : > { %v2804_v55 = vmul.f32 %v5171_v31, %v2728_v58  ;;  %v2805_v51 = vmul.f32 %v5174_v33, %v2729_v9  ;;  %v2730_v50 = vmul.f32 %v3663_v53, %v4971_v7  ;;  %v2731_v56 = vmul.f32 %v3663_v53, %v4974_v27  ;;  %v2565_v46 = vpop.xlane.xlu1 %2564 }
 0x44c   : > { %v2656_v45 = vadd.f32 1e-05, %v2624_v26  ;;  %v2625_v21 = vmul.f32 0.00390625, %v2565_v46 }
 0x44d   : > { %v2880_v39 = vadd.f32 %v5177_v24, %v2804_v55  ;;  %v2881_v17 = vadd.f32 %v5180_v23, %v2805_v51  ;;  %v2806_v8 = vmul.f32 %v5171_v31, %v2730_v50  ;;  %v2807_v52 = vmul.f32 %v5174_v33, %v2731_v56 }
 0x44e   : > { %3668 = vrsqrt.f32 %v2656_v45  ;;  %v2657_v20 = vadd.f32 1e-05, %v2625_v21 }
 0x44f   : > { %2944 = vst [vmem:[%s5192_s22 + $0xc0] sm:$0xff] %v2880_v39  ;;  %2945 = vst [vmem:[%s5192_s22 + $0xc8] sm:$0xff] %v2881_v17  ;;  %v2882_v7 = vadd.f32 %v5177_v24, %v2806_v8  ;;  %v2883_v27 = vadd.f32 %v5180_v23, %v2807_v52 }
 0x450   : > { %v3665_v25 = vpop.eup %3664  ;;  %3670 = vrsqrt.f32 %v2657_v20 }
 0x451   : > { %2946 = vst [vmem:[%s5192_s22 + $0xd0] sm:$0xff] %v2882_v7  ;;  %2947 = vst [vmem:[%s5192_s22 + $0xd8] sm:$0xff] %v2883_v27  ;;  %v2732_v18 = vmul.f32 %v3665_v25, %v4985_v0  ;;  %v2733_v47 = vmul.f32 %v3665_v25, %v4988_v35  ;;  %v2568_v30 = vpop.xlane.xlu0 %2567 }
 0x452   : > { %v3667_v43 = vpop.eup %3666  ;;  %v2626_v62 = vmul.f32 0.00390625, %v2568_v30 }
 0x453   : > { %v2808_v38 = vmul.f32 %v5171_v31, %v2732_v18  ;;  %v2809_v61 = vmul.f32 %v5174_v33, %v2733_v47  ;;  %v2734_v16 = vmul.f32 %v3667_v43, %v4991_v32  ;;  %v2735_v14 = vmul.f32 %v3667_v43, %v4994_v11  ;;  %v2571_v44 = vpop.xlane.xlu1 %2570 }
 0x454   : > { %v2658_v42 = vadd.f32 1e-05, %v2626_v62  ;;  %v2627_v0 = vmul.f32 0.00390625, %v2571_v44 }
 0x455   : > { %v2884_v35 = vadd.f32 %v5177_v24, %v2808_v38  ;;  %v2885_v63 = vadd.f32 %v5180_v23, %v2809_v61  ;;  %v2810_v15 = vmul.f32 %v5171_v31, %v2734_v16  ;;  %v2811_v22 = vmul.f32 %v5174_v33, %v2735_v14 }
 0x456   : > { %3672 = vrsqrt.f32 %v2658_v42  ;;  %v2659_v13 = vadd.f32 1e-05, %v2627_v0 }
 0x457   : > { %2948 = vst [vmem:[%s5192_s22 + $0xe0] sm:$0xff] %v2884_v35  ;;  %2949 = vst [vmem:[%s5192_s22 + $0xe8] sm:$0xff] %v2885_v63  ;;  %v2886_v32 = vadd.f32 %v5177_v24, %v2810_v15  ;;  %v2887_v11 = vadd.f32 %v5180_v23, %v2811_v22  ;;  %v5604_v63 = vld [vmem:[#allocation28_spill] sm:$0xff] }
 0x458   : > { %v3669_v1 = vpop.eup %3668  ;;  %3674 = vrsqrt.f32 %v2659_v13 }
 0x459   : > { %2950 = vst [vmem:[%s5192_s22 + $0xf0] sm:$0xff] %v2886_v32  ;;  %2951 = vst [vmem:[%s5192_s22 + $0xf8] sm:$0xff] %v2887_v11  ;;  %v2736_v2 = vmul.f32 %v3669_v1, %v5005_v4  ;;  %v2737_v54 = vmul.f32 %v3669_v1, %v5008_v34  ;;  %v2574_v10 = vpop.xlane.xlu0 %2573 }
 0x45a   : > { %v3671_v41 = vpop.eup %3670  ;;  %v2628_v40 = vmul.f32 0.00390625, %v2574_v10 }
 0x45b   : > { %v2812_v5 = vmul.f32 %v5171_v31, %v2736_v2  ;;  %v2813_v36 = vmul.f32 %v5174_v33, %v2737_v54  ;;  %v2738_v58 = vmul.f32 %v3671_v41, %v5011_v60  ;;  %v2739_v9 = vmul.f32 %v3671_v41, %v5014_v3  ;;  %v2577_v49 = vpop.xlane.xlu1 %2576  ;;  %v5605_v41 = vld [vmem:[#allocation29_spill] sm:$0xff] }
 0x45c   : > { %v2660_v53 = vadd.f32 1e-05, %v2628_v40  ;;  %v2629_v4 = vmul.f32 0.00390625, %v2577_v49 }
 0x45d   : > { %v2888_v34 = vadd.f32 %v5177_v24, %v2812_v5  ;;  %v2889_v26 = vadd.f32 %v5180_v23, %v2813_v36  ;;  %v2814_v55 = vmul.f32 %v5171_v31, %v2738_v58  ;;  %v2815_v51 = vmul.f32 %v5174_v33, %v2739_v9  ;;  %v5606_v5 = vld [vmem:[#allocation30_spill] sm:$0xff] }
 0x45e   : > { %3676 = vrsqrt.f32 %v2660_v53  ;;  %v2661_v50 = vadd.f32 1e-05, %v2629_v4 }
 0x45f   : > { %2952 = vst [vmem:[%s5192_s22 + $0x100] sm:$0xff] %v2888_v34  ;;  %2953 = vst [vmem:[%s5192_s22 + $0x108] sm:$0xff] %v2889_v26  ;;  %v2890_v60 = vadd.f32 %v5177_v24, %v2814_v55  ;;  %v2891_v3 = vadd.f32 %v5180_v23, %v2815_v51  ;;  %v5607_v34 = vld [vmem:[#allocation14_spill] sm:$0xff]  ;;  %v5608_v55 = vld [vmem:[#allocation15_spill] sm:$0xff] }
 0x460   : > { %v3673_v56 = vpop.eup %3672  ;;  %3678 = vrsqrt.f32 %v2661_v50 }
 0x461   : > { %2954 = vst [vmem:[%s5192_s22 + $0x110] sm:$0xff] %v2890_v60  ;;  %2955 = vst [vmem:[%s5192_s22 + $0x118] sm:$0xff] %v2891_v3  ;;  %v2740_v46 = vmul.f32 %v3673_v56, %v5025_v12  ;;  %v2741_v45 = vmul.f32 %v3673_v56, %v5028_v57 }
 0x462   : > { %v2580_v21 = vpop.xlane.xlu0 %2579  ;;  %v3675_v39 = vpop.eup %3674 }
 0x463   : > { %v2630_v17 = vmul.f32 0.00390625, %v2580_v21  ;;  %v2816_v8 = vmul.f32 %v5171_v31, %v2740_v46  ;;  %v2817_v52 = vmul.f32 %v5174_v33, %v2741_v45  ;;  %v2742_v20 = vmul.f32 %v3675_v39, %v5031_v6  ;;  %v2583_v27 = vpop.xlane.xlu1 %2582 }
 0x464   : > { %v2743_v7 = vmul.f32 %v3675_v39, %v5034_v59  ;;  %v2631_v12 = vmul.f32 0.00390625, %v2583_v27  ;;  %v5610_v27 = vld [vmem:[#allocation17_spill] sm:$0xff] }
 0x465   : > { %v2662_v25 = vadd.f32 1e-05, %v2630_v17  ;;  %v2892_v57 = vadd.f32 %v5177_v24, %v2816_v8  ;;  %v2893_v18 = vadd.f32 %v5180_v23, %v2817_v52  ;;  %v2818_v47 = vmul.f32 %v5171_v31, %v2742_v20  ;;  %v5609_v20 = vld [vmem:[#allocation16_spill] sm:$0xff] }
 0x466   : > { %v2819_v30 = vmul.f32 %v5174_v33, %v2743_v7  ;;  %v2663_v43 = vadd.f32 1e-05, %v2631_v12 }
 0x467   : > { %3680 = vrsqrt.f32 %v2662_v25  ;;  %2956 = vst [vmem:[%s5192_s22 + $0x120] sm:$0xff] %v2892_v57  ;;  %2957 = vst [vmem:[%s5192_s22 + $0x128] sm:$0xff] %v2893_v18  ;;  %v2894_v6 = vadd.f32 %v5177_v24, %v2818_v47 }
 0x468   : > { %v2895_v59 = vadd.f32 %v5180_v23, %v2819_v30  ;;  %v3677_v62 = vpop.eup %3676  ;;  %3682 = vrsqrt.f32 %v2663_v43  ;;  %v5611_v43 = vld [vmem:[#allocation18_spill] sm:$0xff] }
 0x469   : > { %2958 = vst [vmem:[%s5192_s22 + $0x130] sm:$0xff] %v2894_v6  ;;  %v2744_v38 = vmul.f32 %v3677_v62, %v5045_v28  ;;  %v2745_v61 = vmul.f32 %v3677_v62, %v5048_v19 }
 0x46a   : > { %2959 = vst [vmem:[%s5192_s22 + $0x138] sm:$0xff] %v2895_v59  ;;  %v2586_v16 = vpop.xlane.xlu0 %2585  ;;  %v3679_v14 = vpop.eup %3678  ;;  %v5612_v59 = vld [vmem:[#allocation19_spill] sm:$0xff] }
 0x46b   : > { %v2632_v44 = vmul.f32 0.00390625, %v2586_v16  ;;  %v2820_v42 = vmul.f32 %v5171_v31, %v2744_v38  ;;  %v2821_v0 = vmul.f32 %v5174_v33, %v2745_v61  ;;  %v2746_v35 = vmul.f32 %v3679_v14, %v5051_v48  ;;  %v2589_v22 = vpop.xlane.xlu1 %2588 }
 0x46c   : > { %v2747_v15 = vmul.f32 %v3679_v14, %v5604_v63  ;;  %v2633_v28 = vmul.f32 0.00390625, %v2589_v22 }
 0x46d   : > { %v2664_v13 = vadd.f32 1e-05, %v2632_v44  ;;  %v2896_v19 = vadd.f32 %v5177_v24, %v2820_v42  ;;  %v2897_v32 = vadd.f32 %v5180_v23, %v2821_v0  ;;  %v2822_v11 = vmul.f32 %v5171_v31, %v2746_v35 }
 0x46e   : > { %v2823_v1 = vmul.f32 %v5174_v33, %v2747_v15  ;;  %v2665_v2 = vadd.f32 1e-05, %v2633_v28 }
 0x46f   : > { %3684 = vrsqrt.f32 %v2664_v13  ;;  %2960 = vst [vmem:[%s5192_s22 + $0x140] sm:$0xff] %v2896_v19  ;;  %2961 = vst [vmem:[%s5192_s22 + $0x148] sm:$0xff] %v2897_v32  ;;  %v2898_v48 = vadd.f32 %v5177_v24, %v2822_v11  ;;  %v5613_v13 = vld [vmem:[#allocation20_spill] sm:$0xff]  ;;  %v5614_v19 = vld [vmem:[#allocation21_spill] sm:$0xff] }
 0x470   : > { %v2899_v54 = vadd.f32 %v5180_v23, %v2823_v1  ;;  %3686 = vrsqrt.f32 %v2665_v2 }
 0x471   : > { %v3681_v10 = vpop.eup %3680  ;;  %2962 = vst [vmem:[%s5192_s22 + $0x150] sm:$0xff] %v2898_v48 }
 0x472   : > { %2963 = vst [vmem:[%s5192_s22 + $0x158] sm:$0xff] %v2899_v54  ;;  %v2748_v40 = vmul.f32 %v3681_v10, %v5605_v41  ;;  %v2749_v36 = vmul.f32 %v3681_v10, %v5606_v5  ;;  %v2592_v58 = vpop.xlane.xlu0 %2591  ;;  %v3683_v9 = vpop.eup %3682  ;;  %v5615_v10 = vld [vmem:[#allocation22_spill] sm:$0xff] }
 0x473   : > { %v2634_v49 = vmul.f32 0.00390625, %v2592_v58  ;;  %v2750_v26 = vmul.f32 %v3683_v9, %v5607_v34  ;;  %v2751_v51 = vmul.f32 %v3683_v9, %v5608_v55  ;;  %v2595_v50 = vpop.xlane.xlu1 %2594 }
 0x474   : > { %v2824_v53 = vmul.f32 %v5171_v31, %v2748_v40  ;;  %v2825_v4 = vmul.f32 %v5174_v33, %v2749_v36  ;;  %v2635_v3 = vmul.f32 0.00390625, %v2595_v50  ;;  %v5616_v50 = vld [vmem:[#allocation23_spill] sm:$0xff] }
 0x475   : > { %v2666_v60 = vadd.f32 1e-05, %v2634_v49  ;;  %v2826_v45 = vmul.f32 %v5171_v31, %v2750_v26  ;;  %v2827_v21 = vmul.f32 %v5174_v33, %v2751_v51 }
 0x476   : > { %v2900_v56 = vadd.f32 %v5177_v24, %v2824_v53  ;;  %v2901_v46 = vadd.f32 %v5180_v23, %v2825_v4  ;;  %v2667_v39 = vadd.f32 1e-05, %v2635_v3 }
 0x477   : > { %3688 = vrsqrt.f32 %v2666_v60  ;;  %v2902_v17 = vadd.f32 %v5177_v24, %v2826_v45  ;;  %v2903_v8 = vadd.f32 %v5180_v23, %v2827_v21  ;;  %v5617_v45 = vld [vmem:[#allocation24_spill] sm:$0xff] }
 0x478   : > { %2964 = vst [vmem:[%s5192_s22 + $0x160] sm:$0xff] %v2900_v56  ;;  %2965 = vst [vmem:[%s5192_s22 + $0x168] sm:$0xff] %v2901_v46  ;;  %3690 = vrsqrt.f32 %v2667_v39  ;;  %v5618_v39 = vld [vmem:[#allocation25_spill] sm:$0xff] }
 0x479   : > { %v3685_v52 = vpop.eup %3684  ;;  %2966 = vst [vmem:[%s5192_s22 + $0x170] sm:$0xff] %v2902_v17  ;;  %2967 = vst [vmem:[%s5192_s22 + $0x178] sm:$0xff] %v2903_v8  ;;  %v2598_v12 = vpop.xlane.xlu0 %2597 }
 0x47a   : > { %v2752_v7 = vmul.f32 %v3685_v52, %v5609_v20  ;;  %v2753_v25 = vmul.f32 %v3685_v52, %v5610_v27  ;;  %v3687_v57 = vpop.eup %3686  ;;  %v2636_v18 = vmul.f32 0.00390625, %v2598_v12  ;;  %v5619_v12 = vld [vmem:[#allocation26_spill] sm:$0xff] }
 0x47b   : > { %v2754_v6 = vmul.f32 %v3687_v57, %v5611_v43  ;;  %v2755_v62 = vmul.f32 %v3687_v57, %v5612_v59  ;;  %v2601_v38 = vpop.xlane.xlu1 %2600  ;;  %v5621_v59 = vld [vmem:[#allocation31_spill] sm:$0xff] }
 0x47c   : > { %v2828_v47 = vmul.f32 %v5171_v31, %v2752_v7  ;;  %v2829_v30 = vmul.f32 %v5174_v33, %v2753_v25  ;;  %v2668_v61 = vadd.f32 1e-05, %v2636_v18  ;;  %v2637_v16 = vmul.f32 0.00390625, %v2601_v38  ;;  %v5620_v18 = vld [vmem:[#allocation27_spill] sm:$0xff]  ;;  %v5622_v38 = vld [vmem:[#allocation32_spill] sm:$0xff] }
 0x47d   : > { %v2830_v42 = vmul.f32 %v5171_v31, %v2754_v6  ;;  %v2831_v0 = vmul.f32 %v5174_v33, %v2755_v62 }
 0x47e   : > { %v2904_v14 = vadd.f32 %v5177_v24, %v2828_v47  ;;  %v2905_v44 = vadd.f32 %v5180_v23, %v2829_v30  ;;  %3692 = vrsqrt.f32 %v2668_v61  ;;  %v2669_v35 = vadd.f32 1e-05, %v2637_v16 }
 0x47f   : > { %v2906_v63 = vadd.f32 %v5177_v24, %v2830_v42  ;;  %v2907_v15 = vadd.f32 %v5180_v23, %v2831_v0 }
 0x480   : > { %2968 = vst [vmem:[%s5192_s22 + $0x180] sm:$0xff] %v2904_v14  ;;  %2969 = vst [vmem:[%s5192_s22 + $0x188] sm:$0xff] %v2905_v44  ;;  %3694 = vrsqrt.f32 %v2669_v35 }
 0x481   : > { %v3689_v22 = vpop.eup %3688  ;;  %2970 = vst [vmem:[%s5192_s22 + $0x190] sm:$0xff] %v2906_v63  ;;  %2971 = vst [vmem:[%s5192_s22 + $0x198] sm:$0xff] %v2907_v15 }
 0x482   : > { %v2756_v28 = vmul.f32 %v3689_v22, %v5613_v13  ;;  %v2757_v32 = vmul.f32 %v3689_v22, %v5614_v19  ;;  %v2604_v11 = vpop.xlane.xlu0 %2603  ;;  %v3691_v1 = vpop.eup %3690 }
 0x483   : > { %v2638_v2 = vmul.f32 0.00390625, %v2604_v11  ;;  %v2758_v41 = vmul.f32 %v3691_v1, %v5615_v10  ;;  %v2759_v40 = vmul.f32 %v3691_v1, %v5114_v37  ;;  %v2607_v5 = vpop.xlane.xlu1 %2606 }
 0x484   : > { %v2832_v48 = vmul.f32 %v5171_v31, %v2756_v28  ;;  %v2833_v54 = vmul.f32 %v5174_v33, %v2757_v32  ;;  %v2639_v58 = vmul.f32 0.00390625, %v2607_v5 }
 0x485   : > { %v2670_v36 = vadd.f32 1e-05, %v2638_v2  ;;  %v2834_v53 = vmul.f32 %v5171_v31, %v2758_v41  ;;  %v2835_v4 = vmul.f32 %v5174_v33, %v2759_v40 }
 0x486   : > { %v2908_v9 = vadd.f32 %v5177_v24, %v2832_v48  ;;  %v2909_v49 = vadd.f32 %v5180_v23, %v2833_v54  ;;  %v2671_v34 = vadd.f32 1e-05, %v2639_v58 }
 0x487   : > { %3696 = vrsqrt.f32 %v2670_v36  ;;  %v2910_v26 = vadd.f32 %v5177_v24, %v2834_v53  ;;  %v2911_v37 = vadd.f32 %v5180_v23, %v2835_v4 }
 0x488   : > { %2972 = vst [vmem:[%s5192_s22 + $0x1a0] sm:$0xff] %v2908_v9  ;;  %2973 = vst [vmem:[%s5192_s22 + $0x1a8] sm:$0xff] %v2909_v49  ;;  %v3693_v55 = vpop.eup %3692  ;;  %3698 = vrsqrt.f32 %v2671_v34 }
 0x489   : > { %2974 = vst [vmem:[%s5192_s22 + $0x1b0] sm:$0xff] %v2910_v26  ;;  %2975 = vst [vmem:[%s5192_s22 + $0x1b8] sm:$0xff] %v2911_v37  ;;  %v2760_v51 = vmul.f32 %v3693_v55, %v5125_v29  ;;  %v2761_v60 = vmul.f32 %v3693_v55, %v5616_v50 }
 0x48a   : > { %v3695_v3 = vpop.eup %3694 }
 0x48b   : > { %v2836_v56 = vmul.f32 %v5171_v31, %v2760_v51  ;;  %v2837_v46 = vmul.f32 %v5174_v33, %v2761_v60  ;;  %v2762_v21 = vmul.f32 %v3695_v3, %v5617_v45  ;;  %v2763_v17 = vmul.f32 %v3695_v3, %v5618_v39 }
 0x48d   : > { %v2912_v8 = vadd.f32 %v5177_v24, %v2836_v56  ;;  %v2913_v52 = vadd.f32 %v5180_v23, %v2837_v46  ;;  %v2838_v20 = vmul.f32 %v5171_v31, %v2762_v21  ;;  %v2839_v29 = vmul.f32 %v5174_v33, %v2763_v17 }
 0x48f   : > { %2976 = vst [vmem:[%s5192_s22 + $0x1c0] sm:$0xff] %v2912_v8  ;;  %2977 = vst [vmem:[%s5192_s22 + $0x1c8] sm:$0xff] %v2913_v52  ;;  %v2914_v7 = vadd.f32 %v5177_v24, %v2838_v20  ;;  %v2915_v27 = vadd.f32 %v5180_v23, %v2839_v29 }
 0x491   : > { %v3697_v25 = vpop.eup %3696  ;;  %2978 = vst [vmem:[%s5192_s22 + $0x1d0] sm:$0xff] %v2914_v7  ;;  %2979 = vst [vmem:[%s5192_s22 + $0x1d8] sm:$0xff] %v2915_v27 }
 0x492   : > { %v2764_v57 = vmul.f32 %v3697_v25, %v5619_v12  ;;  %v2765_v47 = vmul.f32 %v3697_v25, %v5620_v18  ;;  %v3699_v30 = vpop.eup %3698 }
 0x493   : > { %v2766_v62 = vmul.f32 %v3699_v30, %v5621_v59  ;;  %v2767_v61 = vmul.f32 %v3699_v30, %v5622_v38 }
 0x494   : > { %v2840_v43 = vmul.f32 %v5171_v31, %v2764_v57  ;;  %v2841_v6 = vmul.f32 %v5174_v33, %v2765_v47 }
 0x495   : > { %v2842_v44 = vmul.f32 %v5171_v31, %v2766_v62  ;;  %v2843_v42 = vmul.f32 %v5174_v33, %v2767_v61 }
 0x496   : > { %v2916_v16 = vadd.f32 %v5177_v24, %v2840_v43  ;;  %v2917_v14 = vadd.f32 %v5180_v23, %v2841_v6 }
 0x497   : > { %v2918_v0 = vadd.f32 %v5177_v24, %v2842_v44  ;;  %v2919_v35 = vadd.f32 %v5180_v23, %v2843_v42 }
 0x498   : > { %2980 = vst [vmem:[%s5192_s22 + $0x1e0] sm:$0xff] %v2916_v16  ;;  %2981 = vst [vmem:[%s5192_s22 + $0x1e8] sm:$0xff] %v2917_v14 }
 0x499   : > { %2982 = vst [vmem:[%s5192_s22 + $0x1f0] sm:$0xff] %v2918_v0  ;;  %2983 = vst [vmem:[%s5192_s22 + $0x1f8] sm:$0xff] %v2919_v35 }
 0x49a   : > { %3863 = shalt.err (!%p3860_p1)
}
 0x49b   : > { %s3864_s18 = scalar_lea.hbm %s5441_s30, 8192  ;;  %s3868_s22 = scalar_lea.hbm %s5500_s7, 16384 }
 0x49c   : > { %p3865_p13 = scmp.ne.s32.totalorder %s5441_s30, %s3864_s18  ;;  %p3869_p4 = scmp.lt.u32.totalorder %s5441_s30, %s5500_s7 }
 0x49d   : > { %p3870_p7 = scmp.lt.u32.totalorder %s3868_s22, %s3864_s18  ;;  %p3872_p11 = scmp.lt.u32.totalorder %s3864_s18, %s5441_s30 }
 0x49e   : > { %p3866_p6 = pnand %p3865_p13, %p5623_p0 }
 0x49f   : > { %p3871_p8 = por %p3870_p7, %p3869_p4 }
 0x4a0   : > { %p3867_p10 = pneg %p3866_p6 }
 0x4a1   : > { %p3873_p2 = por %p3872_p11, %p3871_p8 }
 0x4a3   : > { %p3874_p3 = pnand %p3873_p2, %p3867_p10 }
 0x4a5   : > { %3877 = shalt.err (!%p3874_p3)
}
 0x4a6   : > { %s3930_s17 = smov 256   ;;  %s3931_s9 = smov 16  }
 0x4a7   : > { %3381 = dma.vmem_to_hbm [thread:$0]  (%p5623_p0), %s5443_s13, 8192, %s5441_s30, %s2985_s28, %s3930_s17, %s3930_s17, %s3931_s9  }
 0x4a8 PF: > { %s3014_s29 = sand.u32 1, %s3908_s24   ;;  %p5624_p5 = scmp.ne.s32.totalorder %s5543_s8, 0 }
 0x4a9   : > { %p5625_p9 = scmp.ge.s32.totalorder %s3920_s27, 2  ;;  %s3015_s10 = scalar_lea.sflag [#allocation4], %s3014_s29 }
 0x4ab   : > { %p3395_p12 = pnand %p5625_p9, %p5624_p5 }
 0x4ad   : > { %3903 = dma.done.wait (!%p3395_p12), %s3015_s10, 8192  }
 0x4ae   : > { %3905 = vsyncadd (!%p3395_p12), %s3015_s10, 4294959104  ;;  %p21_p1 = scmp.ge.s32.totalorder %s4085_s16, 4   ;;  %s5626_s24 = smov %s3912_s25 }
 0x4af   : > { %s5627_s25 = smov %s3916_s26  ;;  %s5628_s26 = smov %s4094_s19 }
 0x4b0   : > { %s5629_s27 = smov %s4085_s16  ;;  %23 = sbr.rel (!%p21_p1) target bundleno = 6 (0x6), region = 101 }
 0x4b7   :  { %3020 = vsyncpa [#allocation3], 1 }
 0x4b8   :  { %3022 = vsyncpa [#allocation3 + $0x1], 1 }
 0x4b9   :  { %3023 = vsyncpa [#allocation6], 1 }
 0x4ba   :  { %3024 = vsyncpa [#allocation4], 1 }
 0x4bb   :  { %3026 = vsyncpa [#allocation4 + $0x1], 1 }

</bundles_post_ra>
